<compile_context>
chip_gen: v7x
topology: tpu7x:2x2x1
jax: 0.10.0
libtpu: 0.0.40
codegen_flags: <defaults>
</compile_context>

<pallas_src>
import functools

import jax
import jax.numpy as jnp
from jax.experimental import pallas as pl
from jax.experimental.pallas import tpu as pltpu


def _round_up(a, m):
    return ((a + m - 1) // m) * m


def residual_tcn_kernel(x_hbm, w1_ref, w2_ref, wd_ref, vec_ref, o_ref,
                        x_vmem, sem, *, TL, d, K, L):
    """One (batch, time-tile) per grid step.

    x_hbm  : (N, L_tiles + 4d, Cin_p)  padded NLC input, left in HBM (pl.ANY)
    w1_ref : (K, Cin_p, Cout_p)        per-tap conv1 weights
    w2_ref : (K, Cout_p, Cout_p)       per-tap conv2 weights
    wd_ref : (Cin_p, Cout_p)           1x1 downsample weights
    vec_ref: (8, Cout_p) f32           rows: s1, t1, s2, t2, bd (BN + bias folded)
    o_ref  : (1, TL, Cout_p)
    x_vmem : (2, TL + 4d, Cin_p)       double-buffered haloed input window
    sem    : (2,) DMA semaphores, one per slot
    """
    n = pl.program_id(0)
    t = pl.program_id(1)
    T = pl.num_programs(1)
    H = 2 * d                    # input halo per side
    W = TL + 2 * H               # haloed window rows
    L1 = TL + 2 * d              # hidden rows needed by conv2

    def fetch(t_idx, slot):
        start = t_idx * TL
        if not isinstance(start, int):
            start = pl.multiple_of(start, TL)
        pltpu.make_async_copy(x_hbm.at[n, pl.ds(start, W), :],
                              x_vmem.at[slot], sem.at[slot]).start()

    slot = jax.lax.rem(t, 2)

    # First tile of this batch row: blocking fetch (exposed once per batch row).
    @pl.when(t == 0)
    def _():
        fetch(0, 0)

    # Prefetch the next tile of the same batch row into the other slot.  The
    # time axis is "arbitrary", so (n, t+1) always runs next on this core.
    @pl.when(t + 1 < T)
    def _():
        fetch(t + 1, 1 - slot)

    # Wait for the current tile's DMA (same shapes as the matching start).
    pltpu.make_async_copy(x_hbm.at[n, pl.ds(0, W), :],
                          x_vmem.at[slot], sem.at[slot]).wait()

    x = x_vmem[slot]             # (W, Cin_p), compute dtype (bf16 or f32)

    s1 = vec_ref[0:1, :]
    t1 = vec_ref[1:2, :]
    s2 = vec_ref[2:3, :]
    t2 = vec_ref[3:4, :]
    bd = vec_ref[4:5, :]

    # --- residual path: 1x1 conv == channel matmul on the centre TL rows ----
    res = jnp.dot(x[H:H + TL, :], wd_ref[...],
                  preferred_element_type=jnp.float32) + bd

    # --- conv1: K per-tap matmuls accumulated in f32 + folded BN1 + ReLU ----
    h1 = jnp.dot(x[0:L1, :], w1_ref[0], preferred_element_type=jnp.float32)
    for k in range(1, K):
        h1 = h1 + jnp.dot(x[k * d:k * d + L1, :], w1_ref[k],
                          preferred_element_type=jnp.float32)
    h1 = jnp.maximum(h1 * s1 + t1, 0.0)
    # dropout1: identity at inference.

    # conv2 zero-pads the *hidden* activation at the sequence boundaries, so
    # halo rows outside [0, L) must be exactly zero (not conv1-of-padding).
    g = t * TL - d + jax.lax.broadcasted_iota(jnp.int32, (L1, 1), 0)
    h1 = jnp.where((g >= 0) & (g < L), h1, 0.0)
    h1c = h1.astype(w2_ref.dtype)

    # --- conv2: K per-tap matmuls + folded BN2 + ReLU -------------------------
    h2 = jnp.dot(h1c[0:TL, :], w2_ref[0], preferred_element_type=jnp.float32)
    for k in range(1, K):
        h2 = h2 + jnp.dot(h1c[k * d:k * d + TL, :], w2_ref[k],
                          preferred_element_type=jnp.float32)
    h2 = jnp.maximum(h2 * s2 + t2, 0.0)
    # dropout2: identity at inference.

    o_ref[0] = (h2 + res).astype(o_ref.dtype)


def _pick_time_tile(L, cin_p, cout_p, K, d, itemsize,
                    budget_bytes=24 * 1024 * 1024, max_tile=512):
    """Largest 16-aligned time tile whose per-step working set fits the budget."""
    # Weight blocks are double-buffered by the BlockSpec pipeline (constant
    # index maps -> fetched once, but both buffers are allocated).
    w_bytes = (2 * (K * cin_p * cout_p + K * cout_p * cout_p + cin_p * cout_p)
               * itemsize + 2 * 8 * cout_p * 4)
    tl = _round_up(min(max_tile, L), 16)
    while tl > 16:
        l1 = tl + 2 * d
        step_bytes = (2 * (tl + 4 * d) * cin_p * itemsize   # x window, 2 slots
                      + 2 * l1 * cout_p * 4                 # h1 (f32) + cast copy
                      + 2 * tl * cout_p * 4                 # h2 + res (f32)
                      + 2 * tl * cout_p * 4)                # out, double-buffered
        if w_bytes + step_bytes <= budget_bytes:
            break
        tl = _round_up(max(16, tl // 2), 16)
    return max(tl, 16)


def residual_tcn_block(x, params, *, dilation=1, kernel_size=3, eps=1e-5,
                       compute_dtype=jnp.bfloat16, out_dtype=jnp.float32,
                       time_tile=512):
    """x: (N, C_in, L) in PyTorch NCL layout.  Returns (N, C_out, L), out_dtype."""
    N, cin, L = x.shape
    cout = params["w1"].shape[0]
    K, d = kernel_size, dilation
    # padding=dilation gives 'same' length (and a valid residual add) only for K==3.
    assert K == 3, "ResidualTCNBlock semantics require kernel_size == 3"

    # ---- tiling choices (VMEM-budgeted) -------------------------------------
    cin_p = _round_up(cin, 128)
    cout_p = _round_up(cout, 128)
    itemsize = jnp.dtype(compute_dtype).itemsize
    TL = _pick_time_tile(L, cin_p, cout_p, K, d, itemsize, max_tile=time_tile)
    T = -(-L // TL)
    L_tiles = T * TL
    H = 2 * d                                    # input halo per side

    # ---- plain-JAX glue: layout, channel/time padding, parameter folding ----
    # Single pad pass; the haloed windows are DMA'd straight out of this HBM
    # array by the kernel (no duplicated/stacked haloed copy in HBM).
    x_nlc = jnp.transpose(x, (0, 2, 1)).astype(compute_dtype)          # (N, L, Cin)
    xp = jnp.pad(x_nlc, ((0, 0), (H, H + L_tiles - L), (0, cin_p - cin)))

    # per-tap weights: (K, C, Cout), channel-padded
    w1_t = jnp.transpose(params["w1"], (2, 1, 0))                      # (K, Cin, Cout)
    w1_p = jnp.pad(w1_t, ((0, 0), (0, cin_p - cin),
                          (0, cout_p - cout))).astype(compute_dtype)
    w2_t = jnp.transpose(params["w2"], (2, 1, 0))                      # (K, Cout, Cout)
    w2_p = jnp.pad(w2_t, ((0, 0), (0, cout_p - cout),
                          (0, cout_p - cout))).astype(compute_dtype)

    if params.get("wd") is not None:
        wd = params["wd"][:, :, 0].T                                   # (Cin, Cout)
        bd = params["bd"]
    else:                                                              # Identity downsample
        assert cin == cout
        wd = jnp.eye(cin, dtype=jnp.float32)
        bd = jnp.zeros((cout,), jnp.float32)
    wd_p = jnp.pad(wd, ((0, cin_p - cin), (0, cout_p - cout))).astype(compute_dtype)

    def fold_bn(b, g, be, rm, rv):
        # (h + b) * s + (be - rm*s)  ==  h*s + (b*s + be - rm*s)
        s = g / jnp.sqrt(rv + eps)
        return s, b * s + be - rm * s

    s1, t1 = fold_bn(params["b1"], params["g1"], params["be1"],
                     params["rm1"], params["rv1"])
    s2, t2 = fold_bn(params["b2"], params["g2"], params["be2"],
                     params["rm2"], params["rv2"])
    # pack the five per-channel vectors into one aligned (8, Cout_p) tile
    vecs = jnp.zeros((8, cout_p), jnp.float32)
    vecs = vecs.at[0, :cout].set(s1).at[1, :cout].set(t1)
    vecs = vecs.at[2, :cout].set(s2).at[3, :cout].set(t2)
    vecs = vecs.at[4, :cout].set(bd.astype(jnp.float32))

    kernel = functools.partial(residual_tcn_kernel, TL=TL, d=d, K=K, L=L)

    out = pl.pallas_call(
        kernel,
        out_shape=jax.ShapeDtypeStruct((N, L_tiles, cout_p), out_dtype),
        grid=(N, T),
        in_specs=[
            pl.BlockSpec(memory_space=pl.ANY),                            # x (HBM)
            pl.BlockSpec((K, cin_p, cout_p), lambda n, t: (0, 0, 0)),     # w1 taps
            pl.BlockSpec((K, cout_p, cout_p), lambda n, t: (0, 0, 0)),    # w2 taps
            pl.BlockSpec((cin_p, cout_p), lambda n, t: (0, 0)),           # wd
            pl.BlockSpec((8, cout_p), lambda n, t: (0, 0)),               # packed vecs
        ],
        out_specs=pl.BlockSpec((1, TL, cout_p), lambda n, t: (n, t, 0)),
        scratch_shapes=[
            pltpu.VMEM((2, TL + 2 * H, cin_p), compute_dtype),
            pltpu.SemaphoreType.DMA((2,)),
        ],
        # Time axis must stay "arbitrary": the in-kernel double buffering
        # assumes (n, t+1) runs right after (n, t) on the same core.
        compiler_params=pltpu.CompilerParams(
            dimension_semantics=("parallel", "arbitrary"),
            vmem_limit_bytes=48 * 1024 * 1024),
    )(xp, w1_p, w2_p, wd_p, vecs)

    # strip channel/time padding, back to PyTorch NCL layout
    return jnp.transpose(out[:, :L, :cout], (0, 2, 1))


# ---------------------------- pure-JAX reference -----------------------------
def reference_forward(x, params, *, dilation=1, eps=1e-5):
    def conv(x, w, b, dil, pad):
        y = jax.lax.conv_general_dilated(
            x, w, window_strides=(1,), padding=[(pad, pad)],
            rhs_dilation=(dil,), dimension_numbers=("NCH", "OIH", "NCH"))
        return y + b[None, :, None]

    def bn(h, g, be, rm, rv):
        s = g / jnp.sqrt(rv + eps)
        return h * s[None, :, None] + (be - rm * s)[None, :, None]

    res = conv(x, params["wd"], params["bd"], 1, 0)
    h = conv(x, params["w1"], params["b1"], dilation, dilation)
    h = jnp.maximum(bn(h, params["g1"], params["be1"], params["rm1"], params["rv1"]), 0.0)
    h = conv(h, params["w2"], params["b2"], dilation, dilation)
    h = jnp.maximum(bn(h, params["g2"], params["be2"], params["rm2"], params["rv2"]), 0.0)
    return h + res


def make_params(key, cin, cout, kernel_size=3):
    ks = jax.random.split(key, 16)
    u = lambda k, shape, s: s * jax.random.uniform(k, shape, jnp.float32, -1.0, 1.0)
    f1 = 1.0 / jnp.sqrt(cin * kernel_size)
    f2 = 1.0 / jnp.sqrt(cout * kernel_size)
    fd = 1.0 / jnp.sqrt(cin)
    return dict(
        w1=u(ks[0], (cout, cin, kernel_size), f1), b1=u(ks[1], (cout,), f1),
        g1=1.0 + u(ks[2], (cout,), 0.1), be1=u(ks[3], (cout,), 0.1),
        rm1=u(ks[4], (cout,), 0.1), rv1=1.0 + jnp.abs(u(ks[5], (cout,), 0.1)),
        w2=u(ks[6], (cout, cout, kernel_size), f2), b2=u(ks[7], (cout,), f2),
        g2=1.0 + u(ks[8], (cout,), 0.1), be2=u(ks[9], (cout,), 0.1),
        rm2=u(ks[10], (cout,), 0.1), rv2=1.0 + jnp.abs(u(ks[11], (cout,), 0.1)),
        wd=u(ks[12], (cout, cin, 1), fd), bd=u(ks[13], (cout,), fd),
    )


if __name__ == "__main__":
    # Use accurate f32 matmuls in both kernel and reference for the f32 check.
    jax.config.update("jax_default_matmul_precision", "highest")

    key = jax.random.PRNGKey(0)
    k_x, k_p = jax.random.split(key)

    N, cin, cout, L = 2, 4, 8, 16
    kernel_size = 3

    x = jax.random.normal(k_x, (N, cin, L), jnp.float32)
    params = make_params(k_p, cin, cout, kernel_size)

    for dil in (1, 2):
        ref = reference_forward(x, params, dilation=dil)

        out_f32 = residual_tcn_block(x, params, dilation=dil, kernel_size=kernel_size,
                                     compute_dtype=jnp.float32, out_dtype=jnp.float32)
        out_f32 = jax.block_until_ready(out_f32)
        assert out_f32.shape == (N, cout, L)
        assert jnp.allclose(out_f32, ref, atol=1e-3, rtol=1e-3), f"f32 mismatch (d={dil})"

        out_bf16 = residual_tcn_block(x, params, dilation=dil, kernel_size=kernel_size,
                                      compute_dtype=jnp.bfloat16, out_dtype=jnp.bfloat16)
        out_bf16 = jax.block_until_ready(out_bf16)
        assert out_bf16.shape == (N, cout, L)
        assert jnp.allclose(out_bf16.astype(jnp.float32), ref,
                            atol=5e-2, rtol=5e-2), f"bf16 mismatch (d={dil})"

    print("KERNEL_OK")
</pallas_src>

<mosaic_0001>
module attributes {stable_mosaic.version = 11 : i64} {
  func.func @residual_tcn_kernel(%arg0: i32, %arg1: i32, %arg2: memref<2x20x128xf32, #tpu.memory_space<any>>, %arg3: memref<3x128x128xf32, #tpu.memory_space<vmem>>, %arg4: memref<3x128x128xf32, #tpu.memory_space<vmem>>, %arg5: memref<128x128xf32, #tpu.memory_space<vmem>>, %arg6: memref<8x128xf32, #tpu.memory_space<vmem>>, %arg7: memref<1x16x128xf32, #tpu.memory_space<vmem>>, %arg8: memref<2x20x128xf32, #tpu.memory_space<vmem>>, %arg9: memref<2x!tpu.dma_semaphore, #tpu.memory_space<semaphore_mem>>) attributes {dimension_semantics = [#tpu.dimension_semantics<parallel>, #tpu.dimension_semantics<arbitrary>], iteration_bounds = array<i64: 2, 1>, scalar_prefetch = 0 : i64, scratch_operands = 2 : i64, tpu.core_type = #tpu.core_type<tc>, window_params = [{}, {pipeline_mode = #tpu.pipeline_mode<synchronous>, transform_indices = @transform_1, window_bounds = array<i64: 3, 128, 128>}, {pipeline_mode = #tpu.pipeline_mode<synchronous>, transform_indices = @transform_2, window_bounds = array<i64: 3, 128, 128>}, {pipeline_mode = #tpu.pipeline_mode<synchronous>, transform_indices = @transform_3, window_bounds = array<i64: 128, 128>}, {pipeline_mode = #tpu.pipeline_mode<synchronous>, transform_indices = @transform_4, window_bounds = array<i64: 8, 128>}, {transform_indices = @transform_5, window_bounds = array<i64: 1, 16, 128>}]} {
    %c2_i32 = arith.constant 2 : i32
    %0 = arith.remsi %arg1, %c2_i32 : i32
    %c0_i32 = arith.constant 0 : i32
    %1 = arith.cmpi eq, %arg1, %c0_i32 : i32
    %2 = arith.extui %1 : i1 to i32
    %c0_i32_0 = arith.constant 0 : i32
    %3 = arith.cmpi ne, %2, %c0_i32_0 : i32
    scf.if %3 {
      %c0_i32_49 = arith.constant 0 : i32
      %c0_i32_50 = arith.constant 0 : i32
      %c0_i32_51 = arith.constant 0 : i32
      %c0_i32_52 = arith.constant 0 : i32
      %85 = tpu.memref_slice %arg2[%arg0, %c0_i32_51, %c0_i32_52] : memref<2x20x128xf32, #tpu.memory_space<any>> -> memref<1x20x128xf32, #tpu.memory_space<any>>
      %86 = tpu.memref_squeeze %85 : memref<1x20x128xf32, #tpu.memory_space<any>> -> memref<20x128xf32, #tpu.memory_space<any>>
      %c0_i32_53 = arith.constant 0 : i32
      %c0_i32_54 = arith.constant 0 : i32
      %87 = tpu.memref_slice %arg8[%c0_i32_49, %c0_i32_53, %c0_i32_54] : memref<2x20x128xf32, #tpu.memory_space<vmem>> -> memref<1x20x128xf32, #tpu.memory_space<vmem>>
      %88 = tpu.memref_squeeze %87 : memref<1x20x128xf32, #tpu.memory_space<vmem>> -> memref<20x128xf32, #tpu.memory_space<vmem>>
      %89 = tpu.memref_slice %arg9[%c0_i32_50] : memref<2x!tpu.dma_semaphore, #tpu.memory_space<semaphore_mem>> -> memref<1x!tpu.dma_semaphore, #tpu.memory_space<semaphore_mem>>
      %90 = tpu.memref_squeeze %89 : memref<1x!tpu.dma_semaphore, #tpu.memory_space<semaphore_mem>> -> memref<!tpu.dma_semaphore, #tpu.memory_space<semaphore_mem>>
      tpu.enqueue_dma source(%86 : memref<20x128xf32, #tpu.memory_space<any>>) target(%88 : memref<20x128xf32, #tpu.memory_space<vmem>>) target_semaphore(%90 : memref<!tpu.dma_semaphore, #tpu.memory_space<semaphore_mem>>)
    } else {
    }
    %c1_i32 = arith.constant 1 : i32
    %4 = arith.addi %arg1, %c1_i32 : i32
    %c1_i32_1 = arith.constant 1 : i32
    %5 = arith.cmpi slt, %4, %c1_i32_1 : i32
    %6 = arith.extui %5 : i1 to i32
    %c0_i32_2 = arith.constant 0 : i32
    %7 = arith.cmpi ne, %6, %c0_i32_2 : i32
    scf.if %7 {
      %c1_i32_49 = arith.constant 1 : i32
      %85 = arith.addi %arg1, %c1_i32_49 : i32
      %c1_i32_50 = arith.constant 1 : i32
      %86 = arith.subi %c1_i32_50, %0 : i32
      %c16_i32_51 = arith.constant 16 : i32
      %87 = arith.muli %85, %c16_i32_51 : i32
      %88 = tpu.assume_multiple %87, 16 : i32
      %c0_i32_52 = arith.constant 0 : i32
      %89 = tpu.memref_slice %arg2[%arg0, %88, %c0_i32_52] : memref<2x20x128xf32, #tpu.memory_space<any>> -> memref<1x20x128xf32, #tpu.memory_space<any>>
      %90 = tpu.memref_squeeze %89 : memref<1x20x128xf32, #tpu.memory_space<any>> -> memref<20x128xf32, #tpu.memory_space<any>>
      %c0_i32_53 = arith.constant 0 : i32
      %c0_i32_54 = arith.constant 0 : i32
      %91 = tpu.memref_slice %arg8[%86, %c0_i32_53, %c0_i32_54] : memref<2x20x128xf32, #tpu.memory_space<vmem>> -> memref<1x20x128xf32, #tpu.memory_space<vmem>>
      %92 = tpu.memref_squeeze %91 : memref<1x20x128xf32, #tpu.memory_space<vmem>> -> memref<20x128xf32, #tpu.memory_space<vmem>>
      %93 = tpu.memref_slice %arg9[%86] : memref<2x!tpu.dma_semaphore, #tpu.memory_space<semaphore_mem>> -> memref<1x!tpu.dma_semaphore, #tpu.memory_space<semaphore_mem>>
      %94 = tpu.memref_squeeze %93 : memref<1x!tpu.dma_semaphore, #tpu.memory_space<semaphore_mem>> -> memref<!tpu.dma_semaphore, #tpu.memory_space<semaphore_mem>>
      tpu.enqueue_dma source(%90 : memref<20x128xf32, #tpu.memory_space<any>>) target(%92 : memref<20x128xf32, #tpu.memory_space<vmem>>) target_semaphore(%94 : memref<!tpu.dma_semaphore, #tpu.memory_space<semaphore_mem>>)
    } else {
    }
    %c0_i32_3 = arith.constant 0 : i32
    %c0_i32_4 = arith.constant 0 : i32
    %8 = tpu.memref_slice %arg2[%arg0, %c0_i32_3, %c0_i32_4] : memref<2x20x128xf32, #tpu.memory_space<any>> -> memref<1x20x128xf32, #tpu.memory_space<any>>
    %9 = tpu.memref_squeeze %8 : memref<1x20x128xf32, #tpu.memory_space<any>> -> memref<20x128xf32, #tpu.memory_space<any>>
    %c0_i32_5 = arith.constant 0 : i32
    %c0_i32_6 = arith.constant 0 : i32
    %10 = tpu.memref_slice %arg8[%0, %c0_i32_5, %c0_i32_6] : memref<2x20x128xf32, #tpu.memory_space<vmem>> -> memref<1x20x128xf32, #tpu.memory_space<vmem>>
    %11 = tpu.memref_squeeze %10 : memref<1x20x128xf32, #tpu.memory_space<vmem>> -> memref<20x128xf32, #tpu.memory_space<vmem>>
    %12 = tpu.memref_slice %arg9[%0] : memref<2x!tpu.dma_semaphore, #tpu.memory_space<semaphore_mem>> -> memref<1x!tpu.dma_semaphore, #tpu.memory_space<semaphore_mem>>
    %13 = tpu.memref_squeeze %12 : memref<1x!tpu.dma_semaphore, #tpu.memory_space<semaphore_mem>> -> memref<!tpu.dma_semaphore, #tpu.memory_space<semaphore_mem>>
    tpu.wait_dma2 semaphore(%13 : memref<!tpu.dma_semaphore, #tpu.memory_space<semaphore_mem>>) src(%9 : memref<20x128xf32, #tpu.memory_space<any>>) dst(%11 : memref<20x128xf32, #tpu.memory_space<vmem>>)
    %14 = arith.index_cast %0 : i32 to index
    %c0 = arith.constant 0 : index
    %c0_7 = arith.constant 0 : index
    %15 = vector.load %arg8[%14, %c0, %c0_7] : memref<2x20x128xf32, #tpu.memory_space<vmem>>, vector<1x20x128xf32>
    %16 = vector.shape_cast %15 : vector<1x20x128xf32> to vector<20x128xf32>
    %c0_8 = arith.constant 0 : index
    %c0_9 = arith.constant 0 : index
    %17 = vector.load %arg6[%c0_8, %c0_9] : memref<8x128xf32, #tpu.memory_space<vmem>>, vector<1x128xf32>
    %c1 = arith.constant 1 : index
    %c0_10 = arith.constant 0 : index
    %18 = vector.load %arg6[%c1, %c0_10] : memref<8x128xf32, #tpu.memory_space<vmem>>, vector<1x128xf32>
    %c2 = arith.constant 2 : index
    %c0_11 = arith.constant 0 : index
    %19 = vector.load %arg6[%c2, %c0_11] : memref<8x128xf32, #tpu.memory_space<vmem>>, vector<1x128xf32>
    %c3 = arith.constant 3 : index
    %c0_12 = arith.constant 0 : index
    %20 = vector.load %arg6[%c3, %c0_12] : memref<8x128xf32, #tpu.memory_space<vmem>>, vector<1x128xf32>
    %c4 = arith.constant 4 : index
    %c0_13 = arith.constant 0 : index
    %21 = vector.load %arg6[%c4, %c0_13] : memref<8x128xf32, #tpu.memory_space<vmem>>, vector<1x128xf32>
    %22 = vector.extract_strided_slice %16 {offsets = [2, 0], sizes = [16, 128], strides = [1, 1]} : vector<20x128xf32> to vector<16x128xf32>
    %c0_14 = arith.constant 0 : index
    %c0_15 = arith.constant 0 : index
    %23 = vector.load %arg5[%c0_14, %c0_15] : memref<128x128xf32, #tpu.memory_space<vmem>>, vector<128x128xf32>
    %cst = arith.constant dense<0.000000e+00> : vector<16x128xf32>
    %24 = tpu.matmul %22, %23, %cst {dimension_numbers = #tpu.dot_dimension_numbers<[1], [0], [0], [1], [0, 0, 1, 1], [], []>, precision = #tpu.contract_precision<fp32>} : vector<16x128xf32>, vector<128x128xf32>, vector<16x128xf32> -> vector<16x128xf32>
    %25 = vector.broadcast %21 : vector<1x128xf32> to vector<16x128xf32>
    %26 = arith.addf %24, %25 : vector<16x128xf32>
    %27 = vector.extract_strided_slice %16 {offsets = [0, 0], sizes = [18, 128], strides = [1, 1]} : vector<20x128xf32> to vector<18x128xf32>
    %c0_16 = arith.constant 0 : index
    %c0_17 = arith.constant 0 : index
    %c0_18 = arith.constant 0 : index
    %28 = vector.load %arg3[%c0_16, %c0_17, %c0_18] : memref<3x128x128xf32, #tpu.memory_space<vmem>>, vector<1x128x128xf32>
    %29 = vector.shape_cast %28 : vector<1x128x128xf32> to vector<128x128xf32>
    %cst_19 = arith.constant dense<0.000000e+00> : vector<18x128xf32>
    %30 = tpu.matmul %27, %29, %cst_19 {dimension_numbers = #tpu.dot_dimension_numbers<[1], [0], [0], [1], [0, 0, 1, 1], [], []>, precision = #tpu.contract_precision<fp32>} : vector<18x128xf32>, vector<128x128xf32>, vector<18x128xf32> -> vector<18x128xf32>
    %31 = vector.extract_strided_slice %16 {offsets = [1, 0], sizes = [18, 128], strides = [1, 1]} : vector<20x128xf32> to vector<18x128xf32>
    %c1_20 = arith.constant 1 : index
    %c0_21 = arith.constant 0 : index
    %c0_22 = arith.constant 0 : index
    %32 = vector.load %arg3[%c1_20, %c0_21, %c0_22] : memref<3x128x128xf32, #tpu.memory_space<vmem>>, vector<1x128x128xf32>
    %33 = vector.shape_cast %32 : vector<1x128x128xf32> to vector<128x128xf32>
    %cst_23 = arith.constant dense<0.000000e+00> : vector<18x128xf32>
    %34 = tpu.matmul %31, %33, %cst_23 {dimension_numbers = #tpu.dot_dimension_numbers<[1], [0], [0], [1], [0, 0, 1, 1], [], []>, precision = #tpu.contract_precision<fp32>} : vector<18x128xf32>, vector<128x128xf32>, vector<18x128xf32> -> vector<18x128xf32>
    %35 = arith.addf %30, %34 : vector<18x128xf32>
    %36 = vector.extract_strided_slice %16 {offsets = [2, 0], sizes = [18, 128], strides = [1, 1]} : vector<20x128xf32> to vector<18x128xf32>
    %c2_24 = arith.constant 2 : index
    %c0_25 = arith.constant 0 : index
    %c0_26 = arith.constant 0 : index
    %37 = vector.load %arg3[%c2_24, %c0_25, %c0_26] : memref<3x128x128xf32, #tpu.memory_space<vmem>>, vector<1x128x128xf32>
    %38 = vector.shape_cast %37 : vector<1x128x128xf32> to vector<128x128xf32>
    %cst_27 = arith.constant dense<0.000000e+00> : vector<18x128xf32>
    %39 = tpu.matmul %36, %38, %cst_27 {dimension_numbers = #tpu.dot_dimension_numbers<[1], [0], [0], [1], [0, 0, 1, 1], [], []>, precision = #tpu.contract_precision<fp32>} : vector<18x128xf32>, vector<128x128xf32>, vector<18x128xf32> -> vector<18x128xf32>
    %40 = arith.addf %35, %39 : vector<18x128xf32>
    %41 = vector.broadcast %17 : vector<1x128xf32> to vector<18x128xf32>
    %42 = arith.mulf %40, %41 : vector<18x128xf32>
    %43 = vector.broadcast %18 : vector<1x128xf32> to vector<18x128xf32>
    %44 = arith.addf %42, %43 : vector<18x128xf32>
    %cst_28 = arith.constant 0.000000e+00 : f32
    %45 = vector.broadcast %cst_28 : f32 to vector<18x128xf32>
    %46 = arith.maximumf %44, %45 : vector<18x128xf32>
    %c16_i32 = arith.constant 16 : i32
    %47 = arith.muli %arg1, %c16_i32 : i32
    %c1_i32_29 = arith.constant 1 : i32
    %48 = arith.subi %47, %c1_i32_29 : i32
    %49 = tpu.iota {dimensions = array<i32: 0>} : vector<18x1xi32>
    %50 = vector.broadcast %48 : i32 to vector<18x1xi32>
    %51 = arith.addi %50, %49 : vector<18x1xi32>
    %c0_i32_30 = arith.constant 0 : i32
    %52 = vector.broadcast %c0_i32_30 : i32 to vector<18x1xi32>
    %53 = arith.cmpi sge, %51, %52 : vector<18x1xi32>
    %c16_i32_31 = arith.constant 16 : i32
    %54 = vector.broadcast %c16_i32_31 : i32 to vector<18x1xi32>
    %55 = arith.cmpi slt, %51, %54 : vector<18x1xi32>
    %56 = arith.andi %53, %55 : vector<18x1xi1>
    %cst_32 = arith.constant 0.000000e+00 : f32
    %57 = vector.shape_cast %56 : vector<18x1xi1> to vector<18x1xi1>
    %58 = vector.broadcast %57 : vector<18x1xi1> to vector<18x128xi1>
    %59 = vector.broadcast %cst_32 : f32 to vector<18x128xf32>
    %60 = arith.select %58, %46, %59 : vector<18x128xi1>, vector<18x128xf32>
    %61 = vector.extract_strided_slice %60 {offsets = [0, 0], sizes = [16, 128], strides = [1, 1]} : vector<18x128xf32> to vector<16x128xf32>
    %c0_33 = arith.constant 0 : index
    %c0_34 = arith.constant 0 : index
    %c0_35 = arith.constant 0 : index
    %62 = vector.load %arg4[%c0_33, %c0_34, %c0_35] : memref<3x128x128xf32, #tpu.memory_space<vmem>>, vector<1x128x128xf32>
    %63 = vector.shape_cast %62 : vector<1x128x128xf32> to vector<128x128xf32>
    %cst_36 = arith.constant dense<0.000000e+00> : vector<16x128xf32>
    %64 = tpu.matmul %61, %63, %cst_36 {dimension_numbers = #tpu.dot_dimension_numbers<[1], [0], [0], [1], [0, 0, 1, 1], [], []>, precision = #tpu.contract_precision<fp32>} : vector<16x128xf32>, vector<128x128xf32>, vector<16x128xf32> -> vector<16x128xf32>
    %65 = vector.extract_strided_slice %60 {offsets = [1, 0], sizes = [16, 128], strides = [1, 1]} : vector<18x128xf32> to vector<16x128xf32>
    %c1_37 = arith.constant 1 : index
    %c0_38 = arith.constant 0 : index
    %c0_39 = arith.constant 0 : index
    %66 = vector.load %arg4[%c1_37, %c0_38, %c0_39] : memref<3x128x128xf32, #tpu.memory_space<vmem>>, vector<1x128x128xf32>
    %67 = vector.shape_cast %66 : vector<1x128x128xf32> to vector<128x128xf32>
    %cst_40 = arith.constant dense<0.000000e+00> : vector<16x128xf32>
    %68 = tpu.matmul %65, %67, %cst_40 {dimension_numbers = #tpu.dot_dimension_numbers<[1], [0], [0], [1], [0, 0, 1, 1], [], []>, precision = #tpu.contract_precision<fp32>} : vector<16x128xf32>, vector<128x128xf32>, vector<16x128xf32> -> vector<16x128xf32>
    %69 = arith.addf %64, %68 : vector<16x128xf32>
    %70 = vector.extract_strided_slice %60 {offsets = [2, 0], sizes = [16, 128], strides = [1, 1]} : vector<18x128xf32> to vector<16x128xf32>
    %c2_41 = arith.constant 2 : index
    %c0_42 = arith.constant 0 : index
    %c0_43 = arith.constant 0 : index
    %71 = vector.load %arg4[%c2_41, %c0_42, %c0_43] : memref<3x128x128xf32, #tpu.memory_space<vmem>>, vector<1x128x128xf32>
    %72 = vector.shape_cast %71 : vector<1x128x128xf32> to vector<128x128xf32>
    %cst_44 = arith.constant dense<0.000000e+00> : vector<16x128xf32>
    %73 = tpu.matmul %70, %72, %cst_44 {dimension_numbers = #tpu.dot_dimension_numbers<[1], [0], [0], [1], [0, 0, 1, 1], [], []>, precision = #tpu.contract_precision<fp32>} : vector<16x128xf32>, vector<128x128xf32>, vector<16x128xf32> -> vector<16x128xf32>
    %74 = arith.addf %69, %73 : vector<16x128xf32>
    %75 = vector.broadcast %19 : vector<1x128xf32> to vector<16x128xf32>
    %76 = arith.mulf %74, %75 : vector<16x128xf32>
    %77 = vector.broadcast %20 : vector<1x128xf32> to vector<16x128xf32>
    %78 = arith.addf %76, %77 : vector<16x128xf32>
    %cst_45 = arith.constant 0.000000e+00 : f32
    %79 = vector.broadcast %cst_45 : f32 to vector<16x128xf32>
    %80 = arith.maximumf %78, %79 : vector<16x128xf32>
    %81 = arith.addf %80, %26 : vector<16x128xf32>
    %c0_46 = arith.constant 0 : index
    %c0_47 = arith.constant 0 : index
    %c0_48 = arith.constant 0 : index
    %82 = vector.load %arg7[%c0_46, %c0_47, %c0_48] : memref<1x16x128xf32, #tpu.memory_space<vmem>>, vector<1x16x128xf32>
    %83 = vector.shape_cast %82 : vector<1x16x128xf32> to vector<16x128xf32>
    %84 = vector.shape_cast %81 : vector<16x128xf32> to vector<1x16x128xf32>
    tpu.vector_store %arg7[%c0_46, %c0_47, %c0_48], %84 {strides = array<i32>} : memref<1x16x128xf32, #tpu.memory_space<vmem>>, vector<1x16x128xf32>,
    return
  }
  func.func @transform_1(%arg0: i32, %arg1: i32) -> (i32, i32, i32) {
    %c0_i32 = arith.constant 0 : i32
    %c0_i32_0 = arith.constant 0 : i32
    %c0_i32_1 = arith.constant 0 : i32
    %c0_i32_2 = arith.constant 0 : i32
    return %c0_i32, %c0_i32_0, %c0_i32_1 : i32, i32, i32
  }
  func.func @transform_2(%arg0: i32, %arg1: i32) -> (i32, i32, i32) {
    %c0_i32 = arith.constant 0 : i32
    %c0_i32_0 = arith.constant 0 : i32
    %c0_i32_1 = arith.constant 0 : i32
    %c0_i32_2 = arith.constant 0 : i32
    return %c0_i32, %c0_i32_0, %c0_i32_1 : i32, i32, i32
  }
  func.func @transform_3(%arg0: i32, %arg1: i32) -> (i32, i32) {
    %c0_i32 = arith.constant 0 : i32
    %c0_i32_0 = arith.constant 0 : i32
    %c0_i32_1 = arith.constant 0 : i32
    return %c0_i32, %c0_i32_0 : i32, i32
  }
  func.func @transform_4(%arg0: i32, %arg1: i32) -> (i32, i32) {
    %c0_i32 = arith.constant 0 : i32
    %c0_i32_0 = arith.constant 0 : i32
    %c0_i32_1 = arith.constant 0 : i32
    return %c0_i32, %c0_i32_0 : i32, i32
  }
  func.func @transform_5(%arg0: i32, %arg1: i32) -> (i32, i32, i32) {
    %c0_i32 = arith.constant 0 : i32
    %c0_i32_0 = arith.constant 0 : i32
    return %arg0, %arg1, %c0_i32 : i32, i32, i32
  }
}

</mosaic_0001>

<bundles_post_ra>
// kernel: tpu_custom_call.1
= control target key start
LH: loop header
LB: loop body
LE: loop exit
PB: predicated region body
PF: predicated region fallthrough
CT: control target
= control target key end

     0   :  { %s12116_s0 = inlined_call_operand.vmem [shape: f32[2,20,128], index: 0, kind: input, shape index: {}]   ;;  %s12117_s1 = inlined_call_operand.hbm [shape: f32[3,128,128], index: 1, kind: input, shape index: {}]   ;;  %s12118_s2 = inlined_call_operand.hbm [shape: f32[3,128,128], index: 2, kind: input, shape index: {}]   ;;  %s12119_s3 = inlined_call_operand.hbm [shape: f32[128,128], index: 3, kind: input, shape index: {}]   ;;  %s12120_s4 = inlined_call_operand.vmem [shape: f32[8,128], index: 4, kind: input, shape index: {}]   ;;  %s12121_s5 = inlined_call_operand.hbm [shape: f32[2,16,128], index: 5, kind: output, shape index: {}]  }
   0x1   :  { %12196 = sst [smem:[#allocation29_spill]] %s12118_s2 }
   0x2   :  { %10 = vsyncpa [#allocation5], 0 }
   0x3   :  { %11 = vsyncpa [#allocation8], 0 }
   0x4   :  { %12 = vsyncpa [#allocation6], 0 }
   0x5   :  { %14 = vsyncpa [#allocation6 + $0x1], 0  ;;  %s9739_s18 = smov 0   ;;  %s9741_s19 = smov 0  }
   0x6   :  { %s9743_s20 = smov 0   ;;  %s9745_s21 = smov 0  }
   0x7   :  { %s9747_s22 = smov 0   ;;  %s9749_s23 = smov 0  }
   0x8 LB: > { %12197 = sst [smem:[#allocation17_spill]] %s9692_s22  ;;  %s5693_s24 = sadd.s32 4294967295, %s9696_s23   ;;  %s9696_s23 = sphi %s9749_s23, %s20_s23   ;;  %s9692_s22 = sphi %s9747_s22, %s12289_s22   ;;  %s9688_s21 = sphi %s9745_s21, %s12288_s21   ;;  %s9684_s20 = sphi %s9743_s20, %s12292_s20   ;;  %s9680_s19 = sphi %s9741_s19, %s12291_s19   ;;  %s9676_s18 = sphi %s9739_s18, %s12290_s18  }
   0x9   : > { %s5694_s25 = sadd.s32 4294967294, %s9696_s23   ;;  %s32_s26 = sadd.s32 1, %s9692_s22 }
   0xa   : > { %s125_s27 = sadd.s32 1, %s9684_s20  ;;  %p34_p0 = scmp.ge.s32.totalorder %s32_s26, 2 }
   0xb   : > { %p135_p1 = scmp.ne.s32.totalorder %s9684_s20, %s9680_s19  ;;  %p136_p2 = scmp.eq.s32.totalorder %s5693_s24, 1 }
   0xc   : > { %p141_p3 = scmp.ne.s32.totalorder %s9680_s19, %s9676_s18  ;;  %s12294_s26 = smov (%p34_p0, %s32_s26), 0 }
   0xd   : > { %12198 = sst [smem:[#allocation18_spill]] %s12294_s26  ;;  %p9779_p4 = por %p136_p2, %p135_p1 }
   0xe   : > { %p142_p5 = scmp.eq.s32.totalorder %s5694_s25, 1  ;;  %s120_s29 = ssub.s32 %s9692_s22, %s12294_s26 }
   0xf   : > { %s12199_s28 = scalar_select %p9779_p4, 1, 0 }
  0x10   : > { %p5695_p6 = scmp.ge.s32.totalorder %s9696_s23, 1  ;;  %p123_p7 = scmp.eq.s32.totalorder %s120_s29, 0 }
  0x11   : > { %p9786_p8 = por %p142_p5, %p141_p3  ;;  %p149_p9 = scmp.lt.s32.totalorder %s9696_s23, 3 }
  0x12   : > { %s9792_s6 = scalar_select %p123_p7, %s9684_s20, %s125_s27  }
  0x13   : > { %s12200_s30 = scalar_select %p9786_p8, 1, 0 }
  0x14   : > { %p9794_p10 = pnand %p5695_p6, %p149_p9  ;;  %p9798_p11 = scmp.eq.s32.totalorder %s5693_s24, 0 }
  0x15   : > { %s9698_s9 = smov [#allocation7]   ;;  %s9699_s12 = smov [#allocation4]  }
  0x16   : > { %s12201_s7 = scalar_select %p9794_p10, 1, 0 }
  0x17   : > { %s12202_s8 = scalar_select %p9798_p11, 1, 0 }
  0x18   : > { %p9442_p12 = pneg %p9794_p10  ;;  %s174_s10 = sshll.u32 %s9698_s9, 4  ;;  %s175_s10 = int_to_ptr.vmem [resolvable:$true] %s174_s10 }
  0x19   : > { %s161_s13 = sshll.u32 %s9699_s12, 4  ;;  %s12204_s2 = sld [smem:[#allocation29_spill]]  ;;  %s162_s13 = int_to_ptr.vmem [resolvable:$true] %s161_s13 }
  0x1a   : > { %p9806_p13 = pnand %p9798_p11, %p9442_p12 }
  0x1c   : > { %p9818_p1 = pneg %p9806_p13 }
  0x1f   : > { %s9524_s16 = scalar_lea.hbm %s12204_s2, 6144 }
  0x20   : > { %p9525_p0 = scmp.ne.s32.totalorder %s12204_s2, %s9524_s16  ;;  %p9531_p5 = scmp.lt.u32.totalorder %s9524_s16, %s12204_s2 }
  0x22   : > { %p9527_p2 = pnand %p9818_p1, %p9525_p0 }
  0x24   : > { %p9528_p3 = pneg %p9527_p2 }
  0x26   : > { %p9533_p6 = pnand %p9531_p5, %p9528_p3 }
  0x28   : > { %9536 = shalt.err (!%p9533_p6)
}
  0x29   : > { %s9537_s9 = scalar_lea.vmem %s175_s10, 6144  ;;  %p9545_p8 = scmp.lt.s32.totalorder %s175_s10, %s175_s10 }
  0x2a   : > { %p9538_p7 = scmp.ne.s32.totalorder %s175_s10, %s9537_s9  ;;  %p9546_p4 = scmp.lt.s32.totalorder %s9537_s9, %s9537_s9 }
  0x2c   : > { %p9540_p9 = pnand %p9538_p7, %p9818_p1  ;;  %p9547_p11 = por %p9546_p4, %p9545_p8 }
  0x2e   : > { %p9541_p12 = pneg %p9540_p9 }
  0x30   : > { %p9548_p10 = pnand %p9547_p11, %p9541_p12 }
  0x32   : > { %9551 = shalt.err (!%p9548_p10)
}
  0x33   : > { %s9700_s12 = smov 128   ;;  %s9701_s14 = smov 8  }
  0x34   : > { %9448 = dma.hbm_to_vmem [thread:$0]  (!%p9806_p13), %s12204_s2, 6144, %s175_s10, [#allocation8], %s9700_s12, %s9700_s12, %s9701_s14  }
  0x35   : > { %s9552_s27 = scalar_lea.hbm %s12117_s1, 6144 }
  0x36   : > { %p9553_p4 = scmp.ne.s32.totalorder %s12117_s1, %s9552_s27  ;;  %p9559_p11 = scmp.lt.u32.totalorder %s9552_s27, %s12117_s1 }
  0x38   : > { %p9555_p8 = pnand %p9553_p4, %p9818_p1 }
  0x3a   : > { %p9556_p10 = pneg %p9555_p8 }
  0x3c   : > { %p9561_p0 = pnand %p9559_p11, %p9556_p10 }
  0x3e   : > { %9564 = shalt.err (!%p9561_p0)
}
  0x3f   : > { %s9565_s15 = scalar_lea.vmem %s162_s13, 6144  ;;  %p9573_p6 = scmp.lt.s32.totalorder %s162_s13, %s162_s13 }
  0x40   : > { %p9566_p2 = scmp.ne.s32.totalorder %s162_s13, %s9565_s15  ;;  %p9574_p7 = scmp.lt.s32.totalorder %s9565_s15, %s9565_s15 }
  0x42   : > { %p9568_p3 = pnand %p9566_p2, %p9818_p1  ;;  %p9575_p9 = por %p9574_p7, %p9573_p6 }
  0x44   : > { %p9569_p5 = pneg %p9568_p3 }
  0x46   : > { %p9576_p12 = pnand %p9575_p9, %p9569_p5 }
  0x48   : > { %9579 = shalt.err (!%p9576_p12)
}
  0x49   : > { %9445 = dma.hbm_to_vmem [thread:$0]  (!%p9806_p13), %s12117_s1, 6144, %s162_s13, [#allocation5], %s9700_s12, %s9700_s12, %s9701_s14  }
  0x4a   : > { %s9702_s10 = smov [#allocation9]   ;;  %s9580_s27 = scalar_lea.hbm %s12119_s3, 2048 }
  0x4b   : > { %s187_s16 = sshll.u32 %s9702_s10, 4  ;;  %p9581_p4 = scmp.ne.s32.totalorder %s12119_s3, %s9580_s27  ;;  %s188_s16 = int_to_ptr.vmem [resolvable:$true] %s187_s16 }
  0x4c   : > { %p9587_p11 = scmp.lt.u32.totalorder %s9580_s27, %s12119_s3 }
  0x4d   : > { %p9583_p8 = pnand %p9581_p4, %p9818_p1 }
  0x4f   : > { %p9584_p10 = pneg %p9583_p8 }
  0x51   : > { %p9589_p0 = pnand %p9587_p11, %p9584_p10 }
  0x53   : > { %9592 = shalt.err (!%p9589_p0)
}
  0x54   : > { %s9593_s13 = scalar_lea.vmem %s188_s16, 2048  ;;  %p9601_p6 = scmp.lt.s32.totalorder %s188_s16, %s188_s16 }
  0x55   : > { %p9594_p2 = scmp.ne.s32.totalorder %s188_s16, %s9593_s13  ;;  %p9602_p7 = scmp.lt.s32.totalorder %s9593_s13, %s9593_s13 }
  0x57   : > { %p9596_p3 = pnand %p9594_p2, %p9818_p1  ;;  %p9603_p9 = por %p9602_p7, %p9601_p6 }
  0x59   : > { %p9597_p5 = pneg %p9596_p3 }
  0x5b   : > { %p9604_p12 = pnand %p9603_p9, %p9597_p5 }
  0x5d   : > { %9607 = shalt.err (!%p9604_p12)
}
  0x5e   : > { %9451 = dma.hbm_to_vmem [thread:$0]  (!%p9806_p13), %s12119_s3, 2048, %s188_s16, [#allocation8], %s9700_s12, %s9700_s12, %s9701_s14  }
  0x5f   : > { %p12206_p4 = scmp.ne.s32.totalorder %s12201_s7, 0 }
  0x61   : > { %206 = sbr.rel (%p12206_p4) target bundleno = 1744 (0x6d0), region = 36 }
  0x68   : > { %p12207_p1 = scmp.ne.s32.totalorder %s12202_s8, 0 }
  0x6a   : > { %9661 = dma.done.wait (%p12207_p1), [#allocation5], 6144  }
  0x6b   : > { %9663 = vsyncadd (%p12207_p1), [#allocation5], 4294961152 }
  0x6c   : > { %9665 = dma.done.wait (%p12207_p1), [#allocation8], 8192  }
  0x6d   : > { %9667 = vsyncadd (%p12207_p1), [#allocation8], 4294959104  ;;  %s232_s11 = sand.u32 1, %s9680_s19   ;;  %s246_s25 = smul.u32 24, %s9688_s21 }
  0x6e   : > { %s5703_s7 = sshll.u32 %s232_s11, 4 }
  0x6f   : > { %s247_s26 = scalar_lea.vmem %s12116_s0, %s246_s25  ;;  %s9896_s10 = scalar_lea.vmem [#allocation10], %s5703_s7 }
  0x70   : > { %v285_v0 = vld [vmem:[%s247_s26] sm:$0xff]  ;;  %v287_v1 = vld [vmem:[%s247_s26 + $0x8] sm:$0xff]  ;;  %v5704_v2 = vld [vmem:[%s247_s26 + $0x10] sm:$0xf] }
  0x71   : > { %286 = vst [vmem:[#allocation2] sm:$0xff] %v285_v0  ;;  %288 = vst [vmem:[#allocation2 + $0x8] sm:$0xff] %v287_v1 }
  0x72   : > { %299 = vst [vmem:[#allocation2 + $0x10] sm:$0xf] %v5704_v2 }
  0x73   : > { %303 = vsyncadd [#allocation3], 320 }
  0x74   : > { %9668 = dma.done.wait [#allocation3], 320 }
  0x75   : > { %9669 = vsyncadd [#allocation3], 4294966976  ;;  %v387_v3 = vld [vmem:[#allocation9] sm:$0xff]  ;;  %v388_v4 = vld [vmem:[#allocation9 + $0x8] sm:$0xff]  ;;  %vm410_vm0 = vcmask 1045504   ;;  %vm9704_vm1 = vmmov 0  }
  0x76   : > { %v389_v5 = vld [vmem:[#allocation9 + $0x10] sm:$0xff]  ;;  %v419_v6 = vand.u32 4294901760, %v387_v3  ;;  %v422_v7 = vand.u32 4294901760, %v388_v4  ;;  %v390_v8 = vld [vmem:[#allocation9 + $0x18] sm:$0xff]  ;;  %v391_v10 = vld [vmem:[#allocation9 + $0x20] sm:$0xff]  ;;  %vm1135_vm2 = vcmask 1046528  }
  0x77   : > { %v425_v9 = vand.u32 4294901760, %v389_v5  ;;  %v392_v11 = vld [vmem:[#allocation9 + $0x28] sm:$0xff]  ;;  %v428_v12 = vand.u32 4294901760, %v390_v8  ;;  %v431_v13 = vand.u32 4294901760, %v391_v10  ;;  %v393_v15 = vld [vmem:[#allocation9 + $0x30] sm:$0xff]  ;;  %v394_v16 = vld [vmem:[#allocation9 + $0x38] sm:$0xff] }
  0x78   : > { %v434_v14 = vand.u32 4294901760, %v392_v11  ;;  %v9898_v17 = vpack.c.bf16 %v422_v7, %v419_v6  ;;  %v9900_v18 = vsub.f32 %v387_v3, %v419_v6  ;;  %v9902_v19 = vsub.f32 %v388_v4, %v422_v7  ;;  %v395_v28 = vld [vmem:[#allocation9 + $0x40] sm:$0xff]  ;;  %v396_v30 = vld [vmem:[#allocation9 + $0x48] sm:$0xff]  ;;  %v9923_v33 = vld [vmem:[#allocation2] sm:$0xff]  ;;  %s5727_s22 = sshll.u32 %s9688_s21, 8  ;;  %s5546_s25 = sshll.u32 %s9896_s10, 4  ;;  %s12063_s25 = int_to_ptr.vmem [resolvable:$true] %s5546_s25 }
  0x79   : > { %v9904_v20 = vsub.f32 %v389_v5, %v425_v9  ;;  %v9906_v21 = vpack.c.bf16 %v428_v12, %v425_v9  ;;  %v9908_v22 = vsub.f32 %v390_v8, %v428_v12  ;;  %v9910_v23 = vsub.f32 %v391_v10, %v431_v13  ;;  %v397_v38 = vld [vmem:[#allocation9 + $0x50] sm:$0xff]  ;;  %v398_v39 = vld [vmem:[#allocation9 + $0x58] sm:$0xff]  ;;  %v9938_v43 = vld [vmem:[#allocation2 + $0x10] sm:$0xf]  ;;  %s12061_s14 = scalar_lea.hbm %s12121_s5, %s5727_s22  ;;  %s12070_s21 = scalar_lea.sflag [#allocation6], %s232_s11 }
  0x7a   : > { %8081 = vmatprep.subr.bf16.mxu1 %v9898_v17  ;;  %v8144_v24 = vpack.c.bf16 %v9902_v19, %v9900_v18  ;;  %v9915_v25 = vsub.f32 %v392_v11, %v434_v14  ;;  %v437_v26 = vand.u32 4294901760, %v393_v15  ;;  %v440_v27 = vand.u32 4294901760, %v394_v16  ;;  %v9931_v40 = vld [vmem:[#allocation2 + $0x8] sm:$0xff]  ;;  %v399_v50 = vld [vmem:[#allocation9 + $0x60] sm:$0xff]  ;;  %v400_v51 = vld [vmem:[#allocation9 + $0x68] sm:$0xff]  ;;  %s9608_s26 = scalar_lea.vmem %s12063_s25, 256 }
  0x7b   : > { %8083 = vmatpush3.bf16.msra.mxu1 %v9898_v17  ;;  %v8148_v29 = vpack.c.bf16 %v9908_v22, %v9904_v20  ;;  %v9921_v31 = vpack.c.bf16 %v434_v14, %v431_v13  ;;  %v443_v32 = vand.u32 4294901760, %v395_v28  ;;  %v446_v37 = vand.u32 4294901760, %v396_v30  ;;  %v401_v62 = vld [vmem:[#allocation9 + $0x70] sm:$0xff]  ;;  %v402_v1 = vld [vmem:[#allocation9 + $0x78] sm:$0xff]  ;;  %p9609_p13 = scmp.ne.s32.totalorder %s12063_s25, %s9608_s26  ;;  %p12286_p8 = scmp.ne.s32.totalorder %s12199_s28, 0 }
  0x7c   : > { %8145 = vmatprep.subr.bf16.mxu0 %v8144_v24  ;;  %8085 = vmatprep.subr.bf16.mxu1 %v9906_v21  ;;  %v8152_v34 = vpack.c.bf16 %v9915_v25, %v9910_v23  ;;  %v9927_v35 = vsub.f32 %v393_v15, %v437_v26  ;;  %v9929_v36 = vsub.f32 %v394_v16, %v440_v27  ;;  %v411_v42 = vrot.slane %v9923_v33, 2  ;;  %s9706_s8 = smov [#allocation10]  }
  0x7d   : > { %8147 = vmatpush3.bf16.msra.mxu0 %v8144_v24  ;;  %v9935_v41 = vpack.c.bf16 %v440_v27, %v437_v26  ;;  %v449_v44 = vand.u32 4294901760, %v397_v38  ;;  %v452_v45 = vand.u32 4294901760, %v398_v39  ;;  %v412_v46 = vrot.slane %v9931_v40, 2  ;;  %p9610_p10 = pnand %p9609_p13, %p12286_p8  ;;  %s9612_s16 = sshll.u32 %s9706_s8, 4  ;;  %s9613_s16 = int_to_ptr.vmem [resolvable:$false] %s9612_s16 }
  0x7e   : > { %8149 = vmatprep.subr.bf16.mxu0 %v8148_v29  ;;  %v8156_v47 = vpack.c.bf16 %v9929_v36, %v9927_v35  ;;  %v9943_v48 = vsub.f32 %v395_v28, %v443_v32  ;;  %v9945_v49 = vsub.f32 %v396_v30, %v446_v37  ;;  %v9950_v53 = vrot.slane %v9938_v43, 2  ;;  %s9614_s17 = scalar_lea.vmem %s9613_s16, 512  ;;  %p9615_p0 = scmp.lt.s32.totalorder %s12063_s25, %s9613_s16 }
  0x7f   : > { %8087 = vmatpush3.bf16.msra.mxu1 %v9906_v21  ;;  %v413_v52 = vsel %vm410_vm0, %v411_v42, %v412_v46  ;;  %v9953_v54 = vpack.c.bf16 %v446_v37, %v443_v32  ;;  %v9957_v56 = vsub.f32 %v397_v38, %v449_v44  ;;  %v9959_v57 = vsub.f32 %v398_v39, %v452_v45  ;;  %p9611_p11 = pneg %p9610_p10  ;;  %p9616_p2 = scmp.lt.s32.totalorder %s9614_s17, %s9608_s26 }
  0x80   : > { %8089 = vmatprep.subr.bf16.mxu1 %v9921_v31  ;;  %12208 = vst [vmem:[#allocation19_spill] sm:$0xff] %v9950_v53  ;;  %v9955_v55 = vand.u32 4294901760, %v413_v52  ;;  %v455_v58 = vand.u32 4294901760, %v399_v50  ;;  %v415_v59 = vsel %vm410_vm0, %v412_v46, %v9950_v53  ;;  %v8160_v60 = vpack.c.bf16 %v9945_v49, %v9943_v48 }
  0x81   : > { %8151 = vmatpush3.bf16.msra.mxu0 %v8148_v29  ;;  %v458_v61 = vand.u32 4294901760, %v400_v51  ;;  %v9968_v0 = vand.u32 4294901760, %v415_v59  ;;  %v9972_v2 = vpack.c.bf16 %v452_v45, %v449_v44  ;;  %v522_v4 = vand.u32 4294901760, %v9900_v18  ;;  %p9617_p3 = por %p9616_p2, %p9615_p0 }
  0x82   : > { %8153 = vmatprep.subr.bf16.mxu0 %v8152_v34  ;;  %v9966_v63 = vsub.f32 %v413_v52, %v9955_v55  ;;  %v529_v5 = vand.u32 4294901760, %v9902_v19  ;;  %v8164_v6 = vpack.c.bf16 %v9959_v57, %v9957_v56  ;;  %v9982_v7 = vsub.f32 %v399_v50, %v455_v58 }
  0x83   : > { %8091 = vmatpush3.bf16.msra.mxu1 %v9921_v31  ;;  %v461_v8 = vand.u32 4294901760, %v401_v62  ;;  %v9984_v9 = vsub.f32 %v400_v51, %v458_v61  ;;  %v464_v10 = vand.u32 4294901760, %v402_v1  ;;  %v9989_v12 = vsub.f32 %v415_v59, %v9968_v0  ;;  %p9618_p5 = pnand %p9617_p3, %p9611_p11 }
  0x84   : > { %8093 = vmatprep.subr.bf16.mxu1 %v9935_v41  ;;  %12209 = vst [vmem:[#allocation20_spill] sm:$0xff] %v9966_v63  ;;  %v9975_v3 = vand.u32 4294901760, %v9966_v63  ;;  %6604 = vmatprep.mubr.f32.mxu0 %v9966_v63  ;;  %v9992_v13 = vpack.c.bf16 %v458_v61, %v455_v58  ;;  %v536_v14 = vand.u32 4294901760, %v9904_v20  ;;  %v523_v16 = vsub.f32 %v9900_v18, %v522_v4  ;;  %v1125_v18 = vld [vmem:[#allocation4 + $0xb0] sm:$0xff] }
  0x85   : > { %8155 = vmatpush3.bf16.msra.mxu0 %v8152_v34  ;;  %12211 = vst [vmem:[#allocation22_spill] sm:$0xff] %v9989_v12  ;;  %v530_v24 = vsub.f32 %v9902_v19, %v529_v5  ;;  %v543_v26 = vand.u32 4294901760, %v9908_v22  ;;  %v8168_v27 = vpack.c.bf16 %v9984_v9, %v9982_v7  ;;  %v10007_v28 = vsub.f32 %v401_v62, %v461_v8 }
  0x86   : > { %8157 = vmatprep.subr.bf16.mxu0 %v8156_v47  ;;  %12210 = vst [vmem:[#allocation21_spill] sm:$0xff] %v9975_v3  ;;  %v502_v11 = vsub.f32 %v9966_v63, %v9975_v3  ;;  %v10009_v29 = vsub.f32 %v402_v1, %v464_v10  ;;  %v10013_v30 = vand.u32 4294901760, %v9989_v12  ;;  %v10016_v32 = vpack.c.bf16 %v464_v10, %v461_v8 }
  0x87   : > { %8095 = vmatpush3.bf16.msra.mxu1 %v9935_v41  ;;  %v537_v34 = vsub.f32 %v9904_v20, %v536_v14  ;;  %v550_v37 = vand.u32 4294901760, %v9910_v23  ;;  %v524_v38 = vand.u32 4294901760, %v523_v16  ;;  %v531_v39 = vand.u32 4294901760, %v530_v24 }
  0x88   : > { %8097 = vmatprep.subr.bf16.mxu1 %v9953_v54  ;;  %v9996_v15 = vand.u32 4294901760, %v502_v11  ;;  %12213 = vst [vmem:[#allocation24_spill] sm:$0xff] %v10013_v30  ;;  %v544_v42 = vsub.f32 %v9908_v22, %v543_v26  ;;  %v557_v44 = vand.u32 4294901760, %v9915_v25  ;;  %v8172_v45 = vpack.c.bf16 %v10009_v29, %v10007_v28 }
  0x89   : > { %8159 = vmatpush3.bf16.msra.mxu0 %v8156_v47  ;;  %v512_v46 = vsub.f32 %v9989_v12, %v10013_v30  ;;  %v538_v47 = vand.u32 4294901760, %v537_v34  ;;  %v551_v50 = vsub.f32 %v9910_v23, %v550_v37  ;;  %v564_v51 = vand.u32 4294901760, %v9927_v35 }
  0x8a   : > { %8161 = vmatprep.subr.bf16.mxu0 %v8160_v60  ;;  %12212 = vst [vmem:[#allocation23_spill] sm:$0xff] %v9996_v15  ;;  %6534 = vmatprep.mubr.f32.mxu1 %v9996_v15  ;;  %v8112_v52 = vpack.c.bf16 %v531_v39, %v524_v38  ;;  %v545_v58 = vand.u32 4294901760, %v544_v42  ;;  %v558_v59 = vsub.f32 %v9915_v25, %v557_v44  ;;  %v12135_v1 = vand.u32 4294901760, %v9943_v48 }
  0x8b   : > { %8099 = vmatpush3.bf16.msra.mxu1 %v9953_v54  ;;  %v10041_v61 = vand.u32 4294901760, %v512_v46  ;;  %v565_v62 = vsub.f32 %v9927_v35, %v564_v51  ;;  %v552_v10 = vand.u32 4294901760, %v551_v50  ;;  %v12133_v42 = vand.u32 4294901760, %v9957_v56 }
  0x8c   : > { %8101 = vmatprep.subr.bf16.mxu1 %v9972_v2  ;;  %v8116_v8 = vpack.c.bf16 %v545_v58, %v538_v47  ;;  %v559_v11 = vand.u32 4294901760, %v558_v59  ;;  %v12131_v50 = vand.u32 4294901760, %v9982_v7  ;;  %v8212_v19 = vpack.c.bf16 %v543_v26, %v536_v14 }
  0x8d   : > { %8163 = vmatpush3.bf16.msra.mxu0 %v8160_v60  ;;  %v12136_v60 = vand.u32 4294901760, %v9929_v36  ;;  %12214 = vst [vmem:[#allocation25_spill] sm:$0xff] %v10041_v61  ;;  %v566_v24 = vand.u32 4294901760, %v565_v62  ;;  %v593_v58 = vsub.f32 %v9957_v56, %v12133_v42  ;;  %v12130_v62 = vand.u32 4294901760, %v9984_v9 }
  0x8e   : > { %8165 = vmatprep.subr.bf16.mxu0 %v8164_v6  ;;  %v8120_v38 = vpack.c.bf16 %v559_v11, %v552_v10  ;;  %v607_v10 = vsub.f32 %v9982_v7, %v12131_v50  ;;  %v12129_v11 = vand.u32 4294901760, %v10007_v28  ;;  %v1122_v50 = vld [vmem:[#allocation4 + $0x98] sm:$0xff]  ;;  %v12145_v42 = vmov 0.0|0.0  }
  0x8f   : > { %8103 = vmatpush3.bf16.msra.mxu1 %v9972_v2  ;;  %v572_v16 = vsub.f32 %v9929_v36, %v12136_v60  ;;  %v1126_v60 = vld [vmem:[#allocation4 + $0xb8] sm:$0xff]  ;;  %v1163_v14 = vand.u32 4294901760, %v1125_v18  ;;  %v1139_v35 = vrot.slane %v9938_v43, 1 }
  0x90   : > { %8105 = vmatprep.subr.bf16.mxu1 %v9992_v13  ;;  %v1166_v26 = vand.u32 4294901760, %v1126_v60 }
  0x91   : > { %8167 = vmatpush3.bf16.msra.mxu0 %v8164_v6  ;;  %v12134_v6 = vand.u32 4294901760, %v9945_v49  ;;  %v573_v39 = vand.u32 4294901760, %v572_v16  ;;  %v594_v16 = vand.u32 4294901760, %v593_v58 }
  0x92   : > { %8169 = vmatprep.subr.bf16.mxu0 %v8168_v27 }
  0x93   : > { %8107 = vmatpush3.bf16.msra.mxu1 %v9992_v13  ;;  %v586_v34 = vsub.f32 %v9945_v49, %v12134_v6 }
  0x94   : > { %8109 = vmatprep.subr.bf16.mxu1 %v10016_v32 }
  0x95   : > { %8171 = vmatpush3.bf16.msra.mxu0 %v8168_v27  ;;  %v579_v27 = vsub.f32 %v9943_v48, %v12135_v1  ;;  %v587_v47 = vand.u32 4294901760, %v586_v34  ;;  %v12128_v34 = vand.u32 4294901760, %v10009_v29 }
  0x96   : > { %8173 = vmatprep.subr.bf16.mxu0 %v8172_v45 }
  0x97   : > { %8111 = vmatpush3.bf16.msra.mxu1 %v10016_v32  ;;  %v580_v46 = vand.u32 4294901760, %v579_v27  ;;  %v614_v27 = vsub.f32 %v9984_v9, %v12130_v62  ;;  %v628_v58 = vsub.f32 %v10009_v29, %v12128_v34  ;;  %v1121_v62 = vld [vmem:[#allocation4 + $0x90] sm:$0xff] }
  0x98   : > { %8113 = vmatprep.subr.bf16.mxu1 %v8112_v52 }
  0x99   : > { %8175 = vmatpush3.bf16.msra.mxu0 %v8172_v45  ;;  %v12132_v45 = vand.u32 4294901760, %v9959_v57 }
  0x9a   : > { %6535 = vmatmul.mubr.f32.vlgmr.msra.gmra.mrb[0].mxu1 %v10041_v61  ;;  %8177 = vmatprep.subr.bf16.mxu0 %v9898_v17 }
  0x9b   : > { %8115 = vmatpush3.bf16.msra.mxu1 %v8112_v52  ;;  %6569 = vmatprep.mubr.f32.mxu1 %v9955_v55  ;;  %v8124_v52 = vpack.c.bf16 %v573_v39, %v566_v24  ;;  %v600_v59 = vsub.f32 %v9959_v57, %v12132_v45 }
  0x9c   : > { %6605 = vmatmul.mubr.f32.vlgmr.msra.gmra.mrb[0].mxu0 %v9989_v12  ;;  %8117 = vmatprep.subr.bf16.mxu1 %v8116_v8 }
  0x9d   : > { %8179 = vmatpush3.bf16.msra.mxu0 %v9898_v17  ;;  %6639 = vmatprep.mubr.f32.mxu0 %v9975_v3  ;;  %v601_v24 = vand.u32 4294901760, %v600_v59 }
  0x9e   : > { %8181 = vmatprep.subr.bf16.mxu0 %v9906_v21 }
  0x9f   : > { %8119 = vmatpush3.bf16.msra.mxu1 %v8116_v8  ;;  %v8128_v8 = vpack.c.bf16 %v587_v47, %v580_v46  ;;  %v8132_v39 = vpack.c.bf16 %v601_v24, %v594_v16  ;;  %v615_v46 = vand.u32 4294901760, %v614_v27  ;;  %v621_v47 = vsub.f32 %v10007_v28, %v12129_v11  ;;  %v1119_v16 = vld [vmem:[#allocation4 + $0x80] sm:$0xff]  ;;  %v1120_v24 = vld [vmem:[#allocation4 + $0x88] sm:$0xff] }
  0xa0   : > { %8121 = vmatprep.subr.bf16.mxu1 %v8120_v38  ;;  %v1145_v34 = vand.u32 4294901760, %v1119_v16  ;;  %v1148_v11 = vand.u32 4294901760, %v1120_v24 }
  0xa1   : > { %8183 = vmatpush3.bf16.msra.mxu0 %v9906_v21 }
  0xa2   : > { %8185 = vmatprep.subr.bf16.mxu0 %v9921_v31 }
  0xa3   : > { %8123 = vmatpush3.bf16.msra.mxu1 %v8120_v38  ;;  %v608_v38 = vand.u32 4294901760, %v607_v10  ;;  %v629_v10 = vand.u32 4294901760, %v628_v58  ;;  %v1124_v58 = vld [vmem:[#allocation4 + $0xa8] sm:$0xff] }
  0xa4   : > { %8125 = vmatprep.subr.bf16.mxu1 %v8124_v52  ;;  %v1160_v1 = vand.u32 4294901760, %v1124_v58 }
  0xa5   : > { %8187 = vmatpush3.bf16.msra.mxu0 %v9921_v31  ;;  %v8136_v59 = vpack.c.bf16 %v615_v46, %v608_v38  ;;  %v10101_v38 = vsub.f32 %v1120_v24, %v1148_v11  ;;  %v1151_v46 = vand.u32 4294901760, %v1121_v62 }
  0xa6   : > { %8189 = vmatprep.subr.bf16.mxu0 %v9935_v41 }
  0xa7   : > { %8127 = vmatpush3.bf16.msra.mxu1 %v8124_v52  ;;  %v622_v52 = vand.u32 4294901760, %v621_v47  ;;  %v1154_v47 = vand.u32 4294901760, %v1122_v50  ;;  %v12139_v45 = vand.u32 4294901760, %v10101_v38 }
  0xa8   : > { %8129 = vmatprep.subr.bf16.mxu1 %v8128_v8 }
  0xa9   : > { %8191 = vmatpush3.bf16.msra.mxu0 %v9935_v41  ;;  %v8140_v27 = vpack.c.bf16 %v629_v10, %v622_v52  ;;  %v8208_v52 = vpack.c.bf16 %v529_v5, %v522_v4  ;;  %v10109_v10 = vsub.f32 %v1121_v62, %v1151_v46  ;;  %v10137_v22 = vpack.c.bf16 %v1154_v47, %v1151_v46 }
  0xaa   : > { %8193 = vmatprep.subr.bf16.mxu0 %v9953_v54  ;;  %v8216_v46 = vpack.c.bf16 %v557_v44, %v550_v37 }
  0xab   : > { %8131 = vmatpush3.bf16.msra.mxu1 %v8128_v8  ;;  %v10099_v8 = vsub.f32 %v1119_v16, %v1145_v34  ;;  %v10113_v16 = vpack.c.bf16 %v1148_v11, %v1145_v34  ;;  %v12141_v62 = vand.u32 4294901760, %v10109_v10  ;;  %v12137_v11 = vmov 0.0   ;;  %v1127_v34 = vld [vmem:[#allocation4 + $0xc0] sm:$0xff] }
  0xac   : > { %8133 = vmatprep.subr.bf16.mxu1 %v8132_v39  ;;  %v1169_v25 = vand.u32 4294901760, %v1127_v34 }
  0xad   : > { %8195 = vmatpush3.bf16.msra.mxu0 %v9953_v54  ;;  %v12142_v24 = vand.u32 4294901760, %v10099_v8 }
  0xae   : > { %8197 = vmatprep.subr.bf16.mxu0 %v9972_v2 }
  0xaf   : > { %8135 = vmatpush3.bf16.msra.mxu1 %v8132_v39  ;;  %v1123_v39 = vld [vmem:[#allocation4 + $0xa0] sm:$0xff]  ;;  %v10127_v4 = vpack.c.bf16 %v12139_v45, %v12142_v24  ;;  %v1137_v45 = vrot.slane %v9931_v40, 1  ;;  %v12215_v40 = vand.u32 4294901760, %v9929_v36 }
  0xb0   : > { %8137 = vmatprep.subr.bf16.mxu1 %v8136_v59  ;;  %v1157_v6 = vand.u32 4294901760, %v1123_v39 }
  0xb1   : > { %8199 = vmatpush3.bf16.msra.mxu0 %v9972_v2  ;;  %v8220_v44 = vpack.c.bf16 %v12215_v40, %v564_v51  ;;  %v12217_v40 = vand.u32 4294901760, %v9945_v49  ;;  %v1140_v49 = vsel %vm1135_vm2, %v1137_v45, %v1139_v35 }
  0xb2   : > { %8201 = vmatprep.subr.bf16.mxu0 %v9992_v13  ;;  %v10130_v5 = vsub.f32 %v1123_v39, %v1157_v6  ;;  %v10155_v39 = vsub.f32 %v1126_v60, %v1166_v26  ;;  %v10163_v23 = vpack.c.bf16 %v1160_v1, %v1157_v6  ;;  %v10176_v60 = vsub.f32 %v1127_v34, %v1169_v25  ;;  %v1130_v6 = vld [vmem:[#allocation4 + $0xd8] sm:$0xff]  ;;  %v1131_v34 = vld [vmem:[#allocation4 + $0xe0] sm:$0xff] }
  0xb3   : > { %8139 = vmatpush3.bf16.msra.mxu1 %v8136_v59  ;;  %v10111_v59 = vsub.f32 %v1122_v50, %v1154_v47  ;;  %v10132_v50 = vsub.f32 %v1124_v58, %v1160_v1  ;;  %v10153_v47 = vsub.f32 %v1125_v18, %v1163_v14  ;;  %v1128_v58 = vld [vmem:[#allocation4 + $0xc8] sm:$0xff]  ;;  %v1129_v1 = vld [vmem:[#allocation4 + $0xd0] sm:$0xff]  ;;  %v1178_v51 = vand.u32 4294901760, %v1130_v6 }
  0xb4   : > { %8141 = vmatprep.subr.bf16.mxu1 %v8140_v27  ;;  %v1172_v37 = vand.u32 4294901760, %v1128_v58  ;;  %v1175_v36 = vand.u32 4294901760, %v1129_v1 }
  0xb5   : > { %8203 = vmatpush3.bf16.msra.mxu0 %v9992_v13  ;;  %v12140_v20 = vand.u32 4294901760, %v10111_v59  ;;  %v12150_v24 = vand.u32 4294901760, %v10153_v47 }
  0xb6   : > { %8205 = vmatprep.subr.bf16.mxu0 %v10016_v32  ;;  %v10178_v18 = vsub.f32 %v1128_v58, %v1172_v37  ;;  %v12216_v58 = vand.u32 4294901760, %v9943_v48  ;;  %v10200_v43 = vsub.f32 %v1129_v1, %v1175_v36  ;;  %v1181_v48 = vand.u32 4294901760, %v1131_v34 }
  0xb7   : > { %8143 = vmatpush3.bf16.msra.mxu1 %v8140_v27  ;;  %v10147_v27 = vpack.c.bf16 %v12140_v20, %v12141_v62  ;;  %v12144_v20 = vand.u32 4294901760, %v10130_v5 }
  0xb8   : > { %8272 = vmatprep.subr.bf16.mxu1 %v12145_v42  ;;  %v12155_v3 = vand.u32 4294901760, %v10178_v18  ;;  %v10221_v12 = vsub.f32 %v1131_v34, %v1181_v48  ;;  %v12160_v61 = vand.u32 4294901760, %v10200_v43  ;;  %v12223_v34 = vand.u32 4294901760, %v9982_v7 }
  0xb9   : > { %8207 = vmatpush3.bf16.msra.mxu0 %v10016_v32 }
  0xba   : > { %6570 = vmatmul.mubr.f32.vlgmr.msra.gmra.mrb[0].mxu1 %v9968_v0  ;;  %8209 = vmatprep.subr.bf16.mxu0 %v8208_v52  ;;  %v12163_v53 = vand.u32 4294901760, %v10221_v12 }
  0xbb   : > { %8274 = vmatpush3.bf16.msra.mxu1 %v10113_v16  ;;  %6744 = vmatprep.mubr.msk.f32.mxu1 %vm9704_vm1, %v12137_v11  ;;  %v1136_v11 = vrot.slane %v9923_v33, 1 }
  0xbc   : > { %6640 = vmatmul.mubr.f32.vlgmr.msra.gmra.mrb[0].mxu0 %v10013_v30  ;;  %8275 = vmatprep.subr.bf16.mxu1 %v12145_v42  ;;  %v12156_v30 = vand.u32 4294901760, %v10176_v60 }
  0xbd   : > { %8211 = vmatpush3.bf16.msra.mxu0 %v8208_v52  ;;  %6674 = vmatprep.mubr.f32.mxu0 %v9955_v55  ;;  %v12143_v52 = vand.u32 4294901760, %v10132_v50  ;;  %v1138_v62 = vsel %vm1135_vm2, %v1136_v11, %v1137_v45 }
  0xbe   : > { %8213 = vmatprep.subr.bf16.mxu0 %v8212_v19  ;;  %v10215_v1 = vpack.c.bf16 %v12155_v3, %v12156_v30  ;;  %v10230_v3 = vand.u32 4294901760, %v1140_v49 }
  0xbf   : > { %8277 = vmatpush3.bf16.msra.mxu1 %v10137_v22  ;;  %v10170_v33 = vpack.c.bf16 %v12143_v52, %v12144_v20  ;;  %v12149_v52 = vand.u32 4294901760, %v10155_v39  ;;  %v10198_v20 = vand.u32 4294901760, %v1138_v62 }
  0xc0   : > { %8278 = vmatprep.subr.bf16.mxu1 %v12145_v42  ;;  %12219 = vst [vmem:[#allocation26_spill] sm:$0xff] %v10215_v1  ;;  %v10252_v30 = vsub.f32 %v1140_v49, %v10230_v3 }
  0xc1   : > { %8215 = vmatpush3.bf16.msra.mxu0 %v8212_v19  ;;  %v10184_v19 = vpack.c.bf16 %v1166_v26, %v1163_v14  ;;  %v10192_v11 = vpack.c.bf16 %v12149_v52, %v12150_v24  ;;  %v8224_v14 = vpack.c.bf16 %v12217_v40, %v12216_v58  ;;  %v1132_v26 = vld [vmem:[#allocation4 + $0xe8] sm:$0xff]  ;;  %v12218_v58 = vmov 0.0|0.0   ;;  %v1133_v52 = vld [vmem:[#allocation4 + $0xf0] sm:$0xff]  ;;  %v1134_v24 = vld [vmem:[#allocation4 + $0xf8] sm:$0xff] }
  0xc2   : > { %8217 = vmatprep.subr.bf16.mxu0 %v8216_v46  ;;  %v1184_v40 = vand.u32 4294901760, %v1132_v26  ;;  %v10224_v45 = vsub.f32 %v1138_v62, %v10198_v20 }
  0xc3   : > { %8280 = vmatpush3.bf16.msra.mxu1 %v10163_v23 }
  0xc4   : > { %8281 = vmatprep.subr.bf16.mxu1 %v12145_v42  ;;  %v10202_v42 = vsub.f32 %v1130_v6, %v1178_v51  ;;  %v12220_v6 = vand.u32 4294901760, %v9957_v56  ;;  %v10226_v63 = vsub.f32 %v1132_v26, %v1184_v40  ;;  %v10233_v56 = vpack.c.bf16 %v1178_v51, %v1175_v36 }
  0xc5   : > { %8219 = vmatpush3.bf16.msra.mxu0 %v8216_v46  ;;  %v10207_v46 = vpack.c.bf16 %v1172_v37, %v1169_v25  ;;  %v12221_v25 = vand.u32 4294901760, %v9959_v57  ;;  %v1187_v57 = vand.u32 4294901760, %v1133_v52  ;;  %v12224_v26 = vand.u32 4294901760, %v9984_v9 }
  0xc6   : > { %8221 = vmatprep.subr.bf16.mxu0 %v8220_v44  ;;  %v12159_v15 = vand.u32 4294901760, %v10202_v42  ;;  %v12162_v51 = vand.u32 4294901760, %v10224_v45  ;;  %v10259_v7 = vpack.c.bf16 %v1184_v40, %v1181_v48  ;;  %v12225_v9 = vand.u32 4294901760, %v10099_v8 }
  0xc7   : > { %8283 = vmatpush3.bf16.msra.mxu1 %v10184_v19  ;;  %v8228_v37 = vpack.c.bf16 %v12221_v25, %v12220_v6  ;;  %v8232_v6 = vpack.c.bf16 %v12224_v26, %v12223_v34  ;;  %v10246_v25 = vsub.f32 %v1133_v52, %v1187_v57  ;;  %v12226_v52 = vand.u32 4294901760, %v10101_v38 }
  0xc8   : > { %8284 = vmatprep.subr.bf16.mxu1 %v12218_v58  ;;  %v10240_v62 = vpack.c.bf16 %v12159_v15, %v12160_v61  ;;  %v12161_v15 = vand.u32 4294901760, %v10226_v63  ;;  %v12228_v48 = vand.u32 4294901760, %v10007_v28  ;;  %v12229_v40 = vand.u32 4294901760, %v10009_v29 }
  0xc9   : > { %8223 = vmatpush3.bf16.msra.mxu0 %v8220_v44  ;;  %v1190_v44 = vand.u32 4294901760, %v1134_v24  ;;  %v1266_v34 = vsub.f32 %v10101_v38, %v12226_v52  ;;  %v1228_v52 = vsub.f32 %v10224_v45, %v12162_v51  ;;  %v12165_v61 = vand.u32 4294901760, %v10252_v30 }
  0xca   : > { %8225 = vmatprep.subr.bf16.mxu0 %v8224_v14  ;;  %12222 = vst [vmem:[#allocation27_spill] sm:$0xff] %v10240_v62  ;;  %v10272_v49 = vpack.c.bf16 %v12161_v15, %v12163_v53  ;;  %v1356_v15 = vand.u32 4294901760, %v10246_v25  ;;  %v12230_v29 = vand.u32 4294901760, %v10109_v10 }
  0xcb   : > { %8286 = vmatpush3.bf16.msra.mxu1 %v10207_v46  ;;  %v10248_v36 = vsub.f32 %v1134_v24, %v1190_v44  ;;  %v1259_v24 = vsub.f32 %v10099_v8, %v12225_v9  ;;  %v10274_v26 = vpack.c.bf16 %v1190_v44, %v1187_v57  ;;  %v8236_v9 = vpack.c.bf16 %v12229_v40, %v12228_v48 }
  0xcc   : > { %8287 = vmatprep.subr.bf16.mxu1 %v12218_v58  ;;  %12227 = vst [vmem:[#allocation28_spill] sm:$0xff] %v10272_v49  ;;  %v1267_v57 = vand.u32 4294901760, %v1266_v34  ;;  %v1273_v44 = vsub.f32 %v10109_v10, %v12230_v29  ;;  %v12231_v48 = vand.u32 4294901760, %v10111_v59  ;;  %v12232_v34 = vand.u32 4294901760, %v10130_v5 }
  0xcd   : > { %8227 = vmatpush3.bf16.msra.mxu0 %v8224_v14  ;;  %v10256_v14 = vand.u32 4294901760, %v1139_v35  ;;  %v1260_v28 = vand.u32 4294901760, %v1259_v24  ;;  %v1229_v24 = vand.u32 4294901760, %v1228_v52  ;;  %v1238_v29 = vsub.f32 %v10252_v30, %v12165_v61 }
  0xce   : > { %8229 = vmatprep.subr.bf16.mxu0 %v8228_v37  ;;  %v1280_v40 = vsub.f32 %v10111_v59, %v12231_v48  ;;  %v1287_v51 = vsub.f32 %v10130_v5, %v12232_v34  ;;  %v1274_v49 = vand.u32 4294901760, %v1273_v44  ;;  %v12234_v52 = vand.u32 4294901760, %v10153_v47 }
  0xcf   : > { %8289 = vmatpush3.bf16.msra.mxu1 %v10233_v56  ;;  %v10285_v62 = vsub.f32 %v1139_v35, %v10256_v14  ;;  %v8297_v53 = vpack.c.bf16 %v1267_v57, %v1260_v28  ;;  %v1239_v61 = vand.u32 4294901760, %v1238_v29  ;;  %v12237_v29 = vand.u32 4294901760, %v10176_v60 }
  0xd0   : > { %8290 = vmatprep.subr.bf16.mxu1 %v12218_v58  ;;  %v1281_v1 = vand.u32 4294901760, %v1280_v40  ;;  %v1301_v34 = vsub.f32 %v10153_v47, %v12234_v52  ;;  %v1288_v44 = vand.u32 4294901760, %v1287_v51  ;;  %v12238_v52 = vand.u32 4294901760, %v10178_v18 }
  0xd1   : > { %8231 = vmatpush3.bf16.msra.mxu0 %v8228_v37  ;;  %v12164_v37 = vand.u32 4294901760, %v10248_v36  ;;  %v1247_v48 = vand.u32 4294901760, %v10285_v62 }
  0xd2   : > { %8233 = vmatprep.subr.bf16.mxu0 %v8232_v6  ;;  %v8300_v57 = vpack.c.bf16 %v1281_v1, %v1274_v49 }
  0xd3   : > { %8292 = vmatpush3.bf16.msra.mxu1 %v10259_v7  ;;  %v10301_v35 = vpack.c.bf16 %v12164_v37, %v1356_v15  ;;  %v12233_v37 = vand.u32 4294901760, %v10132_v50  ;;  %v1248_v28 = vsub.f32 %v10285_v62, %v1247_v48 }
  0xd4   : > { %8293 = vmatprep.subr.bf16.mxu1 %v12218_v58 }
  0xd5   : > { %8235 = vmatpush3.bf16.msra.mxu0 %v8232_v6  ;;  %v1294_v6 = vsub.f32 %v10132_v50, %v12233_v37  ;;  %v12235_v37 = vand.u32 4294901760, %v10155_v39  ;;  %v1249_v1 = vand.u32 4294901760, %v1248_v28 }
  0xd6   : > { %8237 = vmatprep.subr.bf16.mxu0 %v8236_v9 }
  0xd7   : > { %8295 = vmatpush3.bf16.msra.mxu1 %v10274_v26  ;;  %v1295_v40 = vand.u32 4294901760, %v1294_v6  ;;  %v1315_v6 = vsub.f32 %v10176_v60, %v12237_v29 }
  0xd8   : > { %8296 = vmatprep.subr.bf16.mxu1 %v12218_v58 }
  0xd9   : > { %8239 = vmatpush3.bf16.msra.mxu0 %v8236_v9  ;;  %v1308_v9 = vsub.f32 %v10155_v39, %v12235_v37  ;;  %v8303_v51 = vpack.c.bf16 %v1295_v40, %v1288_v44  ;;  %v1322_v37 = vsub.f32 %v10178_v18, %v12238_v52  ;;  %v1316_v28 = vand.u32 4294901760, %v1315_v6 }
  0xda   : > { %6745 = vmatmul.mubr.f32.vlgmr.msra.gmra.mrb[2].mxu1 %v1229_v24  ;;  %8241 = vmatprep.subr.bf16.mxu0 %v9898_v17  ;;  %v12236_v24 = vmov 0.0   ;;  %v12240_v44 = vand.u32 4294901760, %v10202_v42 }
  0xdb   : > { %8298 = vmatpush3.bf16.msra.mxu1 %v8297_v53  ;;  %6747 = vmatprep.mubr.msk.f32.mxu1 %vm9704_vm1, %v12236_v24  ;;  %v1302_v53 = vand.u32 4294901760, %v1301_v34  ;;  %v1309_v49 = vand.u32 4294901760, %v1308_v9 }
  0xdc   : > { %6675 = vmatmul.mubr.f32.vlgmr.msra.gmra.mrb[0].mxu0 %v9968_v0  ;;  %8299 = vmatprep.subr.bf16.mxu1 %v12218_v58  ;;  %v1336_v40 = vsub.f32 %v10202_v42, %v12240_v44 }
  0xdd   : > { %8243 = vmatpush3.bf16.msra.mxu0 %v9898_v17  ;;  %6709 = vmatprep.mubr.f32.mxu0 %v9955_v55  ;;  %v12239_v17 = vand.u32 4294901760, %v10200_v43  ;;  %v8306_v34 = vpack.c.bf16 %v1309_v49, %v1302_v53  ;;  %v12242_v49 = vand.u32 4294901760, %v10226_v63 }
  0xde   : > { %8245 = vmatprep.subr.bf16.mxu0 %v9906_v21  ;;  %6748 = vmatmul.mubr.f32.gmra.mrb[4].mxu1 %v1239_v61 }
  0xdf   : > { %8301 = vmatpush3.bf16.msra.mxu1 %v8300_v57  ;;  %6750 = vmatprep.mubr.msk.f32.mxu1 %vm9704_vm1, %v12236_v24  ;;  %v1329_v61 = vsub.f32 %v10200_v43, %v12239_v17  ;;  %v1323_v57 = vand.u32 4294901760, %v1322_v37  ;;  %v1350_v29 = vsub.f32 %v10226_v63, %v12242_v49  ;;  %v1357_v37 = vsub.f32 %v10246_v25, %v1356_v15 }
  0xe0   : > { %8302 = vmatprep.subr.bf16.mxu1 %v12218_v58  ;;  %v12243_v17 = vand.u32 4294901760, %v10248_v36 }
  0xe1   : > { %8247 = vmatpush3.bf16.msra.mxu0 %v9906_v21  ;;  %v12241_v21 = vand.u32 4294901760, %v10221_v12  ;;  %v8309_v53 = vpack.c.bf16 %v1323_v57, %v1316_v28  ;;  %v1351_v52 = vand.u32 4294901760, %v1350_v29 }
  0xe2   : > { %8249 = vmatprep.subr.bf16.mxu0 %v9921_v31  ;;  %6751 = vmatmul.mubr.f32.gmra.mrb[6].mxu1 %v1249_v1  ;;  %v1330_v1 = vand.u32 4294901760, %v1329_v61  ;;  %v1364_v61 = vsub.f32 %v10248_v36, %v12243_v17 }
  0xe3   : > { %8304 = vmatpush3.bf16.msra.mxu1 %v8303_v51  ;;  %6785 = vmatprep.mubr.msk.f32.mxu1 %vm9704_vm1, %v12236_v24  ;;  %v1343_v9 = vsub.f32 %v10221_v12, %v12241_v21  ;;  %v1337_v51 = vand.u32 4294901760, %v1336_v40 }
  0xe4   : > { %8305 = vmatprep.subr.bf16.mxu1 %v12218_v58  ;;  %v1365_v28 = vand.u32 4294901760, %v1364_v61 }
  0xe5   : > { %8251 = vmatpush3.bf16.msra.mxu0 %v9921_v31  ;;  %v1344_v31 = vand.u32 4294901760, %v1343_v9  ;;  %v8312_v6 = vpack.c.bf16 %v1337_v51, %v1330_v1  ;;  %v10545_v1 = vld [vmem:[#allocation4 + $0x60] sm:$0xff]  ;;  %v10547_v51 = vld [vmem:[#allocation4 + $0x68] sm:$0xff] }
  0xe6   : > { %8253 = vmatprep.subr.bf16.mxu0 %v9935_v41 }
  0xe7   : > { %8307 = vmatpush3.bf16.msra.mxu1 %v8306_v34  ;;  %v1358_v34 = vand.u32 4294901760, %v1357_v37  ;;  %v9522_v37 = vld [vmem:[#allocation2 + $0x8] sm:$0xff] }
  0xe8   : > { %8308 = vmatprep.subr.bf16.mxu1 %v12218_v58  ;;  %v10558_v17 = vand.u32 4294901760, %v9522_v37 }
  0xe9   : > { %8255 = vmatpush3.bf16.msra.mxu0 %v9935_v41  ;;  %v8315_v41 = vpack.c.bf16 %v1351_v52, %v1344_v31  ;;  %v8318_v15 = vpack.c.bf16 %v1365_v28, %v1358_v34  ;;  %v1911_v34 = vand.u32 4294901760, %v10547_v51  ;;  %v10570_v28 = vld [vmem:[#allocation4 + $0x70] sm:$0xff] }
  0xea   : > { %8257 = vmatprep.subr.bf16.mxu0 %v9953_v54 }
  0xeb   : > { %8310 = vmatpush3.bf16.msra.mxu1 %v8309_v53 }
  0xec   : > { %8311 = vmatprep.subr.bf16.mxu1 %v12218_v58 }
  0xed   : > { %8259 = vmatpush3.bf16.msra.mxu0 %v9953_v54  ;;  %v8321_v54 = vpack.c.bf16 %v10101_v38, %v10099_v8  ;;  %v8333_v8 = vpack.c.bf16 %v10178_v18, %v10176_v60  ;;  %v8336_v38 = vpack.c.bf16 %v10202_v42, %v10200_v43  ;;  %v12247_v42 = vld [vmem:[#allocation27_spill] sm:$0xff]  ;;  %v10494_v18 = vld [vmem:[#allocation4 + $0x28] sm:$0xff] }
  0xee   : > { %8261 = vmatprep.subr.bf16.mxu0 %v9972_v2  ;;  %v1106_v60 = vld [vmem:[#allocation4 + $0x20] sm:$0xff]  ;;  %v1887_v43 = vand.u32 4294901760, %v10494_v18 }
  0xef   : > { %8313 = vmatpush3.bf16.msra.mxu1 %v8312_v6 }
  0xf0   : > { %8314 = vmatprep.subr.bf16.mxu1 %v12218_v58 }
  0xf1   : > { %8263 = vmatpush3.bf16.msra.mxu0 %v9972_v2  ;;  %v8324_v2 = vpack.c.bf16 %v10111_v59, %v10109_v10  ;;  %v8339_v10 = vpack.c.bf16 %v10226_v63, %v10221_v12  ;;  %v8342_v59 = vpack.c.bf16 %v10248_v36, %v10246_v25  ;;  %v12244_v63 = vand.u32 4294901760, %v10224_v45  ;;  %v10514_v25 = vld [vmem:[#allocation4 + $0x40] sm:$0xff]  ;;  %v10516_v36 = vld [vmem:[#allocation4 + $0x48] sm:$0xff] }
  0xf2   : > { %8265 = vmatprep.subr.bf16.mxu0 %v9992_v13  ;;  %v12245_v12 = vand.u32 4294901760, %v10252_v30 }
  0xf3   : > { %8316 = vmatpush3.bf16.msra.mxu1 %v8315_v41  ;;  %v1908_v41 = vand.u32 4294901760, %v10545_v1 }
  0xf4   : > { %8317 = vmatprep.subr.bf16.mxu1 %v12218_v58 }
  0xf5   : > { %8267 = vmatpush3.bf16.msra.mxu0 %v9992_v13  ;;  %v8327_v13 = vpack.c.bf16 %v10132_v50, %v10130_v5  ;;  %v1103_v5 = vld [vmem:[#allocation4 + $0x8] sm:$0xff] }
  0xf6   : > { %8269 = vmatprep.subr.bf16.mxu0 %v10016_v32 }
  0xf7   : > { %8319 = vmatpush3.bf16.msra.mxu1 %v8318_v15  ;;  %v10572_v15 = vld [vmem:[#allocation4 + $0x78] sm:$0xff] }
  0xf8   : > { %8320 = vmatprep.subr.bf16.mxu1 %v12218_v58 }
  0xf9   : > { %8271 = vmatpush3.bf16.msra.mxu0 %v10016_v32  ;;  %v8330_v32 = vpack.c.bf16 %v10155_v39, %v10153_v47  ;;  %v1105_v47 = vld [vmem:[#allocation4 + $0x18] sm:$0xff] }
  0xfa   : > { %6786 = vmatmul.mubr.f32.vlgmr.msra.gmra.mrb[2].mxu1 %v10198_v20 }
  0xfb   : > { %8322 = vmatpush3.bf16.msra.mxu1 %v8321_v54  ;;  %6788 = vmatprep.mubr.msk.f32.mxu1 %vm9704_vm1, %v12236_v24 }
  0xfc   : > { %6710 = vmatmul.mubr.f32.vlgmr.msra.gmra.mrb[0].mxu0 %v9968_v0  ;;  %8323 = vmatprep.subr.bf16.mxu1 %v12218_v58 }
  0xfe   : > { %6789 = vmatmul.mubr.f32.gmra.mrb[4].mxu1 %v10230_v3 }
  0xff   : > { %8325 = vmatpush3.bf16.msra.mxu1 %v8324_v2  ;;  %6791 = vmatprep.mubr.msk.f32.mxu1 %vm9704_vm1, %v12236_v24 }
 0x100   : > { %8326 = vmatprep.subr.bf16.mxu1 %v12218_v58 }
 0x102   : > { %6792 = vmatmul.mubr.f32.gmra.mrb[6].mxu1 %v10256_v14 }
 0x103   : > { %8328 = vmatpush3.bf16.msra.mxu1 %v8327_v13  ;;  %6826 = vmatprep.mubr.msk.f32.mxu1 %vm9704_vm1, %v12236_v24 }
 0x104   : > { %8329 = vmatprep.subr.bf16.mxu1 %v12218_v58 }
 0x107   : > { %8331 = vmatpush3.bf16.msra.mxu1 %v8330_v32 }
 0x108   : > { %8332 = vmatprep.subr.bf16.mxu1 %v12218_v58 }
 0x10b   : > { %8334 = vmatpush3.bf16.msra.mxu1 %v8333_v8 }
 0x10c   : > { %8335 = vmatprep.subr.bf16.mxu1 %v12218_v58 }
 0x10f   : > { %8337 = vmatpush3.bf16.msra.mxu1 %v8336_v38 }
 0x110   : > { %8338 = vmatprep.subr.bf16.mxu1 %v12218_v58 }
 0x113   : > { %8340 = vmatpush3.bf16.msra.mxu1 %v8339_v10 }
 0x114   : > { %8341 = vmatprep.subr.bf16.mxu1 %v12218_v58 }
 0x117   : > { %8343 = vmatpush3.bf16.msra.mxu1 %v8342_v59 }
 0x118   : > { %8344 = vmatprep.subr.bf16.mxu1 %v12218_v58 }
 0x11a   : > { %6827 = vmatmul.mubr.f32.vlgmr.msra.gmra.mrb[2].mxu1 %v10224_v45  ;;  %v10504_v45 = vld [vmem:[#allocation4 + $0x38] sm:$0xff] }
 0x11b   : > { %8346 = vmatpush3.bf16.msra.mxu1 %v10113_v16  ;;  %6829 = vmatprep.mubr.msk.f32.mxu1 %vm9704_vm1, %v12236_v24 }
 0x11c   : > { %8347 = vmatprep.subr.bf16.mxu1 %v12218_v58 }
 0x11e   : > { %6830 = vmatmul.mubr.f32.gmra.mrb[4].mxu1 %v10252_v30  ;;  %v12246_v30 = vld [vmem:[#allocation26_spill] sm:$0xff] }
 0x11f   : > { %8349 = vmatpush3.bf16.msra.mxu1 %v10137_v22  ;;  %6832 = vmatprep.mubr.msk.f32.mxu1 %vm9704_vm1, %v12236_v24 }
 0x120   : > { %8350 = vmatprep.subr.bf16.mxu1 %v12218_v58 }
 0x122   : > { %6833 = vmatmul.mubr.f32.gmra.mrb[6].mxu1 %v10285_v62  ;;  %v1893_v62 = vand.u32 4294901760, %v10504_v45 }
 0x123   : > { %8352 = vmatpush3.bf16.msra.mxu1 %v10163_v23  ;;  %6867 = vmatprep.mubr.msk.f32.mxu1 %vm9704_vm1, %v12236_v24 }
 0x124   : > { %8353 = vmatprep.subr.bf16.mxu1 %v12218_v58 }
 0x127   : > { %8355 = vmatpush3.bf16.msra.mxu1 %v10184_v19 }
 0x128   : > { %8356 = vmatprep.subr.bf16.mxu1 %v12218_v58 }
 0x12b   : > { %8358 = vmatpush3.bf16.msra.mxu1 %v10207_v46 }
 0x12c   : > { %8359 = vmatprep.subr.bf16.mxu1 %v12218_v58 }
 0x12f   : > { %8361 = vmatpush3.bf16.msra.mxu1 %v10233_v56 }
 0x130   : > { %8362 = vmatprep.subr.bf16.mxu1 %v12218_v58 }
 0x133   : > { %8364 = vmatpush3.bf16.msra.mxu1 %v10259_v7 }
 0x134   : > { %8365 = vmatprep.subr.bf16.mxu1 %v12218_v58 }
 0x137   : > { %8367 = vmatpush3.bf16.msra.mxu1 %v10274_v26 }
 0x138   : > { %8368 = vmatprep.subr.bf16.mxu1 %v12218_v58 }
 0x13a   : > { %6868 = vmatmul.mubr.f32.vlgmr.msra.gmra.mrb[2].mxu1 %v12244_v63  ;;  %v10590_v63 = vsub.f32 %v9522_v37, %v10558_v17 }
 0x13b   : > { %8370 = vmatpush3.bf16.msra.mxu1 %v10127_v4  ;;  %6870 = vmatprep.mubr.msk.f32.mxu1 %vm9704_vm1, %v12236_v24  ;;  %v12248_v4 = vld [vmem:[#allocation28_spill] sm:$0xff] }
 0x13c   : > { %8371 = vmatprep.subr.bf16.mxu1 %v12218_v58 }
 0x13e   : > { %6871 = vmatmul.mubr.f32.gmra.mrb[4].mxu1 %v12245_v12  ;;  %v9523_v12 = vld [vmem:[#allocation2 + $0x10] sm:$0xf] }
 0x13f   : > { %8373 = vmatpush3.bf16.msra.mxu1 %v10147_v27  ;;  %6873 = vmatprep.mubr.msk.f32.mxu1 %vm9704_vm1, %v12236_v24  ;;  %v1104_v27 = vld [vmem:[#allocation4 + $0x10] sm:$0xff] }
 0x140   : > { %8374 = vmatprep.subr.bf16.mxu1 %v12218_v58 }
 0x142   : > { %6874 = vmatmul.mubr.f32.gmra.mrb[6].mxu1 %v1247_v48  ;;  %v10531_v48 = vld [vmem:[#allocation4 + $0x58] sm:$0xff] }
 0x143   : > { %8376 = vmatpush3.bf16.msra.mxu1 %v10170_v33  ;;  %6908 = vmatprep.mubr.msk.f32.mxu1 %vm9704_vm1, %v12236_v24  ;;  %v1881_v33 = vand.u32 4294901760, %v1105_v47  ;;  %v1905_v53 = vand.u32 4294901760, %v10531_v48 }
 0x144   : > { %8377 = vmatprep.subr.bf16.mxu1 %v12218_v58 }
 0x145   : > { %v10556_v52 = vsub.f32 %v1105_v47, %v1881_v33 }
 0x147   : > { %8379 = vmatpush3.bf16.msra.mxu1 %v10192_v11  ;;  %v1884_v11 = vand.u32 4294901760, %v1106_v60  ;;  %v12166_v59 = vand.u32 4294901760, %v10556_v52 }
 0x148   : > { %8380 = vmatprep.subr.bf16.mxu1 %v12218_v58 }
 0x149   : > { %v10574_v54 = vsub.f32 %v1106_v60, %v1884_v11  ;;  %v12169_v60 = vand.u32 4294901760, %v10590_v63 }
 0x14b   : > { %8382 = vmatpush3.bf16.msra.mxu1 %v12246_v30  ;;  %v10592_v30 = vand.u32 4294901760, %v9523_v12 }
 0x14c   : > { %8383 = vmatprep.subr.bf16.mxu1 %v12218_v58 }
 0x14f   : > { %8385 = vmatpush3.bf16.msra.mxu1 %v12247_v42  ;;  %v10595_v42 = vsub.f32 %v10494_v18, %v1887_v43  ;;  %v10620_v18 = vsub.f32 %v9523_v12, %v10592_v30  ;;  %v1965_v12 = vsub.f32 %v10590_v63, %v12169_v60 }
 0x150   : > { %8386 = vmatprep.subr.bf16.mxu1 %v12218_v58 }
 0x153   : > { %8388 = vmatpush3.bf16.msra.mxu1 %v12248_v4  ;;  %v10602_v4 = vpack.c.bf16 %v1911_v34, %v1908_v41 }
 0x154   : > { %8389 = vmatprep.subr.bf16.mxu1 %v12218_v58 }
 0x157   : > { %8391 = vmatpush3.bf16.msra.mxu1 %v10301_v35  ;;  %v10529_v35 = vld [vmem:[#allocation4 + $0x50] sm:$0xff] }
 0x158   : > { %8392 = vmatprep.subr.bf16.mxu1 %v12218_v58  ;;  %v1902_v9 = vand.u32 4294901760, %v10529_v35 }
 0x15a   : > { %6909 = vmatmul.mubr.f32.vlgmr.msra.gmra.mrb[2].mxu1 %v10198_v20  ;;  %v10565_v61 = vpack.c.bf16 %v1905_v53, %v1902_v9 }
 0x15b   : > { %8394 = vmatpush3.bf16.msra.mxu1 %v10113_v16  ;;  %6911 = vmatprep.mubr.msk.f32.mxu1 %vm9704_vm1, %v12236_v24  ;;  %v1102_v16 = vld [vmem:[#allocation4] sm:$0xff] }
 0x15c   : > { %8395 = vmatprep.subr.bf16.mxu1 %v12218_v58  ;;  %v1872_v50 = vand.u32 4294901760, %v1102_v16 }
 0x15e   : > { %6912 = vmatmul.mubr.f32.gmra.mrb[4].mxu1 %v10230_v3  ;;  %v10535_v44 = vsub.f32 %v1102_v16, %v1872_v50  ;;  %v1914_v16 = vand.u32 4294901760, %v10570_v28 }
 0x15f   : > { %8397 = vmatpush3.bf16.msra.mxu1 %v10137_v22  ;;  %6914 = vmatprep.mubr.msk.f32.mxu1 %vm9704_vm1, %v12236_v24  ;;  %v1875_v22 = vand.u32 4294901760, %v1103_v5 }
 0x160   : > { %8398 = vmatprep.subr.bf16.mxu1 %v12218_v58  ;;  %v1985_v29 = vand.u32 4294901760, %v10535_v44 }
 0x161   : > { %v10491_v39 = vpack.c.bf16 %v1875_v22, %v1872_v50  ;;  %v10537_v40 = vsub.f32 %v1103_v5, %v1875_v22  ;;  %v1917_v5 = vand.u32 4294901760, %v10572_v15 }
 0x162   : > { %6915 = vmatmul.mubr.f32.gmra.mrb[6].mxu1 %v10256_v14  ;;  %v1986_v32 = vsub.f32 %v10535_v44, %v1985_v29 }
 0x163   : > { %8400 = vmatpush3.bf16.msra.mxu1 %v10163_v23  ;;  %6949 = vmatprep.mubr.msk.f32.mxu1 %vm9704_vm1, %v12236_v24  ;;  %v1878_v23 = vand.u32 4294901760, %v1104_v27  ;;  %v1992_v31 = vand.u32 4294901760, %v10537_v40 }
 0x164   : > { %8401 = vmatprep.subr.bf16.mxu1 %v12218_v58 }
 0x165   : > { %v10554_v6 = vsub.f32 %v1104_v27, %v1878_v23  ;;  %v1993_v8 = vsub.f32 %v10537_v40, %v1992_v31  ;;  %v1987_v27 = vand.u32 4294901760, %v1986_v32 }
 0x167   : > { %8403 = vmatpush3.bf16.msra.mxu1 %v10184_v19  ;;  %v10498_v19 = vpack.c.bf16 %v1881_v33, %v1878_v23  ;;  %v1999_v10 = vand.u32 4294901760, %v10554_v6  ;;  %v1994_v47 = vand.u32 4294901760, %v1993_v8  ;;  %v2007_v33 = vsub.f32 %v10556_v52, %v12166_v59 }
 0x168   : > { %8404 = vmatprep.subr.bf16.mxu1 %v12218_v58  ;;  %v1974_v59 = vand.u32 4294901760, %v10620_v18 }
 0x169   : > { %v2000_v23 = vsub.f32 %v10554_v6, %v1999_v10  ;;  %v2008_v8 = vand.u32 4294901760, %v2007_v33 }
 0x16b   : > { %8406 = vmatpush3.bf16.msra.mxu1 %v10207_v46  ;;  %v1108_v46 = vld [vmem:[#allocation4 + $0x30] sm:$0xff]  ;;  %v2001_v32 = vand.u32 4294901760, %v2000_v23 }
 0x16c   : > { %8407 = vmatprep.subr.bf16.mxu1 %v12218_v58 }
 0x16d   : > { %v8444_v23 = vpack.c.bf16 %v2008_v8, %v2001_v32 }
 0x16f   : > { %8409 = vmatpush3.bf16.msra.mxu1 %v10233_v56  ;;  %v1890_v56 = vand.u32 4294901760, %v1108_v46 }
 0x170   : > { %8410 = vmatprep.subr.bf16.mxu1 %v12218_v58 }
 0x171   : > { %v10607_v50 = vsub.f32 %v1108_v46, %v1890_v56  ;;  %v12168_v46 = vand.u32 4294901760, %v10574_v54 }
 0x173   : > { %8412 = vmatpush3.bf16.msra.mxu1 %v10259_v7  ;;  %v1896_v7 = vand.u32 4294901760, %v10514_v25 }
 0x174   : > { %8413 = vmatprep.subr.bf16.mxu1 %v12218_v58 }
 0x177   : > { %8415 = vmatpush3.bf16.msra.mxu1 %v10274_v26  ;;  %v1899_v26 = vand.u32 4294901760, %v10516_v36 }
 0x178   : > { %8416 = vmatprep.subr.bf16.mxu1 %v12218_v58 }
 0x179   : > { %v10540_v21 = vpack.c.bf16 %v1899_v26, %v1896_v7  ;;  %v10639_v37 = vsub.f32 %v10516_v36, %v1899_v26 }
 0x17a   : > { %6950 = vmatmul.mubr.f32.vlgmr.msra.gmra.mrb[2].mxu1 %v10198_v20  ;;  %v10508_v20 = vpack.c.bf16 %v1887_v43, %v1884_v11  ;;  %v10625_v11 = vsub.f32 %v10504_v45, %v1893_v62  ;;  %v10630_v43 = vpack.c.bf16 %v1917_v5, %v1914_v16 }
 0x17b   : > { %8418 = vmatpush3.bf16.msra.mxu1 %v10491_v39  ;;  %6952 = vmatprep.mubr.msk.f32.mxu1 %vm9704_vm1, %v12236_v24  ;;  %v12170_v33 = vand.u32 4294901760, %v10639_v37 }
 0x17c   : > { %8419 = vmatprep.subr.bf16.mxu1 %v12218_v58  ;;  %v2034_v26 = vand.u32 4294901760, %v10625_v11 }
 0x17e   : > { %6953 = vmatmul.mubr.f32.gmra.mrb[4].mxu1 %v10230_v3  ;;  %v10522_v3 = vpack.c.bf16 %v1893_v62, %v1890_v56  ;;  %v12167_v56 = vand.u32 4294901760, %v10595_v42  ;;  %v8441_v62 = vpack.c.bf16 %v1994_v47, %v1987_v27  ;;  %v10663_v27 = vsub.f32 %v10531_v48, %v1905_v53 }
 0x17f   : > { %8421 = vmatpush3.bf16.msra.mxu1 %v10498_v19  ;;  %6955 = vmatprep.mubr.msk.f32.mxu1 %vm9704_vm1, %v12236_v24  ;;  %v2035_v48 = vsub.f32 %v10625_v11, %v2034_v26  ;;  %v10682_v53 = vsub.f32 %v10545_v1, %v1908_v41 }
 0x180   : > { %8422 = vmatprep.subr.bf16.mxu1 %v12218_v58  ;;  %v2021_v36 = vsub.f32 %v10595_v42, %v12167_v56  ;;  %v1966_v56 = vand.u32 4294901760, %v1965_v12  ;;  %v2062_v8 = vand.u32 4294901760, %v10663_v27 }
 0x182   : > { %6956 = vmatmul.mubr.f32.gmra.mrb[6].mxu1 %v10256_v14  ;;  %v9521_v14 = vld [vmem:[#allocation2] sm:$0xff] }
 0x183   : > { %8424 = vmatpush3.bf16.msra.mxu1 %v10508_v20  ;;  %6990 = vmatprep.mubr.msk.f32.mxu1 %vm9704_vm1, %v12236_v24  ;;  %v10533_v57 = vand.u32 4294901760, %v9521_v14 }
 0x184   : > { %8425 = vmatprep.subr.bf16.mxu1 %v12218_v58 }
 0x185   : > { %v10550_v49 = vsub.f32 %v9521_v14, %v10533_v57  ;;  %v10636_v14 = vsub.f32 %v10514_v25, %v1896_v7  ;;  %v2014_v25 = vsub.f32 %v10574_v54, %v12168_v46  ;;  %v2027_v7 = vand.u32 4294901760, %v10607_v50 }
 0x186   : > { %v1975_v46 = vsub.f32 %v10620_v18, %v1974_v59 }
 0x187   : > { %8427 = vmatpush3.bf16.msra.mxu1 %v10522_v3  ;;  %v1954_v13 = vand.u32 4294901760, %v10550_v49  ;;  %v12171_v47 = vand.u32 4294901760, %v10636_v14  ;;  %v2015_v60 = vand.u32 4294901760, %v2014_v25  ;;  %v10695_v25 = vsub.f32 %v10547_v51, %v1911_v34 }
 0x188   : > { %8428 = vmatprep.subr.bf16.mxu1 %v12218_v58  ;;  %v1976_v12 = vand.u32 4294901760, %v1975_v46  ;;  %v2063_v51 = vsub.f32 %v10663_v27, %v2062_v8  ;;  %v10712_v34 = vsub.f32 %v10572_v15, %v1917_v5 }
 0x189   : > { %v1955_v22 = vsub.f32 %v10550_v49, %v1954_v13 }
 0x18b   : > { %8430 = vmatpush3.bf16.msra.mxu1 %v10540_v21  ;;  %v1956_v45 = vand.u32 4294901760, %v1955_v22  ;;  %v10658_v22 = vsub.f32 %v10529_v35, %v1902_v9  ;;  %v2022_v35 = vand.u32 4294901760, %v2021_v36  ;;  %v2028_v9 = vsub.f32 %v10607_v50, %v2027_v7 }
 0x18c   : > { %8431 = vmatprep.subr.bf16.mxu1 %v12218_v58  ;;  %v2036_v36 = vand.u32 4294901760, %v2035_v48 }
 0x18d   : > { %v10576_v2 = vpop.f32.mrb[0].mxu1  ;;  %v2055_v32 = vand.u32 4294901760, %v10658_v22  ;;  %v8447_v1 = vpack.c.bf16 %v2022_v35, %v2015_v60  ;;  %v2029_v41 = vand.u32 4294901760, %v2028_v9  ;;  %v2064_v9 = vand.u32 4294901760, %v2063_v51 }
 0x18e   : > { %v10585_v38 = vpop.f32.mrb[1].mxu1 }
 0x18f   : > { %8433 = vmatpush3.bf16.msra.mxu1 %v10565_v61  ;;  %v2056_v46 = vsub.f32 %v10658_v22, %v2055_v32  ;;  %v8450_v60 = vpack.c.bf16 %v2036_v36, %v2029_v41 }
 0x190   : > { %8434 = vmatprep.subr.bf16.mxu1 %v12218_v58 }
 0x191   : > { %v2057_v35 = vand.u32 4294901760, %v2056_v46 }
 0x193   : > { %8436 = vmatpush3.bf16.msra.mxu1 %v10602_v4 }
 0x194   : > { %8437 = vmatprep.subr.bf16.mxu1 %v12218_v58 }
 0x197   : > { %8439 = vmatpush3.bf16.msra.mxu1 %v10630_v43 }
 0x198   : > { %8440 = vmatprep.subr.bf16.mxu1 %v12218_v58 }
 0x19a   : > { %6991 = vmatmul.mubr.f32.vlgmr.msra.gmra.mrb[2].mxu1 %v1956_v45  ;;  %v2042_v45 = vsub.f32 %v10636_v14, %v12171_v47 }
 0x19b   : > { %8442 = vmatpush3.bf16.msra.mxu1 %v8441_v62  ;;  %6993 = vmatprep.mubr.msk.f32.mxu1 %vm9704_vm1, %v12236_v24  ;;  %v2049_v62 = vsub.f32 %v10639_v37, %v12170_v33  ;;  %v10701_v33 = vsub.f32 %v10570_v28, %v1914_v16  ;;  %v2069_v28 = vand.u32 4294901760, %v10682_v53  ;;  %v2076_v16 = vand.u32 4294901760, %v10695_v25 }
 0x19c   : > { %8443 = vmatprep.subr.bf16.mxu1 %v12218_v58  ;;  %v2043_v47 = vand.u32 4294901760, %v2042_v45  ;;  %v2090_v45 = vand.u32 4294901760, %v10712_v34 }
 0x19d   : > { %v2070_v15 = vsub.f32 %v10682_v53, %v2069_v28  ;;  %v2077_v5 = vsub.f32 %v10695_v25, %v2076_v16  ;;  %v2083_v48 = vand.u32 4294901760, %v10701_v33 }
 0x19e   : > { %6994 = vmatmul.mubr.f32.gmra.mrb[4].mxu1 %v1966_v56  ;;  %v2050_v56 = vand.u32 4294901760, %v2049_v62  ;;  %v8456_v62 = vpack.c.bf16 %v2064_v9, %v2057_v35  ;;  %v2091_v41 = vsub.f32 %v10712_v34, %v2090_v45  ;;  %v8471_v35 = vpack.c.bf16 %v10595_v42, %v10574_v54 }
 0x19f   : > { %8445 = vmatpush3.bf16.msra.mxu1 %v8444_v23  ;;  %6996 = vmatprep.mubr.msk.f32.mxu1 %vm9704_vm1, %v12236_v24  ;;  %v8474_v9 = vpack.c.bf16 %v10625_v11, %v10607_v50  ;;  %v2604_v11 = vld [vmem:[#allocation4 + $0x128] sm:$0xff] }
 0x1a0   : > { %8446 = vmatprep.subr.bf16.mxu1 %v12218_v58  ;;  %v8453_v23 = vpack.c.bf16 %v2050_v56, %v2043_v47  ;;  %v2071_v47 = vand.u32 4294901760, %v2070_v15  ;;  %v2092_v46 = vand.u32 4294901760, %v2091_v41  ;;  %v8477_v15 = vpack.c.bf16 %v10639_v37, %v10636_v14 }
 0x1a1   : > { %v8483_v41 = vpack.c.bf16 %v10695_v25, %v10682_v53  ;;  %v2610_v25 = vld [vmem:[#allocation4 + $0x158] sm:$0xff] }
 0x1a2   : > { %6997 = vmatmul.mubr.f32.gmra.mrb[6].mxu1 %v1976_v12  ;;  %v2078_v12 = vand.u32 4294901760, %v2077_v5  ;;  %v5715_v5 = vld [vmem:[%s12120_s4 + $0x4] ss:$0 sm:$0xff] }
 0x1a3   : > { %8448 = vmatpush3.bf16.msra.mxu1 %v8447_v1  ;;  %7031 = vmatprep.mubr.msk.f32.mxu1 %vm9704_vm1, %v12236_v24  ;;  %v2084_v1 = vsub.f32 %v10701_v33, %v2083_v48 }
 0x1a4   : > { %8449 = vmatprep.subr.bf16.mxu1 %v12218_v58  ;;  %v8459_v36 = vpack.c.bf16 %v2078_v12, %v2071_v47  ;;  %v9280_v47 = vadd.f32 %v10576_v2, %v5715_v5  ;;  %v9282_v12 = vadd.f32 %v5715_v5, %v10585_v38  ;;  %v8513_v2 = vpack.c.bf16 %v1992_v31, %v1985_v29 }
 0x1a5   : > { %v2085_v56 = vand.u32 4294901760, %v2084_v1  ;;  %v12249_v38 = vand.u32 4294901760, %v10556_v52  ;;  %v8522_v31 = vpack.c.bf16 %v2034_v26, %v2027_v7  ;;  %v2606_v7 = vld [vmem:[#allocation4 + $0x138] sm:$0xff] }
 0x1a7   : > { %8451 = vmatpush3.bf16.msra.mxu1 %v8450_v60  ;;  %v8462_v51 = vpack.c.bf16 %v2092_v46, %v2085_v56  ;;  %v8465_v60 = vpack.c.bf16 %v10537_v40, %v10535_v44  ;;  %v12250_v44 = vand.u32 4294901760, %v10590_v63  ;;  %v12251_v40 = vand.u32 4294901760, %v10574_v54 }
 0x1a8   : > { %8452 = vmatprep.subr.bf16.mxu1 %v12218_v58 }
 0x1ab   : > { %8454 = vmatpush3.bf16.msra.mxu1 %v8453_v23  ;;  %v8468_v23 = vpack.c.bf16 %v10556_v52, %v10554_v6  ;;  %v12253_v6 = vand.u32 4294901760, %v10636_v14  ;;  %v12254_v52 = vand.u32 4294901760, %v10639_v37  ;;  %v2632_v37 = vand.u32 4294901760, %v2604_v11 }
 0x1ac   : > { %8455 = vmatprep.subr.bf16.mxu1 %v12218_v58 }
 0x1ad   : > { %v8525_v54 = vpack.c.bf16 %v12254_v52, %v12253_v6 }
 0x1af   : > { %8457 = vmatpush3.bf16.msra.mxu1 %v8456_v62  ;;  %v8480_v62 = vpack.c.bf16 %v10663_v27, %v10658_v22  ;;  %v2638_v22 = vand.u32 4294901760, %v2606_v7  ;;  %v2607_v27 = vld [vmem:[#allocation4 + $0x140] sm:$0xff] }
 0x1b0   : > { %8458 = vmatprep.subr.bf16.mxu1 %v12218_v58 }
 0x1b3   : > { %8460 = vmatpush3.bf16.msra.mxu1 %v8459_v36 }
 0x1b4   : > { %8461 = vmatprep.subr.bf16.mxu1 %v12218_v58 }
 0x1b7   : > { %8463 = vmatpush3.bf16.msra.mxu1 %v8462_v51  ;;  %v8486_v51 = vpack.c.bf16 %v10712_v34, %v10701_v33  ;;  %v2608_v33 = vld [vmem:[#allocation4 + $0x148] sm:$0xff] }
 0x1b8   : > { %8464 = vmatprep.subr.bf16.mxu1 %v12218_v58 }
 0x1ba   : > { %7032 = vmatmul.mubr.f32.vlgmr.msra.gmra.mrb[2].mxu1 %v10533_v57 }
 0x1bb   : > { %8466 = vmatpush3.bf16.msra.mxu1 %v8465_v60  ;;  %7034 = vmatprep.mubr.msk.f32.mxu1 %vm9704_vm1, %v12236_v24  ;;  %v8516_v60 = vpack.c.bf16 %v12249_v38, %v1999_v10  ;;  %v8531_v10 = vpack.c.bf16 %v2076_v16, %v2069_v28 }
 0x1bc   : > { %8467 = vmatprep.subr.bf16.mxu1 %v12218_v58 }
 0x1be   : > { %7035 = vmatmul.mubr.f32.gmra.mrb[4].mxu1 %v10558_v17 }
 0x1bf   : > { %8469 = vmatpush3.bf16.msra.mxu1 %v8468_v23  ;;  %7037 = vmatprep.mubr.msk.f32.mxu1 %vm9704_vm1, %v12236_v24  ;;  %v10915_v23 = vld [vmem:[#allocation4 + $0x168] sm:$0xff] }
 0x1c0   : > { %8470 = vmatprep.subr.bf16.mxu1 %v12218_v58 }
 0x1c2   : > { %7038 = vmatmul.mubr.f32.gmra.mrb[6].mxu1 %v10592_v30 }
 0x1c3   : > { %8472 = vmatpush3.bf16.msra.mxu1 %v8471_v35  ;;  %7072 = vmatprep.mubr.msk.f32.mxu1 %vm9704_vm1, %v12236_v24 }
 0x1c4   : > { %8473 = vmatprep.subr.bf16.mxu1 %v12218_v58 }
 0x1c7   : > { %8475 = vmatpush3.bf16.msra.mxu1 %v8474_v9 }
 0x1c8   : > { %8476 = vmatprep.subr.bf16.mxu1 %v12218_v58 }
 0x1cb   : > { %8478 = vmatpush3.bf16.msra.mxu1 %v8477_v15 }
 0x1cc   : > { %8479 = vmatprep.subr.bf16.mxu1 %v12218_v58 }
 0x1cf   : > { %v6711_v1 = vpop.f32.mrb[0].mxu0  ;;  %8481 = vmatpush3.bf16.msra.mxu1 %v8480_v62 }
 0x1d0   : > { %v10771_v36 = vadd.f32 %v9280_v47, %v6711_v1  ;;  %v1092_v56 = vpop.f32.mrb[1].mxu0  ;;  %8482 = vmatprep.subr.bf16.mxu1 %v12218_v58  ;;  %v10929_v1 = vld [vmem:[#allocation4 + $0x170] sm:$0xff] }
 0x1d1   : > { %v10774_v46 = vadd.f32 %v9282_v12, %v1092_v56  ;;  %v2656_v12 = vand.u32 4294901760, %v10915_v23 }
 0x1d3   : > { %8484 = vmatpush3.bf16.msra.mxu1 %v8483_v41  ;;  %v10931_v41 = vld [vmem:[#allocation4 + $0x178] sm:$0xff] }
 0x1d4   : > { %8485 = vmatprep.subr.bf16.mxu1 %v12218_v58  ;;  %v2662_v6 = vand.u32 4294901760, %v10931_v41 }
 0x1d7   : > { %8487 = vmatpush3.bf16.msra.mxu1 %v8486_v51 }
 0x1d8   : > { %8488 = vmatprep.subr.bf16.mxu1 %v12218_v58 }
 0x1da   : > { %7073 = vmatmul.mubr.f32.vlgmr.msra.gmra.mrb[2].mxu1 %v10550_v49  ;;  %v12252_v49 = vand.u32 4294901760, %v10595_v42  ;;  %v2601_v42 = vld [vmem:[#allocation4 + $0x110] sm:$0xff] }
 0x1db   : > { %8490 = vmatpush3.bf16.msra.mxu1 %v10491_v39  ;;  %7075 = vmatprep.mubr.msk.f32.mxu1 %vm9704_vm1, %v12236_v24 }
 0x1dc   : > { %8491 = vmatprep.subr.bf16.mxu1 %v12218_v58  ;;  %v8519_v29 = vpack.c.bf16 %v12252_v49, %v12251_v40  ;;  %v10946_v49 = vsub.f32 %v2604_v11, %v2632_v37 }
 0x1de   : > { %7076 = vmatmul.mubr.f32.gmra.mrb[4].mxu1 %v10590_v63 }
 0x1df   : > { %8493 = vmatpush3.bf16.msra.mxu1 %v10498_v19  ;;  %7078 = vmatprep.mubr.msk.f32.mxu1 %vm9704_vm1, %v12236_v24 }
 0x1e0   : > { %8494 = vmatprep.subr.bf16.mxu1 %v12218_v58 }
 0x1e2   : > { %7079 = vmatmul.mubr.f32.gmra.mrb[6].mxu1 %v10620_v18 }
 0x1e3   : > { %8496 = vmatpush3.bf16.msra.mxu1 %v10508_v20  ;;  %7113 = vmatprep.mubr.msk.f32.mxu1 %vm9704_vm1, %v12236_v24 }
 0x1e4   : > { %8497 = vmatprep.subr.bf16.mxu1 %v12218_v58 }
 0x1e7   : > { %8499 = vmatpush3.bf16.msra.mxu1 %v10522_v3 }
 0x1e8   : > { %8500 = vmatprep.subr.bf16.mxu1 %v12218_v58 }
 0x1eb   : > { %8502 = vmatpush3.bf16.msra.mxu1 %v10540_v21 }
 0x1ec   : > { %8503 = vmatprep.subr.bf16.mxu1 %v12218_v58 }
 0x1ef   : > { %8505 = vmatpush3.bf16.msra.mxu1 %v10565_v61 }
 0x1f0   : > { %8506 = vmatprep.subr.bf16.mxu1 %v12218_v58 }
 0x1f3   : > { %8508 = vmatpush3.bf16.msra.mxu1 %v10602_v4 }
 0x1f4   : > { %8509 = vmatprep.subr.bf16.mxu1 %v12218_v58 }
 0x1f7   : > { %8511 = vmatpush3.bf16.msra.mxu1 %v10630_v43 }
 0x1f8   : > { %8512 = vmatprep.subr.bf16.mxu1 %v12218_v58 }
 0x1fa   : > { %7114 = vmatmul.mubr.f32.vlgmr.msra.gmra.mrb[2].mxu1 %v1954_v13  ;;  %v8528_v13 = vpack.c.bf16 %v2062_v8, %v2055_v32  ;;  %v2644_v32 = vand.u32 4294901760, %v2608_v33  ;;  %v2609_v8 = vld [vmem:[#allocation4 + $0x150] sm:$0xff] }
 0x1fb   : > { %8514 = vmatpush3.bf16.msra.mxu1 %v8513_v2  ;;  %7116 = vmatprep.mubr.msk.f32.mxu1 %vm9704_vm1, %v12236_v24  ;;  %v2647_v16 = vand.u32 4294901760, %v2609_v8 }
 0x1fc   : > { %8515 = vmatprep.subr.bf16.mxu1 %v12218_v58 }
 0x1fe   : > { %7117 = vmatmul.mubr.f32.gmra.mrb[4].mxu1 %v12250_v44  ;;  %v12255_v44 = vld [vmem:[#allocation19_spill] sm:$0xff] }
 0x1ff   : > { %8517 = vmatpush3.bf16.msra.mxu1 %v8516_v60  ;;  %7119 = vmatprep.mubr.msk.f32.mxu1 %vm9704_vm1, %v12236_v24  ;;  %v10944_v40 = vand.u32 4294901760, %v12255_v44 }
 0x200   : > { %8518 = vmatprep.subr.bf16.mxu1 %v12218_v58 }
 0x202   : > { %7120 = vmatmul.mubr.f32.gmra.mrb[6].mxu1 %v1974_v59  ;;  %v8534_v59 = vpack.c.bf16 %v2090_v45, %v2083_v48  ;;  %v2650_v48 = vand.u32 4294901760, %v2610_v25  ;;  %v10913_v45 = vld [vmem:[#allocation4 + $0x160] sm:$0xff] }
 0x203   : > { %8520 = vmatpush3.bf16.msra.mxu1 %v8519_v29  ;;  %7154 = vmatprep.mubr.msk.f32.mxu1 %vm9704_vm1, %v12236_v24  ;;  %v2653_v47 = vand.u32 4294901760, %v10913_v45 }
 0x204   : > { %8521 = vmatprep.subr.bf16.mxu1 %v12218_v58  ;;  %v10924_v62 = vpack.c.bf16 %v2650_v48, %v2647_v16 }
 0x205   : > { %v10949_v29 = vpack.c.bf16 %v2656_v12, %v2653_v47 }
 0x207   : > { %8523 = vmatpush3.bf16.msra.mxu1 %v8522_v31  ;;  %v2659_v31 = vand.u32 4294901760, %v10929_v1 }
 0x208   : > { %8524 = vmatprep.subr.bf16.mxu1 %v12218_v58 }
 0x20b   : > { %8526 = vmatpush3.bf16.msra.mxu1 %v8525_v54 }
 0x20c   : > { %8527 = vmatprep.subr.bf16.mxu1 %v12218_v58 }
 0x20f   : > { %8529 = vmatpush3.bf16.msra.mxu1 %v8528_v13 }
 0x210   : > { %8530 = vmatprep.subr.bf16.mxu1 %v12218_v58 }
 0x213   : > { %8532 = vmatpush3.bf16.msra.mxu1 %v8531_v10 }
 0x214   : > { %8533 = vmatprep.subr.bf16.mxu1 %v12218_v58 }
 0x217   : > { %8535 = vmatpush3.bf16.msra.mxu1 %v8534_v59 }
 0x218   : > { %8536 = vmatprep.subr.bf16.mxu1 %v12218_v58 }
 0x21a   : > { %7155 = vmatmul.mubr.f32.vlgmr.msra.gmra.mrb[2].mxu1 %v10533_v57 }
 0x21b   : > { %8538 = vmatpush3.bf16.msra.mxu1 %v10491_v39  ;;  %7157 = vmatprep.mubr.msk.f32.mxu1 %vm9704_vm1, %v12236_v24  ;;  %v2599_v39 = vld [vmem:[#allocation4 + $0x100] sm:$0xff] }
 0x21c   : > { %8539 = vmatprep.subr.bf16.mxu1 %v12218_v58 }
 0x21e   : > { %7158 = vmatmul.mubr.f32.gmra.mrb[4].mxu1 %v10558_v17 }
 0x21f   : > { %8541 = vmatpush3.bf16.msra.mxu1 %v10498_v19  ;;  %7160 = vmatprep.mubr.msk.f32.mxu1 %vm9704_vm1, %v12236_v24  ;;  %v2600_v19 = vld [vmem:[#allocation4 + $0x108] sm:$0xff] }
 0x220   : > { %8542 = vmatprep.subr.bf16.mxu1 %v12218_v58  ;;  %v2620_v63 = vand.u32 4294901760, %v2600_v19 }
 0x222   : > { %7161 = vmatmul.mubr.f32.gmra.mrb[6].mxu1 %v10592_v30  ;;  %v10907_v28 = vsub.f32 %v2600_v19, %v2620_v63  ;;  %v10966_v19 = vsub.f32 %v2606_v7, %v2638_v22 }
 0x223   : > { %8544 = vmatpush3.bf16.msra.mxu1 %v10508_v20  ;;  %7195 = vmatprep.mubr.msk.f32.mxu1 %vm9704_vm1, %v12236_v24  ;;  %v2617_v20 = vand.u32 4294901760, %v2599_v39 }
 0x224   : > { %8545 = vmatprep.subr.bf16.mxu1 %v12218_v58  ;;  %v2737_v5 = vand.u32 4294901760, %v10907_v28 }
 0x225   : > { %v10881_v50 = vpack.c.bf16 %v2620_v63, %v2617_v20  ;;  %v10905_v34 = vsub.f32 %v2599_v39, %v2617_v20  ;;  %v10964_v39 = vsub.f32 %v12255_v44, %v10944_v40  ;;  %v10969_v20 = vpack.c.bf16 %v2662_v6, %v2659_v31 }
 0x226   : > { %v2738_v2 = vsub.f32 %v10907_v28, %v2737_v5 }
 0x227   : > { %8547 = vmatpush3.bf16.msra.mxu1 %v10522_v3  ;;  %v2602_v3 = vld [vmem:[#allocation4 + $0x118] sm:$0xff]  ;;  %v2730_v35 = vand.u32 4294901760, %v10905_v34 }
 0x228   : > { %8548 = vmatprep.subr.bf16.mxu1 %v12218_v58  ;;  %v2626_v18 = vand.u32 4294901760, %v2602_v3  ;;  %v2739_v13 = vand.u32 4294901760, %v2738_v2 }
 0x229   : > { %v2731_v51 = vsub.f32 %v10905_v34, %v2730_v35 }
 0x22a   : > { %v10920_v15 = vsub.f32 %v2602_v3, %v2626_v18 }
 0x22b   : > { %8550 = vmatpush3.bf16.msra.mxu1 %v10540_v21  ;;  %v2623_v21 = vand.u32 4294901760, %v2601_v42  ;;  %v2732_v54 = vand.u32 4294901760, %v2731_v51 }
 0x22c   : > { %8551 = vmatprep.subr.bf16.mxu1 %v12218_v58  ;;  %v2751_v60 = vand.u32 4294901760, %v10920_v15 }
 0x22d   : > { %v10918_v9 = vsub.f32 %v2601_v42, %v2623_v21  ;;  %v12186_v42 = vand.u32 4294901760, %v10946_v49 }
 0x22e   : > { %v2752_v59 = vsub.f32 %v10920_v15, %v2751_v60 }
 0x22f   : > { %8553 = vmatpush3.bf16.msra.mxu1 %v10565_v61  ;;  %v2603_v61 = vld [vmem:[#allocation4 + $0x120] sm:$0xff]  ;;  %v2744_v38 = vand.u32 4294901760, %v10918_v9 }
 0x230   : > { %8554 = vmatprep.subr.bf16.mxu1 %v12218_v58  ;;  %v2629_v14 = vand.u32 4294901760, %v2603_v61  ;;  %v2753_v11 = vand.u32 4294901760, %v2752_v59 }
 0x231   : > { %v2745_v10 = vsub.f32 %v10918_v9, %v2744_v38 }
 0x232   : > { %v10893_v26 = vpack.c.bf16 %v2632_v37, %v2629_v14  ;;  %v10933_v56 = vsub.f32 %v2603_v61, %v2629_v14  ;;  %v12185_v14 = vand.u32 4294901760, %v10964_v39 }
 0x233   : > { %8556 = vmatpush3.bf16.msra.mxu1 %v10602_v4  ;;  %v10886_v4 = vpack.c.bf16 %v2626_v18, %v2623_v21  ;;  %v10976_v21 = vsub.f32 %v2608_v33, %v2644_v32  ;;  %v8585_v18 = vpack.c.bf16 %v2739_v13, %v2732_v54  ;;  %v2746_v61 = vand.u32 4294901760, %v2745_v10 }
 0x234   : > { %8557 = vmatprep.subr.bf16.mxu1 %v12218_v58  ;;  %v12187_v63 = vand.u32 4294901760, %v10933_v56  ;;  %v10992_v33 = vsub.f32 %v2610_v25, %v2650_v48  ;;  %v2720_v2 = vsub.f32 %v10964_v39, %v12185_v14 }
 0x235   : > { %v12172_v51 = vand.u32 4294901760, %v10976_v21 }
 0x236   : > { %v2759_v37 = vsub.f32 %v10933_v56, %v12187_v63  ;;  %v12177_v59 = vand.u32 4294901760, %v10992_v33 }
 0x237   : > { %8559 = vmatpush3.bf16.msra.mxu1 %v10630_v43  ;;  %v2605_v43 = vld [vmem:[#allocation4 + $0x130] sm:$0xff]  ;;  %v2794_v13 = vsub.f32 %v10976_v21, %v12172_v51 }
 0x238   : > { %8560 = vmatprep.subr.bf16.mxu1 %v12218_v58  ;;  %v2760_v44 = vand.u32 4294901760, %v2759_v37 }
 0x239   : > { %v2795_v51 = vand.u32 4294901760, %v2794_v13 }
 0x23a   : > { %7196 = vmatmul.mubr.f32.vlgmr.msra.gmra.mrb[2].mxu1 %v10533_v57  ;;  %v2635_v57 = vand.u32 4294901760, %v2605_v43 }
 0x23b   : > { %8562 = vmatpush3.bf16.msra.mxu1 %v10881_v50  ;;  %7198 = vmatprep.mubr.msk.f32.mxu1 %vm9704_vm1, %v12236_v24 }
 0x23c   : > { %8563 = vmatprep.subr.bf16.mxu1 %v12218_v58  ;;  %v10900_v53 = vpack.c.bf16 %v2638_v22, %v2635_v57  ;;  %v10954_v52 = vsub.f32 %v2605_v43, %v2635_v57  ;;  %v2766_v43 = vsub.f32 %v10946_v49, %v12186_v42  ;;  %v12180_v57 = vand.u32 4294901760, %v10966_v19 }
 0x23d   : > { %v10989_v22 = vsub.f32 %v2609_v8, %v2647_v16  ;;  %v11009_v16 = vsub.f32 %v10913_v45, %v2653_v47 }
 0x23e   : > { %7199 = vmatmul.mubr.f32.gmra.mrb[4].mxu1 %v10558_v17  ;;  %v2641_v17 = vand.u32 4294901760, %v2607_v27  ;;  %v12184_v7 = vand.u32 4294901760, %v10954_v52  ;;  %v2767_v54 = vand.u32 4294901760, %v2766_v43  ;;  %v2780_v25 = vsub.f32 %v10966_v19, %v12180_v57 }
 0x23f   : > { %8565 = vmatpush3.bf16.msra.mxu1 %v10886_v4  ;;  %7201 = vmatprep.mubr.msk.f32.mxu1 %vm9704_vm1, %v12236_v24  ;;  %v12178_v10 = vand.u32 4294901760, %v10989_v22  ;;  %v11027_v43 = vsub.f32 %v10929_v1, %v2659_v31 }
 0x240   : > { %8566 = vmatprep.subr.bf16.mxu1 %v12218_v58  ;;  %v10974_v3 = vsub.f32 %v2607_v27, %v2641_v17  ;;  %v2773_v8 = vsub.f32 %v10954_v52, %v12184_v7  ;;  %v8591_v45 = vpack.c.bf16 %v2767_v54, %v2760_v44  ;;  %v2781_v37 = vand.u32 4294901760, %v2780_v25 }
 0x241   : > { %v12176_v44 = vand.u32 4294901760, %v11009_v16  ;;  %v12174_v25 = vand.u32 4294901760, %v11027_v43 }
 0x242   : > { %7202 = vmatmul.mubr.f32.gmra.mrb[6].mxu1 %v10592_v30  ;;  %v10910_v30 = vpack.c.bf16 %v2644_v32, %v2641_v17  ;;  %v12179_v27 = vand.u32 4294901760, %v10974_v3  ;;  %v12256_v17 = vld [vmem:[#allocation23_spill] sm:$0xff]  ;;  %v8588_v32 = vpack.c.bf16 %v2753_v11, %v2746_v61  ;;  %v2721_v61 = vand.u32 4294901760, %v2720_v2 }
 0x243   : > { %8568 = vmatpush3.bf16.msra.mxu1 %v10893_v26  ;;  %7236 = vmatprep.mubr.msk.f32.mxu1 %vm9704_vm1, %v12236_v24  ;;  %v11021_v11 = vsub.f32 %v10915_v23, %v2656_v12  ;;  %v2774_v47 = vand.u32 4294901760, %v2773_v8  ;;  %v2801_v2 = vsub.f32 %v10989_v22, %v12178_v10  ;;  %v2808_v23 = vsub.f32 %v10992_v33, %v12177_v59 }
 0x244   : > { %8569 = vmatprep.subr.bf16.mxu1 %v12218_v58  ;;  %v2787_v48 = vsub.f32 %v10974_v3, %v12179_v27  ;;  %v11036_v12 = vsub.f32 %v10931_v41, %v2662_v6  ;;  %v2815_v41 = vsub.f32 %v11009_v16, %v12176_v44 }
 0x245   : > { %v12175_v1 = vand.u32 4294901760, %v11021_v11  ;;  %v2802_v54 = vand.u32 4294901760, %v2801_v2  ;;  %v2809_v8 = vand.u32 4294901760, %v2808_v23  ;;  %v8609_v23 = vpack.c.bf16 %v10907_v28, %v10905_v34 }
 0x246   : > { %v12262_v34 = vand.u32 4294901760, %v10933_v56  ;;  %v12263_v28 = vand.u32 4294901760, %v10946_v49 }
 0x247   : > { %8571 = vmatpush3.bf16.msra.mxu1 %v10900_v53  ;;  %v2822_v6 = vsub.f32 %v11021_v11, %v12175_v1  ;;  %v8600_v13 = vpack.c.bf16 %v2809_v8, %v2802_v54  ;;  %v3408_v54 = vld [vmem:[#allocation7 + $0x80] sm:$0xff]  ;;  %v3409_v8 = vld [vmem:[#allocation7 + $0x88] sm:$0xff] }
 0x248   : > { %8572 = vmatprep.subr.bf16.mxu1 %v12218_v58 }
 0x24b   : > { %8574 = vmatpush3.bf16.msra.mxu1 %v10910_v30 }
 0x24c   : > { %8575 = vmatprep.subr.bf16.mxu1 %v12218_v58 }
 0x24f   : > { %8577 = vmatpush3.bf16.msra.mxu1 %v10924_v62 }
 0x250   : > { %8578 = vmatprep.subr.bf16.mxu1 %v12218_v58 }
 0x253   : > { %8580 = vmatpush3.bf16.msra.mxu1 %v10949_v29 }
 0x254   : > { %8581 = vmatprep.subr.bf16.mxu1 %v12218_v58 }
 0x257   : > { %8583 = vmatpush3.bf16.msra.mxu1 %v10969_v20 }
 0x258   : > { %8584 = vmatprep.subr.bf16.mxu1 %v12218_v58 }
 0x25a   : > { %7237 = vmatmul.mubr.f32.vlgmr.msra.gmra.mrb[2].mxu1 %v12256_v17  ;;  %v2788_v17 = vand.u32 4294901760, %v2787_v48  ;;  %v12173_v48 = vand.u32 4294901760, %v11036_v12 }
 0x25b   : > { %8586 = vmatpush3.bf16.msra.mxu1 %v8585_v18  ;;  %7239 = vmatprep.mubr.msk.f32.mxu1 %vm9704_vm1, %v12236_v24  ;;  %v12257_v18 = vld [vmem:[#allocation25_spill] sm:$0xff] }
 0x25c   : > { %8587 = vmatprep.subr.bf16.mxu1 %v12218_v58  ;;  %v8597_v31 = vpack.c.bf16 %v2795_v51, %v2788_v17  ;;  %v2816_v51 = vand.u32 4294901760, %v2815_v41  ;;  %v3410_v41 = vld [vmem:[#allocation7 + $0x90] sm:$0xff] }
 0x25e   : > { %7240 = vmatmul.mubr.f32.gmra.mrb[4].mxu1 %v12257_v18  ;;  %v2823_v18 = vand.u32 4294901760, %v2822_v6  ;;  %v8618_v6 = vpack.c.bf16 %v10966_v19, %v10954_v52 }
 0x25f   : > { %8589 = vmatpush3.bf16.msra.mxu1 %v8588_v32  ;;  %7242 = vmatprep.mubr.msk.f32.mxu1 %vm9704_vm1, %v12236_v24  ;;  %v8594_v32 = vpack.c.bf16 %v2781_v37, %v2774_v47 }
 0x260   : > { %8590 = vmatprep.subr.bf16.mxu1 %v12218_v58  ;;  %v8603_v47 = vpack.c.bf16 %v2823_v18, %v2816_v51  ;;  %v3438_v51 = vand.u32 4294901760, %v3409_v8  ;;  %v3411_v18 = vld [vmem:[#allocation7 + $0x98] sm:$0xff] }
 0x262   : > { %7243 = vmatmul.mubr.f32.gmra.mrb[6].mxu1 %v2721_v61  ;;  %v2829_v61 = vsub.f32 %v11027_v43, %v12174_v25 }
 0x263   : > { %8592 = vmatpush3.bf16.msra.mxu1 %v8591_v45  ;;  %7277 = vmatprep.mubr.msk.f32.mxu1 %vm9704_vm1, %v12236_v24  ;;  %v2836_v45 = vsub.f32 %v11036_v12, %v12173_v48  ;;  %v11088_v48 = vsub.f32 %v3409_v8, %v3438_v51 }
 0x264   : > { %8593 = vmatprep.subr.bf16.mxu1 %v12218_v58  ;;  %v2830_v37 = vand.u32 4294901760, %v2829_v61  ;;  %v3441_v61 = vand.u32 4294901760, %v3410_v41 }
 0x265   : > { %v2837_v17 = vand.u32 4294901760, %v2836_v45  ;;  %v3412_v45 = vld [vmem:[#allocation7 + $0xa0] sm:$0xff]  ;;  %v12181_v57 = vand.u32 4294901760, %v11088_v48 }
 0x266   : > { %v11090_v25 = vsub.f32 %v3410_v41, %v3441_v61 }
 0x267   : > { %8595 = vmatpush3.bf16.msra.mxu1 %v8594_v32  ;;  %v8606_v2 = vpack.c.bf16 %v2837_v17, %v2830_v37  ;;  %v8612_v32 = vpack.c.bf16 %v10920_v15, %v10918_v9  ;;  %v8621_v37 = vpack.c.bf16 %v10976_v21, %v10974_v3  ;;  %v3444_v17 = vand.u32 4294901760, %v3411_v18 }
 0x268   : > { %8596 = vmatprep.subr.bf16.mxu1 %v12218_v58  ;;  %v12264_v9 = vand.u32 4294901760, %v10964_v39  ;;  %v12265_v15 = vand.u32 4294901760, %v10954_v52  ;;  %v12270_v52 = vand.u32 4294901760, %v10992_v33 }
 0x269   : > { %v11092_v1 = vpack.c.bf16 %v3444_v17, %v3441_v61  ;;  %v11094_v44 = vsub.f32 %v3411_v18, %v3444_v17 }
 0x26b   : > { %8598 = vmatpush3.bf16.msra.mxu1 %v8597_v31  ;;  %v8615_v31 = vpack.c.bf16 %v10946_v49, %v10933_v56  ;;  %v12188_v8 = vand.u32 4294901760, %v11094_v44  ;;  %v12267_v56 = vand.u32 4294901760, %v10974_v3  ;;  %v12273_v3 = vand.u32 4294901760, %v11027_v43 }
 0x26c   : > { %8599 = vmatprep.subr.bf16.mxu1 %v12218_v58 }
 0x26f   : > { %8601 = vmatpush3.bf16.msra.mxu1 %v8600_v13  ;;  %v3435_v13 = vand.u32 4294901760, %v3408_v54 }
 0x270   : > { %8602 = vmatprep.subr.bf16.mxu1 %v12218_v58 }
 0x273   : > { %8604 = vmatpush3.bf16.msra.mxu1 %v8603_v47  ;;  %v3413_v47 = vld [vmem:[#allocation7 + $0xa8] sm:$0xff] }
 0x274   : > { %8605 = vmatprep.subr.bf16.mxu1 %v12218_v58 }
 0x277   : > { %8607 = vmatpush3.bf16.msra.mxu1 %v8606_v2  ;;  %v3447_v2 = vand.u32 4294901760, %v3412_v45 }
 0x278   : > { %8608 = vmatprep.subr.bf16.mxu1 %v12218_v58 }
 0x279   : > { %v11098_v10 = vsub.f32 %v3412_v45, %v3447_v2  ;;  %v8624_v45 = vpack.c.bf16 %v10992_v33, %v10989_v22 }
 0x27a   : > { %7278 = vmatmul.mubr.f32.vlgmr.msra.gmra.mrb[2].mxu1 %v9955_v55 }
 0x27b   : > { %8610 = vmatpush3.bf16.msra.mxu1 %v8609_v23  ;;  %7280 = vmatprep.mubr.msk.f32.mxu1 %vm9704_vm1, %v12236_v24  ;;  %v3450_v23 = vand.u32 4294901760, %v3413_v47  ;;  %v3566_v41 = vand.u32 4294901760, %v11098_v10 }
 0x27c   : > { %8611 = vmatprep.subr.bf16.mxu1 %v12218_v58 }
 0x27d   : > { %v11096_v59 = vpack.c.bf16 %v3450_v23, %v3447_v2  ;;  %v3567_v17 = vsub.f32 %v11098_v10, %v3566_v41 }
 0x27e   : > { %7281 = vmatmul.mubr.f32.gmra.mrb[4].mxu1 %v9968_v0 }
 0x27f   : > { %8613 = vmatpush3.bf16.msra.mxu1 %v8612_v32  ;;  %7283 = vmatprep.mubr.msk.f32.mxu1 %vm9704_vm1, %v12236_v24  ;;  %v11084_v32 = vpack.c.bf16 %v3438_v51, %v3435_v13  ;;  %v3568_v14 = vand.u32 4294901760, %v3567_v17 }
 0x280   : > { %8614 = vmatprep.subr.bf16.mxu1 %v12218_v58 }
 0x282   : > { %7284 = vmatmul.mubr.f32.gmra.mrb[6].mxu1 %v10944_v40 }
 0x283   : > { %8616 = vmatpush3.bf16.msra.mxu1 %v8615_v31  ;;  %7318 = vmatprep.mubr.msk.f32.mxu1 %vm9704_vm1, %v12236_v24  ;;  %v11086_v31 = vsub.f32 %v3408_v54, %v3435_v13  ;;  %v12182_v54 = vand.u32 4294901760, %v11090_v25  ;;  %v11103_v13 = vsub.f32 %v3413_v47, %v3450_v23  ;;  %v3560_v47 = vsub.f32 %v11094_v44, %v12188_v8 }
 0x284   : > { %8617 = vmatprep.subr.bf16.mxu1 %v12218_v58  ;;  %v8627_v8 = vpack.c.bf16 %v11021_v11, %v11009_v16 }
 0x285   : > { %v12183_v27 = vand.u32 4294901760, %v11086_v31  ;;  %v3553_v18 = vsub.f32 %v11090_v25, %v12182_v54  ;;  %v3573_v61 = vand.u32 4294901760, %v11103_v13 }
 0x287   : > { %8619 = vmatpush3.bf16.msra.mxu1 %v8618_v6  ;;  %v3539_v51 = vsub.f32 %v11086_v31, %v12183_v27  ;;  %v3546_v6 = vsub.f32 %v11088_v48, %v12181_v57  ;;  %v3554_v57 = vand.u32 4294901760, %v3553_v18  ;;  %v3574_v54 = vsub.f32 %v11103_v13, %v3573_v61 }
 0x288   : > { %8620 = vmatprep.subr.bf16.mxu1 %v12218_v58  ;;  %v3561_v27 = vand.u32 4294901760, %v3560_v47 }
 0x289   : > { %v3540_v2 = vand.u32 4294901760, %v3539_v51  ;;  %v3547_v23 = vand.u32 4294901760, %v3546_v6  ;;  %v3575_v42 = vand.u32 4294901760, %v3574_v54  ;;  %v8630_v51 = vpack.c.bf16 %v11036_v12, %v11027_v43  ;;  %v11275_v43 = vld [vmem:[#allocation7 + $0xd8] sm:$0xff] }
 0x28a   : > { %v8740_v63 = vpack.c.bf16 %v3561_v27, %v3554_v57  ;;  %v12258_v57 = vld [vmem:[#allocation20_spill] sm:$0xff]  ;;  %v12271_v54 = vand.u32 4294901760, %v11009_v16 }
 0x28b   : > { %8622 = vmatpush3.bf16.msra.mxu1 %v8621_v37  ;;  %v8736_v7 = vpack.c.bf16 %v3547_v23, %v3540_v2  ;;  %v8744_v37 = vpack.c.bf16 %v3575_v42, %v3568_v14  ;;  %v12259_v42 = vld [vmem:[#allocation22_spill] sm:$0xff]  ;;  %v12260_v14 = vld [vmem:[#allocation21_spill] sm:$0xff]  ;;  %v12261_v27 = vld [vmem:[#allocation24_spill] sm:$0xff]  ;;  %v3468_v23 = vand.u32 4294901760, %v11275_v43 }
 0x28c   : > { %8623 = vmatprep.subr.bf16.mxu1 %v12218_v58 }
 0x28d   : > { %8737 = vmatprep.subr.bf16.mxu0 %v8736_v7 }
 0x28e   : > { %8739 = vmatpush3.bf16.msra.mxu0 %v8736_v7  ;;  %v8660_v7 = vpack.c.bf16 %v2751_v60, %v2744_v38  ;;  %v12268_v60 = vand.u32 4294901760, %v10976_v21  ;;  %v12274_v21 = vand.u32 4294901760, %v11036_v12 }
 0x28f   : > { %8625 = vmatpush3.bf16.msra.mxu1 %v8624_v45  ;;  %8741 = vmatprep.subr.bf16.mxu0 %v8740_v63 }
 0x290   : > { %8626 = vmatprep.subr.bf16.mxu1 %v12218_v58  ;;  %v8669_v49 = vpack.c.bf16 %v12268_v60, %v12267_v56  ;;  %v8678_v18 = vpack.c.bf16 %v12274_v21, %v12273_v3 }
 0x292   : > { %8743 = vmatpush3.bf16.msra.mxu0 %v8740_v63  ;;  %v8657_v63 = vpack.c.bf16 %v2737_v5, %v2730_v35  ;;  %v8663_v35 = vpack.c.bf16 %v12263_v28, %v12262_v34  ;;  %v12266_v5 = vand.u32 4294901760, %v10966_v19 }
 0x293   : > { %8628 = vmatpush3.bf16.msra.mxu1 %v8627_v8  ;;  %8745 = vmatprep.subr.bf16.mxu0 %v8744_v37  ;;  %v12272_v8 = vand.u32 4294901760, %v11021_v11  ;;  %v11273_v11 = vld [vmem:[#allocation7 + $0xd0] sm:$0xff] }
 0x294   : > { %8629 = vmatprep.subr.bf16.mxu1 %v12218_v58  ;;  %v8666_v38 = vpack.c.bf16 %v12266_v5, %v12265_v15  ;;  %v3465_v2 = vand.u32 4294901760, %v11273_v11 }
 0x295   : > { %v8675_v6 = vpack.c.bf16 %v12272_v8, %v12271_v54 }
 0x296   : > { %8747 = vmatpush3.bf16.msra.mxu0 %v8744_v37 }
 0x297   : > { %8631 = vmatpush3.bf16.msra.mxu1 %v8630_v51 }
 0x298   : > { %8632 = vmatprep.subr.bf16.mxu1 %v12218_v58 }
 0x29a   : > { %7319 = vmatmul.mubr.f32.vlgmr.msra.gmra.mrb[2].mxu1 %v12258_v57 }
 0x29b   : > { %8634 = vmatpush3.bf16.msra.mxu1 %v10881_v50  ;;  %7321 = vmatprep.mubr.msk.f32.mxu1 %vm9704_vm1, %v12236_v24 }
 0x29c   : > { %8635 = vmatprep.subr.bf16.mxu1 %v12218_v58 }
 0x29e   : > { %7322 = vmatmul.mubr.f32.gmra.mrb[4].mxu1 %v12259_v42  ;;  %v11288_v42 = vsub.f32 %v11273_v11, %v3465_v2 }
 0x29f   : > { %8637 = vmatpush3.bf16.msra.mxu1 %v10886_v4  ;;  %7324 = vmatprep.mubr.msk.f32.mxu1 %vm9704_vm1, %v12236_v24 }
 0x2a0   : > { %8638 = vmatprep.subr.bf16.mxu1 %v12218_v58 }
 0x2a2   : > { %7325 = vmatmul.mubr.f32.gmra.mrb[6].mxu1 %v10964_v39  ;;  %v12269_v39 = vand.u32 4294901760, %v10989_v22 }
 0x2a3   : > { %8640 = vmatpush3.bf16.msra.mxu1 %v10893_v26  ;;  %7359 = vmatprep.mubr.msk.f32.mxu1 %vm9704_vm1, %v12236_v24 }
 0x2a4   : > { %8641 = vmatprep.subr.bf16.mxu1 %v12218_v58  ;;  %v8672_v19 = vpack.c.bf16 %v12270_v52, %v12269_v39  ;;  %v3422_v39 = vld [vmem:[#allocation7 + $0xf0] sm:$0xff]  ;;  %v3423_v52 = vld [vmem:[#allocation7 + $0xf8] sm:$0xff] }
 0x2a5   : > { %v3477_v54 = vand.u32 4294901760, %v3422_v39  ;;  %v3480_v8 = vand.u32 4294901760, %v3423_v52 }
 0x2a7   : > { %8643 = vmatpush3.bf16.msra.mxu1 %v10900_v53 }
 0x2a8   : > { %8644 = vmatprep.subr.bf16.mxu1 %v12218_v58 }
 0x2ab   : > { %8646 = vmatpush3.bf16.msra.mxu1 %v10910_v30 }
 0x2ac   : > { %8647 = vmatprep.subr.bf16.mxu1 %v12218_v58 }
 0x2af   : > { %8649 = vmatpush3.bf16.msra.mxu1 %v10924_v62 }
 0x2b0   : > { %8650 = vmatprep.subr.bf16.mxu1 %v12218_v58 }
 0x2b3   : > { %8652 = vmatpush3.bf16.msra.mxu1 %v10949_v29 }
 0x2b4   : > { %8653 = vmatprep.subr.bf16.mxu1 %v12218_v58 }
 0x2b7   : > { %8655 = vmatpush3.bf16.msra.mxu1 %v10969_v20 }
 0x2b8   : > { %8656 = vmatprep.subr.bf16.mxu1 %v12218_v58 }
 0x2ba   : > { %7360 = vmatmul.mubr.f32.vlgmr.msra.gmra.mrb[2].mxu1 %v12260_v14  ;;  %v3420_v14 = vld [vmem:[#allocation7 + $0xe0] sm:$0xff] }
 0x2bb   : > { %8658 = vmatpush3.bf16.msra.mxu1 %v8657_v63  ;;  %7362 = vmatprep.mubr.msk.f32.mxu1 %vm9704_vm1, %v12236_v24  ;;  %v11291_v63 = vsub.f32 %v11275_v43, %v3468_v23  ;;  %v3471_v28 = vand.u32 4294901760, %v3420_v14 }
 0x2bc   : > { %8659 = vmatprep.subr.bf16.mxu1 %v12218_v58 }
 0x2be   : > { %7363 = vmatmul.mubr.f32.gmra.mrb[4].mxu1 %v12261_v27 }
 0x2bf   : > { %8661 = vmatpush3.bf16.msra.mxu1 %v8660_v7  ;;  %7365 = vmatprep.mubr.msk.f32.mxu1 %vm9704_vm1, %v12236_v24  ;;  %v3421_v7 = vld [vmem:[#allocation7 + $0xe8] sm:$0xff] }
 0x2c0   : > { %8662 = vmatprep.subr.bf16.mxu1 %v12218_v58  ;;  %v3474_v15 = vand.u32 4294901760, %v3421_v7 }
 0x2c2   : > { %7366 = vmatmul.mubr.f32.gmra.mrb[6].mxu1 %v12264_v9  ;;  %v3615_v9 = vand.u32 4294901760, %v11291_v63 }
 0x2c3   : > { %8664 = vmatpush3.bf16.msra.mxu1 %v8663_v35  ;;  %7400 = vmatprep.mubr.msk.f32.mxu1 %vm9704_vm1, %v12236_v24  ;;  %v3608_v35 = vand.u32 4294901760, %v11288_v42 }
 0x2c4   : > { %8665 = vmatprep.subr.bf16.mxu1 %v12218_v58  ;;  %v3616_v60 = vsub.f32 %v11291_v63, %v3615_v9 }
 0x2c5   : > { %v3609_v56 = vsub.f32 %v11288_v42, %v3608_v35 }
 0x2c6   : > { %v3617_v3 = vand.u32 4294901760, %v3616_v60  ;;  %v5716_v60 = vld [vmem:[%s12120_s4] ss:$0 sm:$0xff] }
 0x2c7   : > { %8667 = vmatpush3.bf16.msra.mxu1 %v8666_v38  ;;  %v11295_v38 = vsub.f32 %v3420_v14, %v3471_v28 }
 0x2c8   : > { %8668 = vmatprep.subr.bf16.mxu1 %v12218_v58 }
 0x2cb   : > { %8670 = vmatpush3.bf16.msra.mxu1 %v8669_v49  ;;  %v11303_v49 = vsub.f32 %v3421_v7, %v3474_v15  ;;  %v11333_v7 = vpack.c.bf16 %v3468_v23, %v3465_v2 }
 0x2cc   : > { %8671 = vmatprep.subr.bf16.mxu1 %v12218_v58 }
 0x2cd   : > { %v3629_v21 = vand.u32 4294901760, %v11303_v49 }
 0x2cf   : > { %8673 = vmatpush3.bf16.msra.mxu1 %v8672_v19  ;;  %v3622_v19 = vand.u32 4294901760, %v11295_v38 }
 0x2d0   : > { %8674 = vmatprep.subr.bf16.mxu1 %v12218_v58 }
 0x2d3   : > { %8676 = vmatpush3.bf16.msra.mxu1 %v8675_v6  ;;  %v3610_v6 = vand.u32 4294901760, %v3609_v56 }
 0x2d4   : > { %8677 = vmatprep.subr.bf16.mxu1 %v12218_v58 }
 0x2d7   : > { %8679 = vmatpush3.bf16.msra.mxu1 %v8678_v18  ;;  %v3623_v18 = vsub.f32 %v11295_v38, %v3622_v19 }
 0x2d8   : > { %8680 = vmatprep.subr.bf16.mxu1 %v12218_v58 }
 0x2da   : > { %7401 = vmatmul.mubr.f32.vlgmr.msra.gmra.mrb[2].mxu1 %v9955_v55 }
 0x2db   : > { %8682 = vmatpush3.bf16.msra.mxu1 %v10881_v50  ;;  %7403 = vmatprep.mubr.msk.f32.mxu1 %vm9704_vm1, %v12236_v24 }
 0x2dc   : > { %8683 = vmatprep.subr.bf16.mxu1 %v12218_v58 }
 0x2de   : > { %7404 = vmatmul.mubr.f32.gmra.mrb[4].mxu1 %v9968_v0 }
 0x2df   : > { %8685 = vmatpush3.bf16.msra.mxu1 %v10886_v4  ;;  %7406 = vmatprep.mubr.msk.f32.mxu1 %vm9704_vm1, %v12236_v24 }
 0x2e0   : > { %8686 = vmatprep.subr.bf16.mxu1 %v12218_v58 }
 0x2e2   : > { %7407 = vmatmul.mubr.f32.gmra.mrb[6].mxu1 %v10944_v40 }
 0x2e3   : > { %8688 = vmatpush3.bf16.msra.mxu1 %v10893_v26  ;;  %7441 = vmatprep.mubr.msk.f32.mxu1 %vm9704_vm1, %v12236_v24 }
 0x2e4   : > { %8689 = vmatprep.subr.bf16.mxu1 %v12218_v58 }
 0x2e7   : > { %8691 = vmatpush3.bf16.msra.mxu1 %v10900_v53 }
 0x2e8   : > { %8692 = vmatprep.subr.bf16.mxu1 %v12218_v58 }
 0x2eb   : > { %8694 = vmatpush3.bf16.msra.mxu1 %v10910_v30  ;;  %v11255_v30 = vld [vmem:[#allocation7 + $0xc8] sm:$0xff] }
 0x2ec   : > { %8695 = vmatprep.subr.bf16.mxu1 %v12218_v58 }
 0x2ef   : > { %8697 = vmatpush3.bf16.msra.mxu1 %v10924_v62 }
 0x2f0   : > { %8698 = vmatprep.subr.bf16.mxu1 %v12218_v58 }
 0x2f3   : > { %8700 = vmatpush3.bf16.msra.mxu1 %v10949_v29  ;;  %v3462_v29 = vand.u32 4294901760, %v11255_v30 }
 0x2f4   : > { %8701 = vmatprep.subr.bf16.mxu1 %v12218_v58  ;;  %v3415_v58 = vld [vmem:[#allocation7 + $0xb8] sm:$0xff] }
 0x2f5   : > { %v3456_v4 = vand.u32 4294901760, %v3415_v58  ;;  %v11271_v16 = vsub.f32 %v11255_v30, %v3462_v29  ;;  %v8756_v30 = vpack.c.bf16 %v3617_v3, %v3610_v6 }
 0x2f7   : > { %8703 = vmatpush3.bf16.msra.mxu1 %v10969_v20  ;;  %v11251_v53 = vsub.f32 %v3415_v58, %v3456_v4  ;;  %v3601_v17 = vand.u32 4294901760, %v11271_v16  ;;  %v11312_v58 = vsub.f32 %v3423_v52, %v3480_v8 }
 0x2f8   : > { %8705 = vmatprep.subr.bf16.mxu1 %v11084_v32 }
 0x2f9   : > { %v3587_v62 = vand.u32 4294901760, %v11251_v53  ;;  %v3602_v57 = vsub.f32 %v11271_v16, %v3601_v17  ;;  %v12189_v43 = vand.u32 4294901760, %v11312_v58 }
 0x2fa   : > { %7442 = vmatmul.mubr.f32.vlgmr.msra.gmra.mrb[2].mxu1 %v9955_v55  ;;  %v3414_v55 = vld [vmem:[#allocation7 + $0xb0] sm:$0xff] }
 0x2fb   : > { %7444 = vmatprep.mubr.msk.f32.mxu1 %vm9704_vm1, %v12236_v24  ;;  %8707 = vmatpush3.bf16.msra.mxu1 %v11084_v32  ;;  %v3453_v50 = vand.u32 4294901760, %v3414_v55  ;;  %v3588_v22 = vsub.f32 %v11251_v53, %v3587_v62  ;;  %v3603_v34 = vand.u32 4294901760, %v3602_v57 }
 0x2fc   : > { %8709 = vmatprep.subr.bf16.mxu1 %v11092_v1 }
 0x2fd   : > { %v11249_v26 = vsub.f32 %v3414_v55, %v3453_v50  ;;  %v3589_v45 = vand.u32 4294901760, %v3588_v22  ;;  %v11310_v55 = vsub.f32 %v3422_v39, %v3477_v54  ;;  %v3624_v22 = vand.u32 4294901760, %v3623_v18  ;;  %v5717_v39 = vld [vmem:[%s12120_s4 + $0x1] ss:$0 sm:$0xff] }
 0x2fe   : > { %7445 = vmatmul.mubr.f32.gmra.mrb[4].mxu1 %v9968_v0  ;;  %v11253_v0 = vld [vmem:[#allocation7 + $0xc0] sm:$0xff] }
 0x2ff   : > { %7447 = vmatprep.mubr.msk.f32.mxu1 %vm9704_vm1, %v12236_v24  ;;  %8711 = vmatpush3.bf16.msra.mxu1 %v11092_v1  ;;  %v3580_v24 = vand.u32 4294901760, %v11249_v26  ;;  %v3636_v11 = vand.u32 4294901760, %v11310_v55  ;;  %v11349_v2 = vpack.c.bf16 %v11251_v53, %v11249_v26 }
 0x300   : > { %8713 = vmatprep.subr.bf16.mxu1 %v11096_v59 }
 0x301   : > { %v3581_v20 = vsub.f32 %v11249_v26, %v3580_v24  ;;  %v3392_v26 = vld [vmem:[#allocation7 + $0x8] sm:$0xff] }
 0x302   : > { %7448 = vmatmul.mubr.f32.gmra.mrb[6].mxu1 %v10944_v40  ;;  %v3459_v40 = vand.u32 4294901760, %v11253_v0  ;;  %v4122_v53 = vand.u32 4294901760, %v3392_v26 }
 0x303   : > { %8715 = vmatpush3.bf16.msra.mxu1 %v11096_v59  ;;  %v3582_v12 = vand.u32 4294901760, %v3581_v20  ;;  %v3630_v20 = vsub.f32 %v11303_v49, %v3629_v21 }
 0x304   : > { %v11268_v33 = vsub.f32 %v11253_v0, %v3459_v40  ;;  %v11314_v0 = vpack.c.bf16 %v3456_v4, %v3453_v50  ;;  %v3637_v50 = vsub.f32 %v11310_v55, %v3636_v11  ;;  %v3644_v4 = vsub.f32 %v11312_v58, %v12189_v43 }
 0x305   : > { %v8748_v37 = vpack.c.bf16 %v3589_v45, %v3582_v12  ;;  %v3631_v12 = vand.u32 4294901760, %v3630_v20  ;;  %v11329_v45 = vpack.c.bf16 %v3462_v29, %v3459_v40  ;;  %v8768_v40 = vpack.c.bf16 %v11088_v48, %v11086_v31 }
 0x306   : > { %v3594_v47 = vand.u32 4294901760, %v11268_v33  ;;  %8717 = vmatprep.subr.bf16.mxu1 %v11314_v0  ;;  %v3645_v57 = vand.u32 4294901760, %v3644_v4  ;;  %v11339_v29 = vpack.c.bf16 %v3474_v15, %v3471_v28  ;;  %v11353_v23 = vpack.c.bf16 %v11271_v16, %v11268_v33 }
 0x307   : > { %8749 = vmatprep.subr.bf16.mxu0 %v8748_v37  ;;  %8719 = vmatpush3.bf16.msra.mxu1 %v11314_v0  ;;  %v11361_v28 = vpack.c.bf16 %v11303_v49, %v11295_v38  ;;  %v11365_v15 = vpack.c.bf16 %v11312_v58, %v11310_v55  ;;  %v3398_v55 = vld [vmem:[#allocation7 + $0x38] sm:$0xff] }
 0x308   : > { %v3595_v51 = vsub.f32 %v11268_v33, %v3594_v47  ;;  %8751 = vmatpush3.bf16.msra.mxu0 %v8748_v37  ;;  %v8760_v37 = vpack.c.bf16 %v3631_v12, %v3624_v22  ;;  %8721 = vmatprep.subr.bf16.mxu1 %v11329_v45  ;;  %v3394_v33 = vld [vmem:[#allocation7 + $0x18] sm:$0xff] }
 0x30a   : > { %v3596_v27 = vand.u32 4294901760, %v3595_v51  ;;  %v3638_v51 = vand.u32 4294901760, %v3637_v50 }
 0x30b   : > { %8723 = vmatpush3.bf16.msra.mxu1 %v11329_v45 }
 0x30c   : > { %v8752_v5 = vpack.c.bf16 %v3603_v34, %v3596_v27  ;;  %v8764_v14 = vpack.c.bf16 %v3645_v57, %v3638_v51  ;;  %8725 = vmatprep.subr.bf16.mxu1 %v11333_v7  ;;  %v11341_v27 = vpack.c.bf16 %v3480_v8, %v3477_v54  ;;  %v11357_v34 = vpack.c.bf16 %v11291_v63, %v11288_v42  ;;  %v3395_v63 = vld [vmem:[#allocation7 + $0x20] sm:$0xff] }
 0x30d   : > { %v4131_v38 = vand.u32 4294901760, %v3395_v63 }
 0x30e   : > { %8753 = vmatprep.subr.bf16.mxu0 %v8752_v5 }
 0x30f   : > { %8755 = vmatpush3.bf16.msra.mxu0 %v8752_v5  ;;  %8727 = vmatpush3.bf16.msra.mxu1 %v11333_v7  ;;  %v3365_v5 = vlaneseq }
 0x310   : > { %8757 = vmatprep.subr.bf16.mxu0 %v8756_v30  ;;  %8729 = vmatprep.subr.bf16.mxu1 %v11339_v29 }
 0x311   : > { %v3366_v56 = vshrl.u32 %v3365_v5, 7 }
 0x313   : > { %8759 = vmatpush3.bf16.msra.mxu0 %v8756_v30  ;;  %8731 = vmatpush3.bf16.msra.mxu1 %v11339_v29  ;;  %v3370_v54 = vadd.s32 4294967295, %v3366_v56  ;;  %v3368_v30 = vadd.s32 16, %v3366_v56 }
 0x314   : > { %8761 = vmatprep.subr.bf16.mxu0 %v8760_v37  ;;  %8733 = vmatprep.subr.bf16.mxu1 %v11341_v27 }
 0x315   : > { %vm3373_vm3 = vcmp.ge.s32.totalorder %v3370_v54, 0  ;;  %v3372_v51 = vadd.s32 4294967295, %v3368_v30 }
 0x317   : > { %8763 = vmatpush3.bf16.msra.mxu0 %v8760_v37  ;;  %8735 = vmatpush3.bf16.msra.mxu1 %v11341_v27  ;;  %vm3378_vm4 = vcmp.lt.s32.totalorder %v3372_v51, 16 }
 0x318   : > { %8765 = vmatprep.subr.bf16.mxu0 %v8764_v14 }
 0x31b   : > { %8767 = vmatpush3.bf16.msra.mxu0 %v8764_v14 }
 0x31c   : > { %8769 = vmatprep.subr.bf16.mxu0 %v8768_v40 }
 0x3cd   : > { %v3327_v52 = vpop.f32.mrb[2].mxu1 }
 0x3ce   : > { %v3350_v8 = vmul.f32 %v5716_v60, %v3327_v52  ;;  %v7443_v6 = vpop.f32.mrb[3].mxu1 }
 0x3d0   : > { %v3357_v3 = vadd.f32 %v5717_v39, %v3350_v8 }
 0x3d1   : > { %v3333_v18 = vpop.f32.mrb[4].mxu1 }
 0x3d2   : > { %v3360_v20 = vmax.f32 %v3357_v3, 0.0  ;;  %v3351_v22 = vmul.f32 %v5716_v60, %v3333_v18  ;;  %v7446_v12 = vpop.f32.mrb[5].mxu1 }
 0x3d4   : > { %v11373_v50 = vsel %vm3373_vm3, %v3360_v20, 0.0  ;;  %v3358_v4 = vadd.f32 %v5717_v39, %v3351_v22 }
 0x3d5   : > { %v3339_v37 = vpop.f32.mrb[6].mxu1  ;;  %v3427_v43 = vrot.slane %v11373_v50, 1  ;;  %v4819_v52 = vrot.slane %v11373_v50, 2 }
 0x3d6   : > { %v11375_v57 = vmax.f32 %v3358_v4, 0.0  ;;  %v3352_v14 = vmul.f32 %v5716_v60, %v3339_v37  ;;  %v7449_v5 = vpop.f32.mrb[7].mxu1 }
 0x3d8   : > { %v3428_v54 = vrot.slane %v11375_v57, 1  ;;  %v4820_v56 = vrot.slane %v11375_v57, 2  ;;  %v3359_v8 = vadd.f32 %v5717_v39, %v3352_v14 }
 0x3da   : > { %v3362_v6 = vmax.f32 %v3359_v8, 0.0  ;;  %v3429_v3 = vsel %vm1135_vm2, %v3427_v43, %v3428_v54  ;;  %v11383_v18 = vsel %vm410_vm0, %v4819_v52, %v4820_v56  ;;  %v8772_v43 = vpack.c.bf16 %v11094_v44, %v11090_v25 }
 0x3db   : > { %v11385_v30 = vand.u32 4294901760, %v3429_v3 }
 0x3dc   : > { %v3390_v60 = vsel %vm3378_vm4, %v3362_v6, 0.0 }
 0x3dd   : > { %v3430_v20 = vrot.slane %v3390_v60, 1  ;;  %v4822_v22 = vrot.slane %v3390_v60, 2  ;;  %7517 = vmatprep.mubr.f32.mxu0 %v11385_v30  ;;  %v3516_v12 = vsub.f32 %v3429_v3, %v11385_v30  ;;  %v11503_v3 = vld [vmem:[#allocation7 + $0x50] sm:$0xff]  ;;  %v11508_v60 = vld [vmem:[#allocation7 + $0x60] sm:$0xff] }
 0x3df   : > { %v11390_v4 = vsel %vm410_vm0, %v4820_v56, %v4822_v22  ;;  %v3431_v39 = vsel %vm1135_vm2, %v3428_v54, %v3430_v20  ;;  %v3517_v37 = vand.u32 4294901760, %v3516_v12  ;;  %v8776_v56 = vpack.c.bf16 %v11103_v13, %v11098_v10  ;;  %v11510_v20 = vld [vmem:[#allocation7 + $0x68] sm:$0xff] }
 0x3e0   : > { %v11393_v51 = vand.u32 4294901760, %v3431_v39  ;;  %v8852_v10 = vpack.c.bf16 %v3615_v9, %v3608_v35  ;;  %v12279_v13 = vand.u32 4294901760, %v11312_v58  ;;  %v3396_v35 = vld [vmem:[#allocation7 + $0x28] sm:$0xff] }
 0x3e1   : > { %v3518_v14 = vsub.f32 %v3516_v12, %v3517_v37  ;;  %v4134_v49 = vand.u32 4294901760, %v3396_v35 }
 0x3e2   : > { %v3526_v5 = vsub.f32 %v3431_v39, %v11393_v51  ;;  %7518 = vmatmul.mubr.f32.vlgmr.msra.gmra.mrb[2].mxu0 %v11393_v51 }
 0x3e3   : > { %8771 = vmatpush3.bf16.msra.mxu0 %v8768_v40  ;;  %7552 = vmatprep.mubr.f32.mxu0 %v3516_v12  ;;  %v3519_v52 = vand.u32 4294901760, %v3518_v14  ;;  %v12275_v40 = vand.u32 4294901760, %v11086_v31  ;;  %v8840_v31 = vpack.c.bf16 %v3573_v61, %v3566_v41  ;;  %v8860_v41 = vpack.c.bf16 %v12279_v13, %v3636_v11 }
 0x3e4   : > { %v3527_v8 = vand.u32 4294901760, %v3526_v5  ;;  %8773 = vmatprep.subr.bf16.mxu0 %v8772_v43  ;;  %v11472_v61 = vand.u32 4294901760, %v11373_v50  ;;  %v11497_v58 = vpack.c.bf16 %v4134_v49, %v4131_v38  ;;  %v4140_v11 = vand.u32 4294901760, %v3398_v55 }
 0x3e5   : > { %7482 = vmatprep.mubr.f32.mxu1 %v3519_v52  ;;  %v11514_v12 = vsub.f32 %v3392_v26, %v4122_v53  ;;  %v4155_v14 = vand.u32 4294901760, %v11508_v60 }
 0x3e6   : > { %v3528_v54 = vsub.f32 %v3526_v5, %v3527_v8 }
 0x3e7   : > { %8775 = vmatpush3.bf16.msra.mxu0 %v8772_v43  ;;  %v11522_v43 = vand.u32 4294901760, %v11375_v57 }
 0x3e8   : > { %8777 = vmatprep.subr.bf16.mxu0 %v8776_v56  ;;  %v3529_v6 = vand.u32 4294901760, %v3528_v54  ;;  %v11532_v54 = vld [vmem:[#allocation7 + $0x70] sm:$0xff] }
 0x3ea   : > { %7483 = vmatmul.mubr.f32.vlgmr.msra.gmra.mrb[8].mxu1 %v3529_v6  ;;  %v11534_v6 = vld [vmem:[#allocation7 + $0x78] sm:$0xff] }
 0x3eb   : > { %8779 = vmatpush3.bf16.msra.mxu0 %v8776_v56 }
 0x3ec   : > { %8781 = vmatprep.subr.bf16.mxu0 %v11349_v2 }
 0x3ef   : > { %8783 = vmatpush3.bf16.msra.mxu0 %v11349_v2  ;;  %v12276_v2 = vand.u32 4294901760, %v11088_v48  ;;  %v8856_v48 = vpack.c.bf16 %v3629_v21, %v3622_v19  ;;  %v3397_v21 = vld [vmem:[#allocation7 + $0x30] sm:$0xff] }
 0x3f0   : > { %8785 = vmatprep.subr.bf16.mxu0 %v11353_v23 }
 0x3f3   : > { %8787 = vmatpush3.bf16.msra.mxu0 %v11353_v23  ;;  %v8832_v23 = vpack.c.bf16 %v12276_v2, %v12275_v40 }
 0x3f4   : > { %8789 = vmatprep.subr.bf16.mxu0 %v11357_v34 }
 0x3f7   : > { %8791 = vmatpush3.bf16.msra.mxu0 %v11357_v34  ;;  %v12277_v34 = vand.u32 4294901760, %v11090_v25  ;;  %v8844_v25 = vpack.c.bf16 %v3587_v62, %v3580_v24  ;;  %v3393_v62 = vld [vmem:[#allocation7 + $0x10] sm:$0xff] }
 0x3f8   : > { %8793 = vmatprep.subr.bf16.mxu0 %v11361_v28 }
 0x3fb   : > { %8795 = vmatpush3.bf16.msra.mxu0 %v11361_v28  ;;  %v12278_v28 = vand.u32 4294901760, %v11094_v44  ;;  %v8848_v44 = vpack.c.bf16 %v3601_v17, %v3594_v47  ;;  %v4125_v47 = vand.u32 4294901760, %v3393_v62  ;;  %v4128_v17 = vand.u32 4294901760, %v3394_v33 }
 0x3fc   : > { %8797 = vmatprep.subr.bf16.mxu0 %v11365_v15 }
 0x3fd   : > { %v11492_v9 = vpack.c.bf16 %v4128_v17, %v4125_v47  ;;  %v11536_v40 = vsub.f32 %v3393_v62, %v4125_v47  ;;  %v11538_v2 = vsub.f32 %v3394_v33, %v4128_v17 }
 0x3ff   : > { %8799 = vmatpush3.bf16.msra.mxu0 %v11365_v15  ;;  %v8836_v15 = vpack.c.bf16 %v12278_v28, %v12277_v34  ;;  %v4161_v28 = vand.u32 4294901760, %v11532_v54 }
 0x400   : > { %8801 = vmatprep.subr.bf16.mxu0 %v11084_v32 }
 0x402   : > { %7553 = vmatmul.mubr.f32.vlgmr.msra.gmra.mrb[2].mxu0 %v3526_v5  ;;  %v4158_v5 = vand.u32 4294901760, %v11510_v20 }
 0x403   : > { %8803 = vmatpush3.bf16.msra.mxu0 %v11084_v32  ;;  %7587 = vmatprep.mubr.f32.mxu0 %v3517_v37  ;;  %v4149_v37 = vand.u32 4294901760, %v11503_v3 }
 0x404   : > { %8805 = vmatprep.subr.bf16.mxu0 %v11092_v1  ;;  %v11548_v34 = vpack.c.bf16 %v4158_v5, %v4155_v14 }
 0x407   : > { %8807 = vmatpush3.bf16.msra.mxu0 %v11092_v1 }
 0x408   : > { %8809 = vmatprep.subr.bf16.mxu0 %v11096_v59 }
 0x40b   : > { %8811 = vmatpush3.bf16.msra.mxu0 %v11096_v59 }
 0x40c   : > { %8813 = vmatprep.subr.bf16.mxu0 %v11314_v0 }
 0x40f   : > { %8815 = vmatpush3.bf16.msra.mxu0 %v11314_v0 }
 0x410   : > { %8817 = vmatprep.subr.bf16.mxu0 %v11329_v45 }
 0x413   : > { %8819 = vmatpush3.bf16.msra.mxu0 %v11329_v45 }
 0x414   : > { %8821 = vmatprep.subr.bf16.mxu0 %v11333_v7 }
 0x417   : > { %8823 = vmatpush3.bf16.msra.mxu0 %v11333_v7 }
 0x418   : > { %8825 = vmatprep.subr.bf16.mxu0 %v11339_v29 }
 0x41b   : > { %8827 = vmatpush3.bf16.msra.mxu0 %v11339_v29 }
 0x41c   : > { %8829 = vmatprep.subr.bf16.mxu0 %v11341_v27 }
 0x41f   : > { %8831 = vmatpush3.bf16.msra.mxu0 %v11341_v27 }
 0x420   : > { %8833 = vmatprep.subr.bf16.mxu0 %v8832_v23 }
 0x422   : > { %7588 = vmatmul.mubr.f32.vlgmr.msra.gmra.mrb[2].mxu0 %v3527_v8  ;;  %v4229_v8 = vand.u32 4294901760, %v11514_v12 }
 0x423   : > { %8835 = vmatpush3.bf16.msra.mxu0 %v8832_v23  ;;  %7622 = vmatprep.mubr.f32.mxu0 %v11385_v30  ;;  %v11542_v23 = vsub.f32 %v11375_v57, %v11522_v43 }
 0x424   : > { %8837 = vmatprep.subr.bf16.mxu0 %v8836_v15  ;;  %v4230_v57 = vsub.f32 %v11514_v12, %v4229_v8 }
 0x425   : > { %v4211_v26 = vand.u32 4294901760, %v11542_v23 }
 0x427   : > { %8839 = vmatpush3.bf16.msra.mxu0 %v8836_v15  ;;  %v4164_v15 = vand.u32 4294901760, %v11534_v6 }
 0x428   : > { %8841 = vmatprep.subr.bf16.mxu0 %v8840_v31 }
 0x42b   : > { %8843 = vmatpush3.bf16.msra.mxu0 %v8840_v31 }
 0x42c   : > { %8845 = vmatprep.subr.bf16.mxu0 %v8844_v25 }
 0x42f   : > { %8847 = vmatpush3.bf16.msra.mxu0 %v8844_v25  ;;  %v4236_v25 = vand.u32 4294901760, %v11536_v40 }
 0x430   : > { %8849 = vmatprep.subr.bf16.mxu0 %v8848_v44 }
 0x431   : > { %v4237_v62 = vsub.f32 %v11536_v40, %v4236_v25 }
 0x433   : > { %8851 = vmatpush3.bf16.msra.mxu0 %v8848_v44  ;;  %v4243_v44 = vand.u32 4294901760, %v11538_v2 }
 0x434   : > { %8853 = vmatprep.subr.bf16.mxu0 %v8852_v10 }
 0x435   : > { %v4244_v33 = vsub.f32 %v11538_v2, %v4243_v44 }
 0x437   : > { %8855 = vmatpush3.bf16.msra.mxu0 %v8852_v10  ;;  %v11562_v10 = vsub.f32 %v3395_v63, %v4131_v38 }
 0x438   : > { %8857 = vmatprep.subr.bf16.mxu0 %v8856_v48 }
 0x439   : > { %v4250_v47 = vand.u32 4294901760, %v11562_v10 }
 0x43b   : > { %8859 = vmatpush3.bf16.msra.mxu0 %v8856_v48  ;;  %v11564_v48 = vsub.f32 %v3396_v35, %v4134_v49  ;;  %v4212_v35 = vsub.f32 %v11542_v23, %v4211_v26 }
 0x43c   : > { %8861 = vmatprep.subr.bf16.mxu0 %v8860_v41 }
 0x43d   : > { %v12192_v17 = vand.u32 4294901760, %v11564_v48 }
 0x43f   : > { %8863 = vmatpush3.bf16.msra.mxu0 %v8860_v41  ;;  %v11568_v41 = vsub.f32 %v3398_v55, %v4140_v11  ;;  %v4245_v55 = vand.u32 4294901760, %v4244_v33 }
 0x440   : > { %8865 = vmatprep.subr.bf16.mxu0 %v11084_v32 }
 0x441   : > { %v12191_v63 = vand.u32 4294901760, %v11568_v41 }
 0x442   : > { %7623 = vmatmul.mubr.f32.vlgmr.msra.gmra.mrb[2].mxu0 %v11393_v51 }
 0x443   : > { %8867 = vmatpush3.bf16.msra.mxu0 %v11084_v32  ;;  %7657 = vmatprep.mubr.f32.mxu0 %v11385_v30  ;;  %v3391_v32 = vld [vmem:[#allocation7] sm:$0xff]  ;;  %v11505_v30 = vld [vmem:[#allocation7 + $0x58] sm:$0xff] }
 0x444   : > { %8869 = vmatprep.subr.bf16.mxu0 %v11092_v1 }
 0x447   : > { %8871 = vmatpush3.bf16.msra.mxu0 %v11092_v1  ;;  %v11478_v1 = vsub.f32 %v11373_v50, %v11472_v61 }
 0x448   : > { %8873 = vmatprep.subr.bf16.mxu0 %v11096_v59 }
 0x449   : > { %v4201_v24 = vand.u32 4294901760, %v11478_v1 }
 0x44b   : > { %8875 = vmatpush3.bf16.msra.mxu0 %v11096_v59  ;;  %v4119_v59 = vand.u32 4294901760, %v3391_v32  ;;  %v4202_v42 = vsub.f32 %v11478_v1, %v4201_v24 }
 0x44c   : > { %8877 = vmatprep.subr.bf16.mxu0 %v11314_v0 }
 0x44d   : > { %v11485_v16 = vpack.c.bf16 %v4122_v53, %v4119_v59  ;;  %v4203_v19 = vand.u32 4294901760, %v4202_v42  ;;  %v11512_v22 = vsub.f32 %v3391_v32, %v4119_v59  ;;  %v11575_v32 = vpack.c.bf16 %v4164_v15, %v4161_v28 }
 0x44e   : > { %v4231_v53 = vand.u32 4294901760, %v4230_v57 }
 0x44f   : > { %8879 = vmatpush3.bf16.msra.mxu0 %v11314_v0  ;;  %v4137_v0 = vand.u32 4294901760, %v3397_v21  ;;  %v4222_v52 = vand.u32 4294901760, %v11512_v22 }
 0x450   : > { %8881 = vmatprep.subr.bf16.mxu0 %v11329_v45 }
 0x451   : > { %v4223_v31 = vsub.f32 %v11512_v22, %v4222_v52  ;;  %v11566_v13 = vsub.f32 %v3397_v21, %v4137_v0  ;;  %v4238_v21 = vand.u32 4294901760, %v4237_v62 }
 0x453   : > { %8883 = vmatpush3.bf16.msra.mxu0 %v11329_v45  ;;  %v3399_v45 = vld [vmem:[#allocation7 + $0x40] sm:$0xff]  ;;  %v4224_v59 = vand.u32 4294901760, %v4223_v31  ;;  %v12190_v42 = vand.u32 4294901760, %v11566_v13 }
 0x454   : > { %8885 = vmatprep.subr.bf16.mxu0 %v11333_v7 }
 0x455   : > { %v8928_v38 = vpack.c.bf16 %v4231_v53, %v4224_v59  ;;  %v4265_v31 = vsub.f32 %v11566_v13, %v12190_v42  ;;  %v4213_v59 = vand.u32 4294901760, %v4212_v35  ;;  %v8932_v53 = vpack.c.bf16 %v4245_v55, %v4238_v21 }
 0x456   : > { %v11631_v35 = vsub.f32 %v11508_v60, %v4155_v14 }
 0x457   : > { %8887 = vmatpush3.bf16.msra.mxu0 %v11333_v7  ;;  %v3400_v7 = vld [vmem:[#allocation7 + $0x48] sm:$0xff]  ;;  %v4266_v42 = vand.u32 4294901760, %v4265_v31 }
 0x458   : > { %8889 = vmatprep.subr.bf16.mxu0 %v11339_v29  ;;  %v4146_v50 = vand.u32 4294901760, %v3400_v7  ;;  %v4306_v60 = vand.u32 4294901760, %v11631_v35 }
 0x45b   : > { %8891 = vmatpush3.bf16.msra.mxu0 %v11339_v29  ;;  %v11501_v29 = vpack.c.bf16 %v4140_v11, %v4137_v0  ;;  %v4251_v0 = vsub.f32 %v11562_v10, %v4250_v47  ;;  %v4258_v11 = vsub.f32 %v11564_v48, %v12192_v17 }
 0x45c   : > { %8893 = vmatprep.subr.bf16.mxu0 %v11341_v27 }
 0x45d   : > { %v4252_v62 = vand.u32 4294901760, %v4251_v0  ;;  %v4259_v33 = vand.u32 4294901760, %v4258_v11 }
 0x45f   : > { %8895 = vmatpush3.bf16.msra.mxu0 %v11341_v27  ;;  %v4143_v27 = vand.u32 4294901760, %v3399_v45 }
 0x460   : > { %8897 = vmatprep.subr.bf16.mxu0 %v11485_v16 }
 0x461   : > { %v11517_v39 = vpack.c.bf16 %v4146_v50, %v4143_v27  ;;  %v11593_v49 = vsub.f32 %v3399_v45, %v4143_v27  ;;  %v4272_v45 = vsub.f32 %v11568_v41, %v12191_v63 }
 0x462   : > { %7658 = vmatmul.mubr.f32.vlgmr.msra.gmra.mrb[2].mxu0 %v11393_v51  ;;  %v4152_v51 = vand.u32 4294901760, %v11505_v30 }
 0x463   : > { %8899 = vmatpush3.bf16.msra.mxu0 %v11485_v16  ;;  %7692 = vmatprep.mubr.f32.mxu0 %v4203_v19  ;;  %v11595_v19 = vsub.f32 %v3400_v7, %v4146_v50  ;;  %v4278_v7 = vand.u32 4294901760, %v11593_v49  ;;  %v11614_v50 = vsub.f32 %v11503_v3, %v4149_v37  ;;  %v4273_v63 = vand.u32 4294901760, %v4272_v45 }
 0x464   : > { %8901 = vmatprep.subr.bf16.mxu0 %v11492_v9  ;;  %v11530_v56 = vpack.c.bf16 %v4152_v51, %v4149_v37  ;;  %v11617_v57 = vsub.f32 %v11505_v30, %v4152_v51  ;;  %v8936_v51 = vpack.c.bf16 %v4259_v33, %v4252_v62  ;;  %v4307_v45 = vsub.f32 %v11631_v35, %v4306_v60 }
 0x465   : > { %v4285_v27 = vand.u32 4294901760, %v11595_v19  ;;  %v4279_v17 = vsub.f32 %v11593_v49, %v4278_v7  ;;  %v4292_v30 = vand.u32 4294901760, %v11614_v50  ;;  %v8940_v21 = vpack.c.bf16 %v4273_v63, %v4266_v42 }
 0x466   : > { %v4299_v37 = vand.u32 4294901760, %v11617_v57 }
 0x467   : > { %8903 = vmatpush3.bf16.msra.mxu0 %v11492_v9  ;;  %v4286_v3 = vsub.f32 %v11595_v19, %v4285_v27  ;;  %v4280_v55 = vand.u32 4294901760, %v4279_v17  ;;  %v4293_v11 = vsub.f32 %v11614_v50, %v4292_v30 }
 0x468   : > { %8905 = vmatprep.subr.bf16.mxu0 %v11497_v58  ;;  %v4300_v31 = vsub.f32 %v11617_v57, %v4299_v37 }
 0x469   : > { %v4287_v0 = vand.u32 4294901760, %v4286_v3  ;;  %v4294_v42 = vand.u32 4294901760, %v4293_v11  ;;  %v8964_v11 = vpack.c.bf16 %v11538_v2, %v11536_v40  ;;  %v9040_v2 = vpack.c.bf16 %v4285_v27, %v4278_v7 }
 0x46a   : > { %v4301_v63 = vand.u32 4294901760, %v4300_v31  ;;  %v8968_v31 = vpack.c.bf16 %v11564_v48, %v11562_v10  ;;  %v11758_v10 = vand.u32 4294901760, %v11383_v18 }
 0x46b   : > { %8907 = vmatpush3.bf16.msra.mxu0 %v11497_v58  ;;  %v8944_v17 = vpack.c.bf16 %v4287_v0, %v4280_v55  ;;  %v8960_v0 = vpack.c.bf16 %v11514_v12, %v11512_v22  ;;  %v12280_v22 = vand.u32 4294901760, %v11564_v48 }
 0x46c   : > { %8909 = vmatprep.subr.bf16.mxu0 %v11501_v29 }
 0x46d   : > { %v9032_v12 = vpack.c.bf16 %v12280_v22, %v4250_v47 }
 0x46f   : > { %8911 = vmatpush3.bf16.msra.mxu0 %v11501_v29 }
 0x470   : > { %8913 = vmatprep.subr.bf16.mxu0 %v11517_v39 }
 0x473   : > { %8915 = vmatpush3.bf16.msra.mxu0 %v11517_v39 }
 0x474   : > { %8917 = vmatprep.subr.bf16.mxu0 %v11530_v56 }
 0x477   : > { %8919 = vmatpush3.bf16.msra.mxu0 %v11530_v56 }
 0x478   : > { %8921 = vmatprep.subr.bf16.mxu0 %v11548_v34 }
 0x47b   : > { %8923 = vmatpush3.bf16.msra.mxu0 %v11548_v34 }
 0x47c   : > { %8925 = vmatprep.subr.bf16.mxu0 %v11575_v32 }
 0x47f   : > { %8927 = vmatpush3.bf16.msra.mxu0 %v11575_v32 }
 0x480   : > { %8929 = vmatprep.subr.bf16.mxu0 %v8928_v38 }
 0x482   : > { %7693 = vmatmul.mubr.f32.vlgmr.msra.gmra.mrb[2].mxu0 %v4213_v59 }
 0x483   : > { %8931 = vmatpush3.bf16.msra.mxu0 %v8928_v38  ;;  %7727 = vmatprep.mubr.f32.mxu0 %v11472_v61  ;;  %v11636_v38 = vsub.f32 %v11510_v20, %v4158_v5  ;;  %v11649_v20 = vsub.f32 %v11532_v54, %v4161_v28  ;;  %v11654_v5 = vsub.f32 %v11534_v6, %v4164_v15  ;;  %v4308_v15 = vand.u32 4294901760, %v4307_v45 }
 0x484   : > { %8933 = vmatprep.subr.bf16.mxu0 %v8932_v53  ;;  %v8948_v6 = vpack.c.bf16 %v4301_v63, %v4294_v42  ;;  %v8976_v42 = vpack.c.bf16 %v11595_v19, %v11593_v49  ;;  %v8980_v63 = vpack.c.bf16 %v11617_v57, %v11614_v50  ;;  %v4808_v49 = vld [vmem:[#allocation7 + $0x128] sm:$0xff]  ;;  %v4809_v50 = vld [vmem:[#allocation7 + $0x130] sm:$0xff]  ;;  %v4810_v57 = vld [vmem:[#allocation7 + $0x138] sm:$0xff] }
 0x485   : > { %v4313_v14 = vand.u32 4294901760, %v11636_v38  ;;  %v4320_v54 = vand.u32 4294901760, %v11649_v20  ;;  %v4327_v28 = vand.u32 4294901760, %v11654_v5  ;;  %v8984_v45 = vpack.c.bf16 %v11636_v38, %v11631_v35  ;;  %v4811_v35 = vld [vmem:[#allocation7 + $0x140] sm:$0xff] }
 0x487   : > { %8935 = vmatpush3.bf16.msra.mxu0 %v8932_v53  ;;  %v4314_v59 = vsub.f32 %v11636_v38, %v4313_v14  ;;  %v4321_v62 = vsub.f32 %v11649_v20, %v4320_v54  ;;  %v4328_v33 = vsub.f32 %v11654_v5, %v4327_v28  ;;  %v4812_v38 = vld [vmem:[#allocation7 + $0x148] sm:$0xff] }
 0x488   : > { %8937 = vmatprep.subr.bf16.mxu0 %v8936_v51 }
 0x489   : > { %v4315_v53 = vand.u32 4294901760, %v4314_v59  ;;  %v4329_v55 = vand.u32 4294901760, %v4328_v33  ;;  %v8988_v59 = vpack.c.bf16 %v11654_v5, %v11649_v20  ;;  %v4854_v20 = vand.u32 4294901760, %v4812_v38  ;;  %v11791_v5 = vld [vmem:[#allocation7 + $0x158] sm:$0xff] }
 0x48b   : > { %8939 = vmatpush3.bf16.msra.mxu0 %v8936_v51  ;;  %v8952_v3 = vpack.c.bf16 %v4315_v53, %v4308_v15  ;;  %v4322_v51 = vand.u32 4294901760, %v4321_v62 }
 0x48c   : > { %8941 = vmatprep.subr.bf16.mxu0 %v8940_v21 }
 0x48f   : > { %8943 = vmatpush3.bf16.msra.mxu0 %v8940_v21  ;;  %v8956_v21 = vpack.c.bf16 %v4329_v55, %v4322_v51  ;;  %v4860_v51 = vand.u32 4294901760, %v11791_v5  ;;  %v11808_v55 = vand.u32 4294901760, %v11390_v4 }
 0x490   : > { %8945 = vmatprep.subr.bf16.mxu0 %v8944_v17 }
 0x493   : > { %8947 = vmatpush3.bf16.msra.mxu0 %v8944_v17  ;;  %v8972_v17 = vpack.c.bf16 %v11568_v41, %v11566_v13 }
 0x494   : > { %8949 = vmatprep.subr.bf16.mxu0 %v8948_v6 }
 0x497   : > { %8951 = vmatpush3.bf16.msra.mxu0 %v8948_v6 }
 0x498   : > { %8953 = vmatprep.subr.bf16.mxu0 %v8952_v3 }
 0x49b   : > { %8955 = vmatpush3.bf16.msra.mxu0 %v8952_v3 }
 0x49c   : > { %8957 = vmatprep.subr.bf16.mxu0 %v8956_v21 }
 0x49f   : > { %8959 = vmatpush3.bf16.msra.mxu0 %v8956_v21 }
 0x4a0   : > { %8961 = vmatprep.subr.bf16.mxu0 %v8960_v0 }
 0x4a2   : > { %7728 = vmatmul.mubr.f32.vlgmr.msra.gmra.mrb[2].mxu0 %v11522_v43 }
 0x4a3   : > { %8963 = vmatpush3.bf16.msra.mxu0 %v8960_v0  ;;  %7762 = vmatprep.mubr.f32.mxu0 %v11478_v1  ;;  %v9024_v1 = vpack.c.bf16 %v4229_v8, %v4222_v52  ;;  %v12281_v52 = vand.u32 4294901760, %v11566_v13  ;;  %v12282_v8 = vand.u32 4294901760, %v11568_v41  ;;  %v4805_v13 = vld [vmem:[#allocation7 + $0x110] sm:$0xff]  ;;  %v4806_v41 = vld [vmem:[#allocation7 + $0x118] sm:$0xff] }
 0x4a4   : > { %8965 = vmatprep.subr.bf16.mxu0 %v8964_v11  ;;  %v4836_v47 = vand.u32 4294901760, %v4806_v41 }
 0x4a5   : > { %v9036_v40 = vpack.c.bf16 %v12282_v8, %v12281_v52 }
 0x4a7   : > { %8967 = vmatpush3.bf16.msra.mxu0 %v8964_v11 }
 0x4a8   : > { %8969 = vmatprep.subr.bf16.mxu0 %v8968_v31 }
 0x4ab   : > { %8971 = vmatpush3.bf16.msra.mxu0 %v8968_v31 }
 0x4ac   : > { %8973 = vmatprep.subr.bf16.mxu0 %v8972_v17 }
 0x4af   : > { %8975 = vmatpush3.bf16.msra.mxu0 %v8972_v17 }
 0x4b0   : > { %8977 = vmatprep.subr.bf16.mxu0 %v8976_v42 }
 0x4b3   : > { %8979 = vmatpush3.bf16.msra.mxu0 %v8976_v42  ;;  %v11818_v42 = vld [vmem:[#allocation7 + $0x170] sm:$0xff] }
 0x4b4   : > { %8981 = vmatprep.subr.bf16.mxu0 %v8980_v63  ;;  %v4869_v22 = vand.u32 4294901760, %v11818_v42 }
 0x4b7   : > { %8983 = vmatpush3.bf16.msra.mxu0 %v8980_v63  ;;  %v11820_v63 = vld [vmem:[#allocation7 + $0x178] sm:$0xff] }
 0x4b8   : > { %8985 = vmatprep.subr.bf16.mxu0 %v8984_v45 }
 0x4bb   : > { %8987 = vmatpush3.bf16.msra.mxu0 %v8984_v45 }
 0x4bc   : > { %8989 = vmatprep.subr.bf16.mxu0 %v8988_v59 }
 0x4bd   : > { %v11688_v6 = vpop.f32.mrb[8].mxu1 }
 0x4be   : > { %v11690_v15 = vpop.f32.mrb[9].mxu1 }
 0x4bf   : > { %8991 = vmatpush3.bf16.msra.mxu0 %v8988_v59  ;;  %v11824_v59 = vsub.f32 %v4806_v41, %v4836_v47 }
 0x4c0   : > { %8993 = vmatprep.subr.bf16.mxu0 %v11485_v16 }
 0x4c2   : > { %7763 = vmatmul.mubr.f32.vlgmr.msra.gmra.mrb[2].mxu0 %v11542_v23  ;;  %v9044_v23 = vpack.c.bf16 %v4299_v37, %v4292_v30  ;;  %v4845_v37 = vand.u32 4294901760, %v4809_v50 }
 0x4c3   : > { %8995 = vmatpush3.bf16.msra.mxu0 %v11485_v16  ;;  %7797 = vmatprep.mubr.f32.mxu0 %v4201_v24  ;;  %v9028_v24 = vpack.c.bf16 %v4243_v44, %v4236_v25  ;;  %v9048_v25 = vpack.c.bf16 %v4313_v14, %v4306_v60  ;;  %v9052_v44 = vpack.c.bf16 %v4327_v28, %v4320_v54  ;;  %v4851_v14 = vand.u32 4294901760, %v4811_v35  ;;  %v11794_v54 = vld [vmem:[#allocation7 + $0x160] sm:$0xff]  ;;  %v11796_v28 = vld [vmem:[#allocation7 + $0x168] sm:$0xff] }
 0x4c4   : > { %8997 = vmatprep.subr.bf16.mxu0 %v11492_v9  ;;  %v4863_v21 = vand.u32 4294901760, %v11794_v54  ;;  %v4866_v0 = vand.u32 4294901760, %v11796_v28 }
 0x4c5   : > { %v11803_v33 = vpack.c.bf16 %v4854_v20, %v4851_v14 }
 0x4c7   : > { %8999 = vmatpush3.bf16.msra.mxu0 %v11492_v9 }
 0x4c8   : > { %9001 = vmatprep.subr.bf16.mxu0 %v11497_v58 }
 0x4cb   : > { %9003 = vmatpush3.bf16.msra.mxu0 %v11497_v58 }
 0x4cc   : > { %9005 = vmatprep.subr.bf16.mxu0 %v11501_v29 }
 0x4cf   : > { %9007 = vmatpush3.bf16.msra.mxu0 %v11501_v29 }
 0x4d0   : > { %9009 = vmatprep.subr.bf16.mxu0 %v11517_v39 }
 0x4d3   : > { %9011 = vmatpush3.bf16.msra.mxu0 %v11517_v39 }
 0x4d4   : > { %9013 = vmatprep.subr.bf16.mxu0 %v11530_v56 }
 0x4d7   : > { %9015 = vmatpush3.bf16.msra.mxu0 %v11530_v56 }
 0x4d8   : > { %9017 = vmatprep.subr.bf16.mxu0 %v11548_v34 }
 0x4db   : > { %9019 = vmatpush3.bf16.msra.mxu0 %v11548_v34 }
 0x4dc   : > { %9021 = vmatprep.subr.bf16.mxu0 %v11575_v32 }
 0x4df   : > { %9023 = vmatpush3.bf16.msra.mxu0 %v11575_v32 }
 0x4e0   : > { %9025 = vmatprep.subr.bf16.mxu0 %v9024_v1 }
 0x4e2   : > { %7798 = vmatmul.mubr.f32.vlgmr.msra.gmra.mrb[2].mxu0 %v4211_v26  ;;  %v4833_v26 = vand.u32 4294901760, %v4805_v13 }
 0x4e3   : > { %9027 = vmatpush3.bf16.msra.mxu0 %v9024_v1  ;;  %7832 = vmatprep.mubr.f32.mxu0 %v11472_v61  ;;  %v11828_v1 = vsub.f32 %v11390_v4, %v11808_v55 }
 0x4e4   : > { %9029 = vmatprep.subr.bf16.mxu0 %v9028_v24  ;;  %v11778_v19 = vpack.c.bf16 %v4836_v47, %v4833_v26  ;;  %v11822_v45 = vsub.f32 %v4805_v13, %v4833_v26 }
 0x4e6   : > { %v4944_v8 = vand.u32 4294901760, %v11822_v45 }
 0x4e7   : > { %9031 = vmatpush3.bf16.msra.mxu0 %v9028_v24  ;;  %v11834_v24 = vpack.c.bf16 %v4866_v0, %v4863_v21 }
 0x4e8   : > { %9033 = vmatprep.subr.bf16.mxu0 %v9032_v12  ;;  %v4945_v13 = vsub.f32 %v11822_v45, %v4944_v8 }
 0x4eb   : > { %9035 = vmatpush3.bf16.msra.mxu0 %v9032_v12  ;;  %v4872_v12 = vand.u32 4294901760, %v11820_v63 }
 0x4ec   : > { %9037 = vmatprep.subr.bf16.mxu0 %v9036_v40 }
 0x4ef   : > { %9039 = vmatpush3.bf16.msra.mxu0 %v9036_v40  ;;  %v4951_v40 = vand.u32 4294901760, %v11824_v59 }
 0x4f0   : > { %9041 = vmatprep.subr.bf16.mxu0 %v9040_v2 }
 0x4f1   : > { %v4952_v41 = vsub.f32 %v11824_v59, %v4951_v40 }
 0x4f3   : > { %9043 = vmatpush3.bf16.msra.mxu0 %v9040_v2 }
 0x4f4   : > { %9045 = vmatprep.subr.bf16.mxu0 %v9044_v23 }
 0x4f7   : > { %9047 = vmatpush3.bf16.msra.mxu0 %v9044_v23 }
 0x4f8   : > { %9049 = vmatprep.subr.bf16.mxu0 %v9048_v25 }
 0x4fb   : > { %9051 = vmatpush3.bf16.msra.mxu0 %v9048_v25  ;;  %v11852_v25 = vsub.f32 %v4809_v50, %v4845_v37  ;;  %v4946_v50 = vand.u32 4294901760, %v4945_v13 }
 0x4fc   : > { %9053 = vmatprep.subr.bf16.mxu0 %v9052_v44 }
 0x4ff   : > { %9055 = vmatpush3.bf16.msra.mxu0 %v9052_v44 }
 0x500   : > { %9057 = vmatprep.subr.bf16.mxu0 %v11485_v16 }
 0x502   : > { %7833 = vmatmul.mubr.f32.vlgmr.msra.gmra.mrb[2].mxu0 %v11522_v43 }
 0x503   : > { %9059 = vmatpush3.bf16.msra.mxu0 %v11485_v16  ;;  %7867 = vmatprep.mubr.f32.mxu0 %v11472_v61  ;;  %v4803_v61 = vld [vmem:[#allocation7 + $0x100] sm:$0xff]  ;;  %v4804_v16 = vld [vmem:[#allocation7 + $0x108] sm:$0xff] }
 0x504   : > { %9061 = vmatprep.subr.bf16.mxu0 %v11492_v9 }
 0x507   : > { %9063 = vmatpush3.bf16.msra.mxu0 %v11492_v9  ;;  %v11764_v9 = vsub.f32 %v11383_v18, %v11758_v10 }
 0x508   : > { %9065 = vmatprep.subr.bf16.mxu0 %v11497_v58 }
 0x509   : > { %v4909_v48 = vand.u32 4294901760, %v11764_v9 }
 0x50b   : > { %9067 = vmatpush3.bf16.msra.mxu0 %v11497_v58  ;;  %v4827_v58 = vand.u32 4294901760, %v4803_v61  ;;  %v4910_v18 = vsub.f32 %v11764_v9, %v4909_v48 }
 0x50c   : > { %9069 = vmatprep.subr.bf16.mxu0 %v11501_v29 }
 0x50d   : > { %v4911_v27 = vand.u32 4294901760, %v4910_v18  ;;  %v11798_v53 = vsub.f32 %v4803_v61, %v4827_v58  ;;  %v11861_v61 = vpack.c.bf16 %v4872_v12, %v4869_v22  ;;  %v12193_v18 = vand.u32 4294901760, %v11852_v25 }
 0x50f   : > { %9071 = vmatpush3.bf16.msra.mxu0 %v11501_v29  ;;  %v4830_v29 = vand.u32 4294901760, %v4804_v16  ;;  %v4930_v11 = vand.u32 4294901760, %v11798_v53 }
 0x510   : > { %9073 = vmatprep.subr.bf16.mxu0 %v11517_v39 }
 0x511   : > { %v11800_v62 = vsub.f32 %v4804_v16, %v4830_v29  ;;  %v4931_v52 = vsub.f32 %v11798_v53, %v4930_v11  ;;  %v4919_v16 = vand.u32 4294901760, %v11828_v1 }
 0x513   : > { %9075 = vmatpush3.bf16.msra.mxu0 %v11517_v39  ;;  %v11771_v39 = vpack.c.bf16 %v4830_v29, %v4827_v58  ;;  %v4937_v31 = vand.u32 4294901760, %v11800_v62  ;;  %v4932_v58 = vand.u32 4294901760, %v4931_v52  ;;  %v4973_v52 = vsub.f32 %v11852_v25, %v12193_v18 }
 0x514   : > { %9077 = vmatprep.subr.bf16.mxu0 %v11530_v56 }
 0x515   : > { %v4938_v4 = vsub.f32 %v11800_v62, %v4937_v31  ;;  %v4974_v18 = vand.u32 4294901760, %v4973_v52 }
 0x517   : > { %9079 = vmatpush3.bf16.msra.mxu0 %v11530_v56  ;;  %v4807_v56 = vld [vmem:[#allocation7 + $0x120] sm:$0xff]  ;;  %v4939_v29 = vand.u32 4294901760, %v4938_v4  ;;  %v11903_v4 = vsub.f32 %v11791_v5, %v4860_v51 }
 0x518   : > { %9081 = vmatprep.subr.bf16.mxu0 %v11548_v34  ;;  %v4839_v7 = vand.u32 4294901760, %v4807_v56 }
 0x51a   : > { %v11848_v2 = vsub.f32 %v4807_v56, %v4839_v7 }
 0x51b   : > { %9083 = vmatpush3.bf16.msra.mxu0 %v11548_v34  ;;  %v4842_v34 = vand.u32 4294901760, %v4808_v49 }
 0x51c   : > { %9085 = vmatprep.subr.bf16.mxu0 %v11575_v32  ;;  %v4958_v26 = vand.u32 4294901760, %v11848_v2 }
 0x51d   : > { %v11783_v30 = vpack.c.bf16 %v4842_v34, %v4839_v7  ;;  %v11850_v23 = vsub.f32 %v4808_v49, %v4842_v34  ;;  %v4920_v49 = vsub.f32 %v11828_v1, %v4919_v16  ;;  %v9120_v7 = vpack.c.bf16 %v4939_v29, %v4932_v58 }
 0x51e   : > { %v11879_v34 = vsub.f32 %v4811_v35, %v4851_v14 }
 0x51f   : > { %9087 = vmatpush3.bf16.msra.mxu0 %v11575_v32  ;;  %v4848_v32 = vand.u32 4294901760, %v4810_v57  ;;  %v12195_v47 = vand.u32 4294901760, %v11850_v23  ;;  %v4921_v58 = vand.u32 4294901760, %v4920_v49  ;;  %v11917_v49 = vsub.f32 %v11794_v54, %v4863_v21 }
 0x520   : > { %9089 = vmatprep.subr.bf16.mxu0 %v11771_v39 }
 0x521   : > { %v11787_v60 = vpack.c.bf16 %v4848_v32, %v4845_v37  ;;  %v11854_v44 = vsub.f32 %v4810_v57, %v4848_v32  ;;  %v4953_v57 = vand.u32 4294901760, %v4952_v41  ;;  %v4959_v37 = vsub.f32 %v11848_v2, %v4958_v26 }
 0x522   : > { %7868 = vmatmul.mubr.f32.vlgmr.msra.gmra.mrb[2].mxu0 %v11522_v43  ;;  %v11789_v43 = vld [vmem:[#allocation7 + $0x150] sm:$0xff]  ;;  %v4966_v32 = vsub.f32 %v11850_v23, %v12195_v47  ;;  %v5014_v54 = vand.u32 4294901760, %v11917_v49 }
 0x523   : > { %9091 = vmatpush3.bf16.msra.mxu0 %v11771_v39  ;;  %7902 = vmatprep.mubr.f32.mxu0 %v4911_v27  ;;  %v4857_v3 = vand.u32 4294901760, %v11789_v43  ;;  %v12194_v56 = vand.u32 4294901760, %v11854_v44  ;;  %v11881_v27 = vsub.f32 %v4812_v38, %v4854_v20  ;;  %v4986_v38 = vand.u32 4294901760, %v11879_v34 }
 0x524   : > { %9093 = vmatprep.subr.bf16.mxu0 %v11778_v19  ;;  %v9124_v29 = vpack.c.bf16 %v4953_v57, %v4946_v50  ;;  %v4960_v13 = vand.u32 4294901760, %v4959_v37  ;;  %v4967_v41 = vand.u32 4294901760, %v4966_v32 }
 0x525   : > { %v11816_v17 = vpack.c.bf16 %v4860_v51, %v4857_v3  ;;  %v4980_v35 = vsub.f32 %v11854_v44, %v12194_v56  ;;  %v4993_v14 = vand.u32 4294901760, %v11881_v27  ;;  %v11900_v20 = vsub.f32 %v11789_v43, %v4857_v3 }
 0x526   : > { %v4987_v47 = vsub.f32 %v11879_v34, %v4986_v38  ;;  %v5007_v3 = vand.u32 4294901760, %v11903_v4  ;;  %v9128_v51 = vpack.c.bf16 %v4967_v41, %v4960_v13 }
 0x527   : > { %9095 = vmatpush3.bf16.msra.mxu0 %v11778_v19  ;;  %v4981_v56 = vand.u32 4294901760, %v4980_v35  ;;  %v4994_v43 = vsub.f32 %v11881_v27, %v4993_v14  ;;  %v5000_v5 = vand.u32 4294901760, %v11900_v20  ;;  %v5015_v35 = vsub.f32 %v11917_v49, %v5014_v54 }
 0x528   : > { %9097 = vmatprep.subr.bf16.mxu0 %v11783_v30  ;;  %v4988_v57 = vand.u32 4294901760, %v4987_v47  ;;  %v5008_v52 = vsub.f32 %v11903_v4, %v5007_v3 }
 0x529   : > { %v9132_v50 = vpack.c.bf16 %v4981_v56, %v4974_v18  ;;  %v4995_v37 = vand.u32 4294901760, %v4994_v43  ;;  %v5001_v32 = vsub.f32 %v11900_v20, %v5000_v5 }
 0x52a   : > { %v5009_v56 = vand.u32 4294901760, %v5008_v52  ;;  %v9160_v52 = vpack.c.bf16 %v11850_v23, %v11848_v2 }
 0x52b   : > { %9099 = vmatpush3.bf16.msra.mxu0 %v11783_v30  ;;  %v9136_v47 = vpack.c.bf16 %v4995_v37, %v4988_v57  ;;  %v5002_v18 = vand.u32 4294901760, %v5001_v32  ;;  %v9152_v37 = vpack.c.bf16 %v11800_v62, %v11798_v53  ;;  %v9156_v32 = vpack.c.bf16 %v11824_v59, %v11822_v45 }
 0x52c   : > { %9101 = vmatprep.subr.bf16.mxu0 %v11787_v60  ;;  %v12283_v53 = vand.u32 4294901760, %v11850_v23  ;;  %v9232_v59 = vpack.c.bf16 %v4993_v14, %v4986_v38 }
 0x52e   : > { %v9224_v62 = vpack.c.bf16 %v12283_v53, %v4958_v26 }
 0x52f   : > { %9103 = vmatpush3.bf16.msra.mxu0 %v11787_v60 }
 0x530   : > { %9105 = vmatprep.subr.bf16.mxu0 %v11803_v33 }
 0x533   : > { %9107 = vmatpush3.bf16.msra.mxu0 %v11803_v33 }
 0x534   : > { %9109 = vmatprep.subr.bf16.mxu0 %v11816_v17 }
 0x537   : > { %9111 = vmatpush3.bf16.msra.mxu0 %v11816_v17 }
 0x538   : > { %9113 = vmatprep.subr.bf16.mxu0 %v11834_v24 }
 0x53b   : > { %9115 = vmatpush3.bf16.msra.mxu0 %v11834_v24 }
 0x53c   : > { %9117 = vmatprep.subr.bf16.mxu0 %v11861_v61 }
 0x53f   : > { %9119 = vmatpush3.bf16.msra.mxu0 %v11861_v61 }
 0x540   : > { %9121 = vmatprep.subr.bf16.mxu0 %v9120_v7 }
 0x542   : > { %7903 = vmatmul.mubr.f32.vlgmr.msra.gmra.mrb[2].mxu0 %v4921_v58 }
 0x543   : > { %9123 = vmatpush3.bf16.msra.mxu0 %v9120_v7  ;;  %7937 = vmatprep.mubr.f32.mxu0 %v11758_v10  ;;  %v11922_v7 = vsub.f32 %v11796_v28, %v4866_v0  ;;  %v11935_v28 = vsub.f32 %v11818_v42, %v4869_v22  ;;  %v11940_v0 = vsub.f32 %v11820_v63, %v4872_v12  ;;  %v5016_v12 = vand.u32 4294901760, %v5015_v35 }
 0x544   : > { %9125 = vmatprep.subr.bf16.mxu0 %v9124_v29  ;;  %v9140_v63 = vpack.c.bf16 %v5009_v56, %v5002_v18  ;;  %v9168_v18 = vpack.c.bf16 %v11881_v27, %v11879_v34  ;;  %v9172_v56 = vpack.c.bf16 %v11903_v4, %v11900_v20 }
 0x545   : > { %v5021_v21 = vand.u32 4294901760, %v11922_v7  ;;  %v5028_v42 = vand.u32 4294901760, %v11935_v28  ;;  %v5035_v22 = vand.u32 4294901760, %v11940_v0  ;;  %v9176_v35 = vpack.c.bf16 %v11922_v7, %v11917_v49 }
 0x547   : > { %9127 = vmatpush3.bf16.msra.mxu0 %v9124_v29  ;;  %v5022_v58 = vsub.f32 %v11922_v7, %v5021_v21  ;;  %v5029_v13 = vsub.f32 %v11935_v28, %v5028_v42  ;;  %v5036_v41 = vsub.f32 %v11940_v0, %v5035_v22 }
 0x548   : > { %9129 = vmatprep.subr.bf16.mxu0 %v9128_v51 }
 0x549   : > { %v5023_v29 = vand.u32 4294901760, %v5022_v58  ;;  %v5037_v57 = vand.u32 4294901760, %v5036_v41  ;;  %v9180_v58 = vpack.c.bf16 %v11940_v0, %v11935_v28 }
 0x54b   : > { %9131 = vmatpush3.bf16.msra.mxu0 %v9128_v51  ;;  %v9144_v43 = vpack.c.bf16 %v5023_v29, %v5016_v12  ;;  %v5030_v51 = vand.u32 4294901760, %v5029_v13 }
 0x54c   : > { %9133 = vmatprep.subr.bf16.mxu0 %v9132_v50 }
 0x54f   : > { %9135 = vmatpush3.bf16.msra.mxu0 %v9132_v50  ;;  %v9148_v50 = vpack.c.bf16 %v5037_v57, %v5030_v51 }
 0x550   : > { %9137 = vmatprep.subr.bf16.mxu0 %v9136_v47 }
 0x553   : > { %9139 = vmatpush3.bf16.msra.mxu0 %v9136_v47  ;;  %v9164_v47 = vpack.c.bf16 %v11854_v44, %v11852_v25 }
 0x554   : > { %9141 = vmatprep.subr.bf16.mxu0 %v9140_v63 }
 0x557   : > { %9143 = vmatpush3.bf16.msra.mxu0 %v9140_v63 }
 0x558   : > { %9145 = vmatprep.subr.bf16.mxu0 %v9144_v43 }
 0x55b   : > { %9147 = vmatpush3.bf16.msra.mxu0 %v9144_v43 }
 0x55c   : > { %9149 = vmatprep.subr.bf16.mxu0 %v9148_v50 }
 0x55f   : > { %9151 = vmatpush3.bf16.msra.mxu0 %v9148_v50 }
 0x560   : > { %9153 = vmatprep.subr.bf16.mxu0 %v9152_v37 }
 0x562   : > { %7938 = vmatmul.mubr.f32.vlgmr.msra.gmra.mrb[2].mxu0 %v11808_v55 }
 0x563   : > { %9155 = vmatpush3.bf16.msra.mxu0 %v9152_v37  ;;  %7972 = vmatprep.mubr.f32.mxu0 %v11764_v9  ;;  %v9216_v9 = vpack.c.bf16 %v4937_v31, %v4930_v11  ;;  %v12284_v11 = vand.u32 4294901760, %v11852_v25  ;;  %v12285_v31 = vand.u32 4294901760, %v11854_v44 }
 0x564   : > { %9157 = vmatprep.subr.bf16.mxu0 %v9156_v32 }
 0x565   : > { %v9228_v45 = vpack.c.bf16 %v12285_v31, %v12284_v11 }
 0x567   : > { %9159 = vmatpush3.bf16.msra.mxu0 %v9156_v32 }
 0x568   : > { %9161 = vmatprep.subr.bf16.mxu0 %v9160_v52 }
 0x56b   : > { %9163 = vmatpush3.bf16.msra.mxu0 %v9160_v52 }
 0x56c   : > { %9165 = vmatprep.subr.bf16.mxu0 %v9164_v47 }
 0x56f   : > { %9167 = vmatpush3.bf16.msra.mxu0 %v9164_v47 }
 0x570   : > { %9169 = vmatprep.subr.bf16.mxu0 %v9168_v18 }
 0x573   : > { %9171 = vmatpush3.bf16.msra.mxu0 %v9168_v18 }
 0x574   : > { %9173 = vmatprep.subr.bf16.mxu0 %v9172_v56 }
 0x577   : > { %9175 = vmatpush3.bf16.msra.mxu0 %v9172_v56 }
 0x578   : > { %9177 = vmatprep.subr.bf16.mxu0 %v9176_v35 }
 0x57b   : > { %9179 = vmatpush3.bf16.msra.mxu0 %v9176_v35 }
 0x57c   : > { %9181 = vmatprep.subr.bf16.mxu0 %v9180_v58 }
 0x57f   : > { %9183 = vmatpush3.bf16.msra.mxu0 %v9180_v58 }
 0x580   : > { %9185 = vmatprep.subr.bf16.mxu0 %v11771_v39 }
 0x582   : > { %7973 = vmatmul.mubr.f32.vlgmr.msra.gmra.mrb[2].mxu0 %v11828_v1  ;;  %v9236_v1 = vpack.c.bf16 %v5007_v3, %v5000_v5 }
 0x583   : > { %9187 = vmatpush3.bf16.msra.mxu0 %v11771_v39  ;;  %8007 = vmatprep.mubr.f32.mxu0 %v4909_v48  ;;  %v9220_v48 = vpack.c.bf16 %v4951_v40, %v4944_v8  ;;  %v9240_v8 = vpack.c.bf16 %v5021_v21, %v5014_v54  ;;  %v9244_v40 = vpack.c.bf16 %v5035_v22, %v5028_v42 }
 0x584   : > { %9189 = vmatprep.subr.bf16.mxu0 %v11778_v19 }
 0x587   : > { %9191 = vmatpush3.bf16.msra.mxu0 %v11778_v19 }
 0x588   : > { %9193 = vmatprep.subr.bf16.mxu0 %v11783_v30 }
 0x58b   : > { %9195 = vmatpush3.bf16.msra.mxu0 %v11783_v30 }
 0x58c   : > { %9197 = vmatprep.subr.bf16.mxu0 %v11787_v60 }
 0x58f   : > { %9199 = vmatpush3.bf16.msra.mxu0 %v11787_v60 }
 0x590   : > { %9201 = vmatprep.subr.bf16.mxu0 %v11803_v33 }
 0x593   : > { %9203 = vmatpush3.bf16.msra.mxu0 %v11803_v33 }
 0x594   : > { %9205 = vmatprep.subr.bf16.mxu0 %v11816_v17 }
 0x597   : > { %9207 = vmatpush3.bf16.msra.mxu0 %v11816_v17 }
 0x598   : > { %9209 = vmatprep.subr.bf16.mxu0 %v11834_v24 }
 0x59b   : > { %9211 = vmatpush3.bf16.msra.mxu0 %v11834_v24 }
 0x59c   : > { %9213 = vmatprep.subr.bf16.mxu0 %v11861_v61 }
 0x59f   : > { %9215 = vmatpush3.bf16.msra.mxu0 %v11861_v61 }
 0x5a0   : > { %9217 = vmatprep.subr.bf16.mxu0 %v9216_v9 }
 0x5a2   : > { %8008 = vmatmul.mubr.f32.vlgmr.msra.gmra.mrb[2].mxu0 %v4919_v16 }
 0x5a3   : > { %9219 = vmatpush3.bf16.msra.mxu0 %v9216_v9  ;;  %8042 = vmatprep.mubr.f32.mxu0 %v11758_v10 }
 0x5a4   : > { %9221 = vmatprep.subr.bf16.mxu0 %v9220_v48 }
 0x5a7   : > { %9223 = vmatpush3.bf16.msra.mxu0 %v9220_v48 }
 0x5a8   : > { %9225 = vmatprep.subr.bf16.mxu0 %v9224_v62 }
 0x5ab   : > { %9227 = vmatpush3.bf16.msra.mxu0 %v9224_v62 }
 0x5ac   : > { %9229 = vmatprep.subr.bf16.mxu0 %v9228_v45 }
 0x5af   : > { %9231 = vmatpush3.bf16.msra.mxu0 %v9228_v45 }
 0x5b0   : > { %9233 = vmatprep.subr.bf16.mxu0 %v9232_v59 }
 0x5b3   : > { %9235 = vmatpush3.bf16.msra.mxu0 %v9232_v59 }
 0x5b4   : > { %9237 = vmatprep.subr.bf16.mxu0 %v9236_v1 }
 0x5b7   : > { %9239 = vmatpush3.bf16.msra.mxu0 %v9236_v1 }
 0x5b8   : > { %9241 = vmatprep.subr.bf16.mxu0 %v9240_v8 }
 0x5bb   : > { %9243 = vmatpush3.bf16.msra.mxu0 %v9240_v8 }
 0x5bc   : > { %9245 = vmatprep.subr.bf16.mxu0 %v9244_v40 }
 0x5bf   : > { %9247 = vmatpush3.bf16.msra.mxu0 %v9244_v40 }
 0x5c0   : > { %9249 = vmatprep.subr.bf16.mxu0 %v11771_v39 }
 0x5c2   : > { %8043 = vmatmul.mubr.f32.vlgmr.msra.gmra.mrb[2].mxu0 %v11808_v55 }
 0x5c3   : > { %9251 = vmatpush3.bf16.msra.mxu0 %v11771_v39  ;;  %8077 = vmatprep.mubr.f32.mxu0 %v11758_v10  ;;  %v5718_v10 = vld [vmem:[%s12120_s4 + $0x2] ss:$0 sm:$0xff] }
 0x5c4   : > { %9253 = vmatprep.subr.bf16.mxu0 %v11778_v19 }
 0x5c7   : > { %9255 = vmatpush3.bf16.msra.mxu0 %v11778_v19 }
 0x5c8   : > { %9257 = vmatprep.subr.bf16.mxu0 %v11783_v30 }
 0x5cb   : > { %9259 = vmatpush3.bf16.msra.mxu0 %v11783_v30 }
 0x5cc   : > { %9261 = vmatprep.subr.bf16.mxu0 %v11787_v60 }
 0x5cf   : > { %9263 = vmatpush3.bf16.msra.mxu0 %v11787_v60  ;;  %v5719_v60 = vld [vmem:[%s12120_s4 + $0x3] ss:$0 sm:$0xff] }
 0x5d0   : > { %9265 = vmatprep.subr.bf16.mxu0 %v11803_v33 }
 0x5d3   : > { %9267 = vmatpush3.bf16.msra.mxu0 %v11803_v33 }
 0x5d4   : > { %9269 = vmatprep.subr.bf16.mxu0 %v11816_v17 }
 0x5d7   : > { %9271 = vmatpush3.bf16.msra.mxu0 %v11816_v17 }
 0x5d8   : > { %9273 = vmatprep.subr.bf16.mxu0 %v11834_v24 }
 0x5db   : > { %9275 = vmatpush3.bf16.msra.mxu0 %v11834_v24 }
 0x5dc   : > { %9277 = vmatprep.subr.bf16.mxu0 %v11861_v61 }
 0x5df   : > { %9279 = vmatpush3.bf16.msra.mxu0 %v11861_v61 }
 0x5e2   : > { %8078 = vmatmul.mubr.f32.vlgmr.msra.gmra.mrb[2].mxu0 %v11808_v55 }
 0x6b5   : > { %v8079_v39 = vpop.f32.mrb[2].mxu0 }
 0x6b6   : > { %v9284_v19 = vadd.f32 %v8079_v39, %v11688_v6  ;;  %v5500_v30 = vpop.f32.mrb[3].mxu0 }
 0x6b7   : > { %v9285_v33 = vadd.f32 %v5500_v30, %v11690_v15 }
 0x6b8   : > { %v5517_v17 = vmul.f32 %v9284_v19, %v5718_v10 }
 0x6b9   : > { %v5516_v24 = vmul.f32 %v9285_v33, %v5718_v10 }
 0x6ba   : > { %v5523_v55 = vadd.f32 %v5719_v60, %v5517_v17 }
 0x6bb   : > { %v5522_v2 = vadd.f32 %v5719_v60, %v5516_v24 }
 0x6bc   : > { %v5525_v23 = vmax.f32 %v5523_v55, 0.0 }
 0x6bd   : > { %v5524_v25 = vmax.f32 %v5522_v2, 0.0 }
 0x6be   : > { %v5527_v6 = vadd.f32 %v10771_v36, %v5525_v23 }
 0x6bf   : > { %v5526_v15 = vadd.f32 %v10774_v46, %v5524_v25 }
 0x6c0   : > { %5529 = vst [vmem:[%s9896_s10 + $0x8] sm:$0xff] %v5527_v6 }
 0x6c1   : > { %5528 = vst [vmem:[%s9896_s10] sm:$0xff] %v5526_v15 }
 0x6c2   : > { %9621 = shalt.err (!%p9618_p5)
}
 0x6c3   : > { %s9622_s11 = scalar_lea.hbm %s12061_s14, 256  ;;  %s9626_s27 = scalar_lea.hbm %s12121_s5, 512 }
 0x6c4   : > { %p9623_p6 = scmp.ne.s32.totalorder %s12061_s14, %s9622_s11  ;;  %p9627_p12 = scmp.lt.u32.totalorder %s12061_s14, %s12121_s5 }
 0x6c5   : > { %p9628_p4 = scmp.lt.u32.totalorder %s9626_s27, %s9622_s11  ;;  %p9630_p13 = scmp.lt.u32.totalorder %s9622_s11, %s12061_s14 }
 0x6c6   : > { %p9624_p7 = pnand %p9623_p6, %p12286_p8 }
 0x6c7   : > { %p9629_p1 = por %p9628_p4, %p9627_p12 }
 0x6c8   : > { %p9625_p9 = pneg %p9624_p7 }
 0x6c9   : > { %p9631_p10 = por %p9630_p13, %p9629_p1 }
 0x6cb   : > { %p9632_p11 = pnand %p9631_p10, %p9625_p9 }
 0x6cd   : > { %9635 = shalt.err (!%p9632_p11)
}
 0x6ce   : > { %s9707_s15 = smov 128   ;;  %s9708_s13 = smov 8  }
 0x6cf   : > { %9440 = dma.vmem_to_hbm [thread:$0]  (%p12286_p8), %s12063_s25, 256, %s12061_s14, %s12070_s21, %s9707_s15, %s9707_s15, %s9708_s13  }
 0x6d0 PF: > { %p9462_p0 = scmp.ge.s32.totalorder %s9696_s23, 2  ;;  %s5561_s2 = sand.u32 1, %s9676_s18  }
 0x6d1   : > { %p12287_p2 = scmp.ne.s32.totalorder %s12200_s30, 0  ;;  %s5562_s22 = scalar_lea.sflag [#allocation6], %s5561_s2 }
 0x6d3   : > { %p9453_p3 = pnand %p9462_p0, %p12287_p2 }
 0x6d5   : > { %9671 = dma.done.wait (!%p9453_p3), %s5562_s22, 256  }
 0x6d6   : > { %9673 = vsyncadd (!%p9453_p3), %s5562_s22, 4294967040  ;;  %s20_s23 = sadd.s32 1, %s9696_s23   ;;  %s12288_s21 = sld [smem:[#allocation17_spill]] }
 0x6d7   : > { %p17_p5 = scmp.ge.s32.totalorder %s20_s23, 4   ;;  %s12289_s22 = sld [smem:[#allocation18_spill]] }
 0x6d8   : > { %s12290_s18 = smov %s9680_s19  ;;  %s12291_s19 = smov %s9684_s20 }
 0x6d9   : > { %s12292_s20 = smov %s9792_s6  ;;  %19 = sbr.rel (!%p17_p5) target bundleno = 8 (0x8), region = 202 }
 0x6e0   :  { %5567 = vsyncpa [#allocation5], 1 }
 0x6e1   :  { %5569 = vsyncpa [#allocation5 + $0x1], 1 }
 0x6e2   :  { %5570 = vsyncpa [#allocation8], 1 }
 0x6e3   :  { %5571 = vsyncpa [#allocation6], 1 }
 0x6e4   :  { %5573 = vsyncpa [#allocation6 + $0x1], 1 }
 0x6e5   :  { %5574 = vsyncmov [#allocation3] }
 0x6e8   :  { %s5575_s28 = vpop.sfrf %5574 }
 0x6e9   :  { %p5725_p8 = scmp.ne.s32.totalorder %s5575_s28, 0 }
 0x6eb   :  { %5579 = shalt.err (%p5725_p8)  }
 0x6ec   :  { %5581 = vsyncmov [#allocation3 + $0x1] }
 0x6ef   :  { %s5582_s30 = vpop.sfrf %5581 }
 0x6f0   :  { %p5726_p6 = scmp.ne.s32.totalorder %s5582_s30, 0 }
 0x6f2   :  { %5586 = shalt.err (%p5726_p6)  }

</bundles_post_ra>
